<compile_context>
chip_gen: v6e
topology: v6e:2x2x1
jax: 0.10.0
libtpu: 0.0.40
codegen_flags: <defaults>
</compile_context>

<pallas_src>
import math
from functools import partial

import jax
import jax.numpy as jnp
from jax import lax
from jax.experimental import pallas as pl
from jax.experimental.pallas import tpu as pltpu

H = 64  # LSTM hidden size
BF16 = jnp.bfloat16


# --------------------------------------------------------------------------- #
# Fused Pallas kernel: 2-layer LSTM (time-chunked) + regression head
# --------------------------------------------------------------------------- #
def lstm_head_kernel(x_ref, wih0_ref, whh0_ref, bg0_ref, wih1_ref, whh1_ref,
                     bg1_ref, wlin_ref, blin_ref, wf1_ref, bf1_ref, wf2_ref,
                     bf2_ref, wf3_ref, bf3_ref, out_ref,
                     h1_ref, c1_ref, h2_ref, c2_ref, g_ref, hbuf_ref, *, bt):
    """One (batch-tile, time-chunk) grid step.

    x_ref:   (rows, 3)   rows = chunk_T * bt, row index = t*bt + b_in_tile
    out_ref: (rows, 4)   out[:, :3] = pred, out[:, 3] = y
    h*_ref / c*_ref: (bt, H) f32 carries, persist across time chunks.
    g_ref:   (rows, 4H) f32  batched gate pre-projection scratch.
    hbuf_ref:(rows, H)  f32  per-layer hidden buffer (layer0 then layer1).
    Weights pre-transposed (in, out); gate columns ordered [i, f, o, g];
    gate biases pre-summed; head padded so the output is one (rows,4) slab.
    """
    rows = x_ref.shape[0]
    ct = rows // bt  # timesteps in this chunk

    @pl.when(pl.program_id(1) == 0)                      # new batch tile
    def _init():
        h1_ref[...] = jnp.zeros_like(h1_ref)
        c1_ref[...] = jnp.zeros_like(c1_ref)
        h2_ref[...] = jnp.zeros_like(h2_ref)
        c2_ref[...] = jnp.zeros_like(c2_ref)

    def recurrence(whh_bf16, h0, c0):
        """Serial loop: only h @ Whh per step (input projection precomputed).

        Whh is bf16 (MXU-native), h cast to bf16 at the dot, accumulation and
        all elementwise gate math stay f32."""
        def body(t, carry):
            h, c = carry
            r = pl.multiple_of(t * bt, bt)
            gates = (g_ref[pl.ds(r, bt), :]
                     + jnp.dot(h.astype(BF16), whh_bf16,
                               preferred_element_type=jnp.float32))
            sig = jax.nn.sigmoid(gates[:, :3 * H])       # [ i | f | o ]
            g_t = jnp.tanh(gates[:, 3 * H:])             # g
            i_g = sig[:, 0 * H:1 * H]
            f_g = sig[:, 1 * H:2 * H]
            o_g = sig[:, 2 * H:3 * H]
            c_new = f_g * c + i_g * g_t
            h_new = o_g * jnp.tanh(c_new)
            hbuf_ref[pl.ds(r, bt), :] = h_new
            return h_new, c_new

        return lax.fori_loop(0, ct, body, (h0, c0), unroll=8)

    # ---- layer 0: batched input projection (K=3, f32), then recurrence --- #
    g_ref[...] = (jnp.dot(x_ref[...], wih0_ref[...],
                          preferred_element_type=jnp.float32) + bg0_ref[...])
    h1, c1 = recurrence(whh0_ref[...], h1_ref[...], c1_ref[...])
    h1_ref[...] = h1
    c1_ref[...] = c1

    # ---- layer 1: batched bf16 projection of layer-0 hiddens, recurrence - #
    g_ref[...] = (jnp.dot(hbuf_ref[...].astype(BF16), wih1_ref[...],
                          preferred_element_type=jnp.float32) + bg1_ref[...])
    h2, c2 = recurrence(whh1_ref[...], h2_ref[...], c2_ref[...])
    h2_ref[...] = h2
    c2_ref[...] = c2

    # ---- fused regression head on the whole chunk ------------------------ #
    hid = hbuf_ref[...]                                           # (rows, H) f32
    hid16 = hid.astype(BF16)
    # pred (padded to 4 lanes) kept only for the output slab / residual.
    p4 = (jnp.dot(hid, wlin_ref[...], preferred_element_type=jnp.float32)
          + blin_ref[...])                                        # (rows, 4)
    # fc1 with the 64->3 linear folded in (exact algebra).
    a1 = jnp.maximum(
        jnp.dot(hid16, wf1_ref[...], preferred_element_type=jnp.float32)
        + bf1_ref[...], 0.0)                                      # (rows, 256)
    a2 = jnp.maximum(
        jnp.dot(a1.astype(BF16), wf2_ref[...],
                preferred_element_type=jnp.float32) + bf2_ref[...], 0.0)
    out_ref[...] = (p4
                    + jnp.dot(a2, wf3_ref[...],
                              preferred_element_type=jnp.float32)
                    + bf3_ref[...])


# --------------------------------------------------------------------------- #
# One-time parameter preparation (transpose / reorder / fold / pad / cast)
# --------------------------------------------------------------------------- #
def prepare_params(p):
    # torch gate order along 4H is [i, f, g, o]; kernel wants [i, f, o, g].
    perm = jnp.concatenate([jnp.arange(0, 2 * H),
                            jnp.arange(3 * H, 4 * H),
                            jnp.arange(2 * H, 3 * H)])

    def gate_w(w):                       # (4H, in) torch -> (in, 4H) reordered
        return w.T[:, perm]

    def gate_b(bih, bhh):
        return (bih + bhh)[perm].reshape(1, 4 * H)

    # Fold linear(64->3) into fc1(3->256): a1 = relu(hid @ wf1c + bf1c).
    wf1c = p["wlin"].T @ p["w1"].T                       # (64, 256)
    bf1c = p["blin"] @ p["w1"].T + p["b1"]               # (256,)

    return {
        "wih0": gate_w(p["wih0"]).astype(jnp.float32),   # (3, 4H)  keep f32
        "whh0": gate_w(p["whh0"]).astype(BF16),          # (H, 4H)  bf16 MXU
        "bg0": gate_b(p["bih0"], p["bhh0"]),
        "wih1": gate_w(p["wih1"]).astype(BF16),          # (H, 4H)
        "whh1": gate_w(p["whh1"]).astype(BF16),          # (H, 4H)
        "bg1": gate_b(p["bih1"], p["bhh1"]),
        # head, padded so out[:, :3] = pred, out[:, 3] = y in one slab
        "wlin4": jnp.pad(p["wlin"].T, ((0, 0), (0, 1))),         # (H, 4)  f32
        "blin4": jnp.pad(p["blin"], (0, 1)).reshape(1, 4),
        "wf1c": wf1c.astype(BF16),                               # (H, 256)
        "bf1c": bf1c.reshape(1, 256),
        "wf2": p["w2"].T.astype(BF16),                           # (256, 128)
        "bf2": p["b2"].reshape(1, 128),
        "wf3": jnp.pad(p["w3"].T, ((0, 0), (3, 0))),             # (128, 4) f32
        "bf3": jnp.pad(p["b3"], (3, 0)).reshape(1, 4),
    }


# --------------------------------------------------------------------------- #
# Wrapper
# --------------------------------------------------------------------------- #
def lstm_regr_forward(x, prep, *, chunk_t=None, batch_tiles=1):
    """x: (B, T, 3) f32  ->  (B, T, 4) f32  (matches torch LstmRegr.forward).

    batch_tiles > 1 adds a leading "parallel" grid axis over batch tiles
    (useful on v7x's 2 TensorCores when the batch is large); each tile keeps
    its own h/c carries so results are identical to batch_tiles=1.
    """
    B, T, _ = x.shape
    per_tile = -(-B // batch_tiles)
    bt = max(8, -(-per_tile // 8) * 8)          # batch rows per tile (sublanes)
    Bp = bt * batch_tiles

    if chunk_t is None:
        # Target rows ~ 8192: gate scratch ~8 MiB f32, hbuf ~2 MiB -- large
        # enough to amortize grid-step overhead, small enough for v7x VMEM.
        chunk_t = max(1, 8192 // bt)
    CT = min(chunk_t, T)
    Tp = -(-T // CT) * CT                       # pad time to a chunk multiple
    n_chunks = Tp // CT
    rows = CT * bt

    # (B,T,3) -> time-major, pad, split batch into tiles, flatten per tile.
    x_tm = jnp.transpose(x, (1, 0, 2))                           # (T, B, 3)
    x_tm = jnp.pad(x_tm, ((0, Tp - T), (0, Bp - B), (0, 0)))     # (Tp, Bp, 3)
    x2 = (x_tm.reshape(Tp, batch_tiles, bt, 3)
               .transpose(1, 0, 2, 3)
               .reshape(batch_tiles * Tp * bt, 3))

    w_order = ["wih0", "whh0", "bg0", "wih1", "whh1", "bg1",
               "wlin4", "blin4", "wf1c", "bf1c", "wf2", "bf2", "wf3", "bf3"]
    w_args = [prep[k] for k in w_order]

    # Explicit scoped-VMEM budget (defaults: 16 MiB v5e / 32 MiB v6e,v7x).
    vmem_need = (rows * 4 * H * 4            # gate pre-projection scratch (f32)
                 + rows * H * 4              # hidden buffer (f32)
                 + 2 * rows * (3 + 4) * 4    # double-buffered x / out blocks
                 + 4 * 1024 * 1024)          # weights, carries, headroom
    vmem_limit = int(min(56 * 1024 * 1024,
                         max(32 * 1024 * 1024, vmem_need)))

    out2 = pl.pallas_call(
        partial(lstm_head_kernel, bt=bt),
        out_shape=jax.ShapeDtypeStruct((batch_tiles * Tp * bt, 4), jnp.float32),
        grid=(batch_tiles, n_chunks),
        in_specs=[pl.BlockSpec((rows, 3), lambda b, i: (b * n_chunks + i, 0))]
                 + [pl.BlockSpec(a.shape, lambda b, i: (0, 0)) for a in w_args],
        out_specs=pl.BlockSpec((rows, 4), lambda b, i: (b * n_chunks + i, 0)),
        scratch_shapes=[
            pltpu.VMEM((bt, H), jnp.float32),        # h1 carry
            pltpu.VMEM((bt, H), jnp.float32),        # c1 carry
            pltpu.VMEM((bt, H), jnp.float32),        # h2 carry
            pltpu.VMEM((bt, H), jnp.float32),        # c2 carry
            pltpu.VMEM((rows, 4 * H), jnp.float32),  # gate pre-projection
            pltpu.VMEM((rows, H), jnp.float32),      # per-layer hidden buffer
        ],
        compiler_params=pltpu.CompilerParams(
            dimension_semantics=("parallel", "arbitrary"),
            vmem_limit_bytes=vmem_limit),
    )(x2, *w_args)

    out = (out2.reshape(batch_tiles, Tp, bt, 4)
               .transpose(1, 0, 2, 3)
               .reshape(Tp, Bp, 4)[:T, :B])                      # drop padding
    return jnp.transpose(out, (1, 0, 2))                         # (B, T, 4)


# --------------------------------------------------------------------------- #
# Deterministic parameter init (same shapes / init scheme as PyTorch defaults)
# --------------------------------------------------------------------------- #
def init_params(key):
    ks = jax.random.split(key, 18)

    def u(k, shape, bound):
        return jax.random.uniform(k, shape, jnp.float32, -bound, bound)

    kl = 1.0 / math.sqrt(H)
    return {
        # LSTM layer 0 (input_size=3)
        "wih0": u(ks[0], (4 * H, 3), kl), "whh0": u(ks[1], (4 * H, H), kl),
        "bih0": u(ks[2], (4 * H,), kl),   "bhh0": u(ks[3], (4 * H,), kl),
        # LSTM layer 1 (input_size=64)
        "wih1": u(ks[4], (4 * H, H), kl), "whh1": u(ks[5], (4 * H, H), kl),
        "bih1": u(ks[6], (4 * H,), kl),   "bhh1": u(ks[7], (4 * H,), kl),
        # linear: 64 -> 3
        "wlin": u(ks[8], (3, H), 1.0 / math.sqrt(H)),
        "blin": u(ks[9], (3,), 1.0 / math.sqrt(H)),
        # fc1: 3 -> 256
        "w1": u(ks[10], (256, 3), 1.0 / math.sqrt(3)),
        "b1": u(ks[11], (256,), 1.0 / math.sqrt(3)),
        # fc2: 256 -> 128
        "w2": u(ks[12], (128, 256), 1.0 / math.sqrt(256)),
        "b2": u(ks[13], (128,), 1.0 / math.sqrt(256)),
        # fc3: 128 -> 1
        "w3": u(ks[14], (1, 128), 1.0 / math.sqrt(128)),
        "b3": u(ks[15], (1,), 1.0 / math.sqrt(128)),
    }


# --------------------------------------------------------------------------- #
# Pure-JAX f32 reference (mirrors torch semantics) for verification
# --------------------------------------------------------------------------- #
def reference_forward(x, p):
    B, T, _ = x.shape

    def cell(x_t, h, c, wih, whh, b):
        gates = x_t @ wih.T + h @ whh.T + b
        i, f, g, o = jnp.split(gates, 4, axis=-1)
        c = jax.nn.sigmoid(f) * c + jax.nn.sigmoid(i) * jnp.tanh(g)
        h = jax.nn.sigmoid(o) * jnp.tanh(c)
        return h, c

    h1 = c1 = h2 = c2 = jnp.zeros((B, H), jnp.float32)
    b0 = p["bih0"] + p["bhh0"]
    bL1 = p["bih1"] + p["bhh1"]
    hs = []
    for t in range(T):
        h1, c1 = cell(x[:, t, :], h1, c1, p["wih0"], p["whh0"], b0)
        h2, c2 = cell(h1, h2, c2, p["wih1"], p["whh1"], bL1)
        hs.append(h2)
    hidden = jnp.stack(hs, axis=1)                               # (B, T, H)
    pred = hidden @ p["wlin"].T + p["blin"]
    a1 = jax.nn.relu(pred @ p["w1"].T + p["b1"])
    a2 = jax.nn.relu(a1 @ p["w2"].T + p["b2"])
    y = a2 @ p["w3"].T + p["b3"]
    return jnp.concatenate([pred, y], axis=2)                    # (B, T, 4)


if __name__ == "__main__":
    key = jax.random.PRNGKey(0)
    k_x, k_p, k_x2 = jax.random.split(key, 3)

    params = init_params(k_p)
    prep = prepare_params(params)

    # bf16 MXU operands (f32 accumulation) vs. f32 reference -> loose-ish tol.
    ATOL = RTOL = 3e-2

    # ---- small default case: B=2, T=8 (single chunk, single batch tile) --- #
    B, T = 2, 8
    x = jax.random.normal(k_x, (B, T, 3), jnp.float32)
    ref = jax.block_until_ready(reference_forward(x, params))

    out = jax.block_until_ready(lstm_regr_forward(x, prep))
    assert out.shape == (B, T, 4), out.shape
    assert jnp.allclose(out, ref, atol=ATOL, rtol=RTOL), (
        "mismatch vs reference", float(jnp.max(jnp.abs(out - ref))))

    # ---- multi-chunk path: exercises cross-chunk h/c carries in scratch --- #
    out_chunked = jax.block_until_ready(lstm_regr_forward(x, prep, chunk_t=4))
    assert jnp.allclose(out_chunked, ref, atol=ATOL, rtol=RTOL), (
        "chunked mismatch", float(jnp.max(jnp.abs(out_chunked - ref))))

    # ---- parallel batch-tile axis + time padding + batch padding ---------- #
    B2, T2 = 13, 10
    x_b = jax.random.normal(k_x2, (B2, T2, 3), jnp.float32)
    ref_b = jax.block_until_ready(reference_forward(x_b, params))
    out_b = jax.block_until_ready(
        lstm_regr_forward(x_b, prep, chunk_t=4, batch_tiles=2))
    assert out_b.shape == (B2, T2, 4), out_b.shape
    assert jnp.allclose(out_b, ref_b, atol=ATOL, rtol=RTOL), (
        "batch-tiled mismatch", float(jnp.max(jnp.abs(out_b - ref_b))))

    print("KERNEL_OK")
</pallas_src>

<mosaic_0001>
module attributes {stable_mosaic.version = 11 : i64} {
  func.func @lstm_head_kernel(%arg0: i32, %arg1: i32, %arg2: memref<64x3xf32, #tpu.memory_space<vmem>>, %arg3: memref<3x256xf32, #tpu.memory_space<vmem>>, %arg4: memref<64x256xbf16, #tpu.memory_space<vmem>>, %arg5: memref<1x256xf32, #tpu.memory_space<vmem>>, %arg6: memref<64x256xbf16, #tpu.memory_space<vmem>>, %arg7: memref<64x256xbf16, #tpu.memory_space<vmem>>, %arg8: memref<1x256xf32, #tpu.memory_space<vmem>>, %arg9: memref<64x4xf32, #tpu.memory_space<vmem>>, %arg10: memref<1x4xf32, #tpu.memory_space<vmem>>, %arg11: memref<64x256xbf16, #tpu.memory_space<vmem>>, %arg12: memref<1x256xf32, #tpu.memory_space<vmem>>, %arg13: memref<256x128xbf16, #tpu.memory_space<vmem>>, %arg14: memref<1x128xf32, #tpu.memory_space<vmem>>, %arg15: memref<128x4xf32, #tpu.memory_space<vmem>>, %arg16: memref<1x4xf32, #tpu.memory_space<vmem>>, %arg17: memref<64x4xf32, #tpu.memory_space<vmem>>, %arg18: memref<8x64xf32, #tpu.memory_space<vmem>>, %arg19: memref<8x64xf32, #tpu.memory_space<vmem>>, %arg20: memref<8x64xf32, #tpu.memory_space<vmem>>, %arg21: memref<8x64xf32, #tpu.memory_space<vmem>>, %arg22: memref<64x256xf32, #tpu.memory_space<vmem>>, %arg23: memref<64x64xf32, #tpu.memory_space<vmem>>) attributes {dimension_semantics = [#tpu.dimension_semantics<parallel>, #tpu.dimension_semantics<arbitrary>], iteration_bounds = array<i64: 1, 1>, scalar_prefetch = 0 : i64, scratch_operands = 6 : i64, tpu.core_type = #tpu.core_type<tc>, window_params = [{transform_indices = @transform_0, window_bounds = array<i64: 64, 3>}, {pipeline_mode = #tpu.pipeline_mode<synchronous>, transform_indices = @transform_1, window_bounds = array<i64: 3, 256>}, {pipeline_mode = #tpu.pipeline_mode<synchronous>, transform_indices = @transform_2, window_bounds = array<i64: 64, 256>}, {pipeline_mode = #tpu.pipeline_mode<synchronous>, transform_indices = @transform_3, window_bounds = array<i64: 1, 256>}, {pipeline_mode = #tpu.pipeline_mode<synchronous>, transform_indices = @transform_4, window_bounds = array<i64: 64, 256>}, {pipeline_mode = #tpu.pipeline_mode<synchronous>, transform_indices = @transform_5, window_bounds = array<i64: 64, 256>}, {pipeline_mode = #tpu.pipeline_mode<synchronous>, transform_indices = @transform_6, window_bounds = array<i64: 1, 256>}, {pipeline_mode = #tpu.pipeline_mode<synchronous>, transform_indices = @transform_7, window_bounds = array<i64: 64, 4>}, {pipeline_mode = #tpu.pipeline_mode<synchronous>, transform_indices = @transform_8, window_bounds = array<i64: 1, 4>}, {pipeline_mode = #tpu.pipeline_mode<synchronous>, transform_indices = @transform_9, window_bounds = array<i64: 64, 256>}, {pipeline_mode = #tpu.pipeline_mode<synchronous>, transform_indices = @transform_10, window_bounds = array<i64: 1, 256>}, {pipeline_mode = #tpu.pipeline_mode<synchronous>, transform_indices = @transform_11, window_bounds = array<i64: 256, 128>}, {pipeline_mode = #tpu.pipeline_mode<synchronous>, transform_indices = @transform_12, window_bounds = array<i64: 1, 128>}, {pipeline_mode = #tpu.pipeline_mode<synchronous>, transform_indices = @transform_13, window_bounds = array<i64: 128, 4>}, {pipeline_mode = #tpu.pipeline_mode<synchronous>, transform_indices = @transform_14, window_bounds = array<i64: 1, 4>}, {transform_indices = @transform_15, window_bounds = array<i64: 64, 4>}]} {
    %c0_i32 = arith.constant 0 : i32
    %0 = arith.cmpi eq, %arg1, %c0_i32 : i32
    %1 = arith.extui %0 : i1 to i32
    %c0_i32_0 = arith.constant 0 : i32
    %2 = arith.cmpi ne, %1, %c0_i32_0 : i32
    scf.if %2 {
      %cst_153 = arith.constant 0.000000e+00 : f32
      %457 = vector.broadcast %cst_153 : f32 to vector<8x64xf32>
      %c0_154 = arith.constant 0 : index
      %c0_155 = arith.constant 0 : index
      %458 = vector.load %arg18[%c0_154, %c0_155] : memref<8x64xf32, #tpu.memory_space<vmem>>, vector<8x64xf32>
      tpu.vector_store %arg18[%c0_154, %c0_155], %457 {strides = array<i32>} : memref<8x64xf32, #tpu.memory_space<vmem>>, vector<8x64xf32>,
      %cst_156 = arith.constant 0.000000e+00 : f32
      %459 = vector.broadcast %cst_156 : f32 to vector<8x64xf32>
      %c0_157 = arith.constant 0 : index
      %c0_158 = arith.constant 0 : index
      %460 = vector.load %arg19[%c0_157, %c0_158] : memref<8x64xf32, #tpu.memory_space<vmem>>, vector<8x64xf32>
      tpu.vector_store %arg19[%c0_157, %c0_158], %459 {strides = array<i32>} : memref<8x64xf32, #tpu.memory_space<vmem>>, vector<8x64xf32>,
      %cst_159 = arith.constant 0.000000e+00 : f32
      %461 = vector.broadcast %cst_159 : f32 to vector<8x64xf32>
      %c0_160 = arith.constant 0 : index
      %c0_161 = arith.constant 0 : index
      %462 = vector.load %arg20[%c0_160, %c0_161] : memref<8x64xf32, #tpu.memory_space<vmem>>, vector<8x64xf32>
      tpu.vector_store %arg20[%c0_160, %c0_161], %461 {strides = array<i32>} : memref<8x64xf32, #tpu.memory_space<vmem>>, vector<8x64xf32>,
      %cst_162 = arith.constant 0.000000e+00 : f32
      %463 = vector.broadcast %cst_162 : f32 to vector<8x64xf32>
      %c0_163 = arith.constant 0 : index
      %c0_164 = arith.constant 0 : index
      %464 = vector.load %arg21[%c0_163, %c0_164] : memref<8x64xf32, #tpu.memory_space<vmem>>, vector<8x64xf32>
      tpu.vector_store %arg21[%c0_163, %c0_164], %463 {strides = array<i32>} : memref<8x64xf32, #tpu.memory_space<vmem>>, vector<8x64xf32>,
    } else {
    }
    %c0 = arith.constant 0 : index
    %c0_1 = arith.constant 0 : index
    %3 = vector.load %arg2[%c0, %c0_1] : memref<64x3xf32, #tpu.memory_space<vmem>>, vector<64x3xf32>
    %c0_2 = arith.constant 0 : index
    %c0_3 = arith.constant 0 : index
    %4 = vector.load %arg3[%c0_2, %c0_3] : memref<3x256xf32, #tpu.memory_space<vmem>>, vector<3x256xf32>
    %cst = arith.constant dense<0.000000e+00> : vector<64x256xf32>
    %5 = tpu.matmul %3, %4, %cst {dimension_numbers = #tpu.dot_dimension_numbers<[1], [0], [0], [1], [0, 0, 1, 1], [], []>} : vector<64x3xf32>, vector<3x256xf32>, vector<64x256xf32> -> vector<64x256xf32>
    %c0_4 = arith.constant 0 : index
    %c0_5 = arith.constant 0 : index
    %6 = vector.load %arg5[%c0_4, %c0_5] : memref<1x256xf32, #tpu.memory_space<vmem>>, vector<1x256xf32>
    %7 = vector.broadcast %6 : vector<1x256xf32> to vector<64x256xf32>
    %8 = arith.addf %5, %7 : vector<64x256xf32>
    %c0_6 = arith.constant 0 : index
    %c0_7 = arith.constant 0 : index
    %9 = vector.load %arg22[%c0_6, %c0_7] : memref<64x256xf32, #tpu.memory_space<vmem>>, vector<64x256xf32>
    tpu.vector_store %arg22[%c0_6, %c0_7], %8 {strides = array<i32>} : memref<64x256xf32, #tpu.memory_space<vmem>>, vector<64x256xf32>,
    %c0_8 = arith.constant 0 : index
    %c0_9 = arith.constant 0 : index
    %10 = vector.load %arg4[%c0_8, %c0_9] : memref<64x256xbf16, #tpu.memory_space<vmem>>, vector<64x256xbf16>
    %c0_10 = arith.constant 0 : index
    %c0_11 = arith.constant 0 : index
    %11 = vector.load %arg18[%c0_10, %c0_11] : memref<8x64xf32, #tpu.memory_space<vmem>>, vector<8x64xf32>
    %c0_12 = arith.constant 0 : index
    %c0_13 = arith.constant 0 : index
    %12 = vector.load %arg19[%c0_12, %c0_13] : memref<8x64xf32, #tpu.memory_space<vmem>>, vector<8x64xf32>
    %c0_i32_14 = arith.constant 0 : i32
    %c8_i32 = arith.constant 8 : i32
    %13 = arith.muli %c0_i32_14, %c8_i32 : i32
    %14 = tpu.assume_multiple %13, 8 : i32
    %15 = arith.index_cast %14 : i32 to index
    %c0_15 = arith.constant 0 : index
    %16 = vector.load %arg22[%15, %c0_15] : memref<64x256xf32, #tpu.memory_space<vmem>>, vector<8x256xf32>
    %17 = arith.truncf %11 : vector<8x64xf32> to vector<8x64xbf16>
    %cst_16 = arith.constant dense<0.000000e+00> : vector<8x256xf32>
    %18 = tpu.matmul %17, %10, %cst_16 {dimension_numbers = #tpu.dot_dimension_numbers<[1], [0], [0], [1], [0, 0, 1, 1], [], []>} : vector<8x64xbf16>, vector<64x256xbf16>, vector<8x256xf32> -> vector<8x256xf32>
    %19 = arith.addf %16, %18 : vector<8x256xf32>
    %20 = vector.extract_strided_slice %19 {offsets = [0, 0], sizes = [8, 192], strides = [1, 1]} : vector<8x256xf32> to vector<8x192xf32>
    %21 = arith.negf %20 : vector<8x192xf32>
    %22 = math.exp %21 : vector<8x192xf32>
    %cst_17 = arith.constant 1.000000e+00 : f32
    %23 = vector.broadcast %cst_17 : f32 to vector<8x192xf32>
    %24 = arith.addf %23, %22 : vector<8x192xf32>
    %25 = arith.divf %23, %24 : vector<8x192xf32>
    %26 = vector.extract_strided_slice %19 {offsets = [0, 192], sizes = [8, 64], strides = [1, 1]} : vector<8x256xf32> to vector<8x64xf32>
    %27 = math.tanh %26 : vector<8x64xf32>
    %28 = vector.extract_strided_slice %25 {offsets = [0, 0], sizes = [8, 64], strides = [1, 1]} : vector<8x192xf32> to vector<8x64xf32>
    %29 = vector.extract_strided_slice %25 {offsets = [0, 64], sizes = [8, 64], strides = [1, 1]} : vector<8x192xf32> to vector<8x64xf32>
    %30 = vector.extract_strided_slice %25 {offsets = [0, 128], sizes = [8, 64], strides = [1, 1]} : vector<8x192xf32> to vector<8x64xf32>
    %31 = arith.mulf %29, %12 : vector<8x64xf32>
    %32 = arith.mulf %28, %27 : vector<8x64xf32>
    %33 = arith.addf %31, %32 : vector<8x64xf32>
    %34 = math.tanh %33 : vector<8x64xf32>
    %35 = arith.mulf %30, %34 : vector<8x64xf32>
    %36 = arith.index_cast %14 : i32 to index
    %c0_18 = arith.constant 0 : index
    %37 = vector.load %arg23[%36, %c0_18] : memref<64x64xf32, #tpu.memory_space<vmem>>, vector<8x64xf32>
    tpu.vector_store %arg23[%36, %c0_18], %35 {strides = array<i32>} : memref<64x64xf32, #tpu.memory_space<vmem>>, vector<8x64xf32>,
    %c1_i32 = arith.constant 1 : i32
    %c8_i32_19 = arith.constant 8 : i32
    %38 = arith.muli %c1_i32, %c8_i32_19 : i32
    %39 = tpu.assume_multiple %38, 8 : i32
    %40 = arith.index_cast %39 : i32 to index
    %c0_20 = arith.constant 0 : index
    %41 = vector.load %arg22[%40, %c0_20] : memref<64x256xf32, #tpu.memory_space<vmem>>, vector<8x256xf32>
    %42 = arith.truncf %35 : vector<8x64xf32> to vector<8x64xbf16>
    %cst_21 = arith.constant dense<0.000000e+00> : vector<8x256xf32>
    %43 = tpu.matmul %42, %10, %cst_21 {dimension_numbers = #tpu.dot_dimension_numbers<[1], [0], [0], [1], [0, 0, 1, 1], [], []>} : vector<8x64xbf16>, vector<64x256xbf16>, vector<8x256xf32> -> vector<8x256xf32>
    %44 = arith.addf %41, %43 : vector<8x256xf32>
    %45 = vector.extract_strided_slice %44 {offsets = [0, 0], sizes = [8, 192], strides = [1, 1]} : vector<8x256xf32> to vector<8x192xf32>
    %46 = arith.negf %45 : vector<8x192xf32>
    %47 = math.exp %46 : vector<8x192xf32>
    %cst_22 = arith.constant 1.000000e+00 : f32
    %48 = vector.broadcast %cst_22 : f32 to vector<8x192xf32>
    %49 = arith.addf %48, %47 : vector<8x192xf32>
    %50 = arith.divf %48, %49 : vector<8x192xf32>
    %51 = vector.extract_strided_slice %44 {offsets = [0, 192], sizes = [8, 64], strides = [1, 1]} : vector<8x256xf32> to vector<8x64xf32>
    %52 = math.tanh %51 : vector<8x64xf32>
    %53 = vector.extract_strided_slice %50 {offsets = [0, 0], sizes = [8, 64], strides = [1, 1]} : vector<8x192xf32> to vector<8x64xf32>
    %54 = vector.extract_strided_slice %50 {offsets = [0, 64], sizes = [8, 64], strides = [1, 1]} : vector<8x192xf32> to vector<8x64xf32>
    %55 = vector.extract_strided_slice %50 {offsets = [0, 128], sizes = [8, 64], strides = [1, 1]} : vector<8x192xf32> to vector<8x64xf32>
    %56 = arith.mulf %54, %33 : vector<8x64xf32>
    %57 = arith.mulf %53, %52 : vector<8x64xf32>
    %58 = arith.addf %56, %57 : vector<8x64xf32>
    %59 = math.tanh %58 : vector<8x64xf32>
    %60 = arith.mulf %55, %59 : vector<8x64xf32>
    %61 = arith.index_cast %39 : i32 to index
    %c0_23 = arith.constant 0 : index
    %62 = vector.load %arg23[%61, %c0_23] : memref<64x64xf32, #tpu.memory_space<vmem>>, vector<8x64xf32>
    tpu.vector_store %arg23[%61, %c0_23], %60 {strides = array<i32>} : memref<64x64xf32, #tpu.memory_space<vmem>>, vector<8x64xf32>,
    %c2_i32 = arith.constant 2 : i32
    %c8_i32_24 = arith.constant 8 : i32
    %63 = arith.muli %c2_i32, %c8_i32_24 : i32
    %64 = tpu.assume_multiple %63, 8 : i32
    %65 = arith.index_cast %64 : i32 to index
    %c0_25 = arith.constant 0 : index
    %66 = vector.load %arg22[%65, %c0_25] : memref<64x256xf32, #tpu.memory_space<vmem>>, vector<8x256xf32>
    %67 = arith.truncf %60 : vector<8x64xf32> to vector<8x64xbf16>
    %cst_26 = arith.constant dense<0.000000e+00> : vector<8x256xf32>
    %68 = tpu.matmul %67, %10, %cst_26 {dimension_numbers = #tpu.dot_dimension_numbers<[1], [0], [0], [1], [0, 0, 1, 1], [], []>} : vector<8x64xbf16>, vector<64x256xbf16>, vector<8x256xf32> -> vector<8x256xf32>
    %69 = arith.addf %66, %68 : vector<8x256xf32>
    %70 = vector.extract_strided_slice %69 {offsets = [0, 0], sizes = [8, 192], strides = [1, 1]} : vector<8x256xf32> to vector<8x192xf32>
    %71 = arith.negf %70 : vector<8x192xf32>
    %72 = math.exp %71 : vector<8x192xf32>
    %cst_27 = arith.constant 1.000000e+00 : f32
    %73 = vector.broadcast %cst_27 : f32 to vector<8x192xf32>
    %74 = arith.addf %73, %72 : vector<8x192xf32>
    %75 = arith.divf %73, %74 : vector<8x192xf32>
    %76 = vector.extract_strided_slice %69 {offsets = [0, 192], sizes = [8, 64], strides = [1, 1]} : vector<8x256xf32> to vector<8x64xf32>
    %77 = math.tanh %76 : vector<8x64xf32>
    %78 = vector.extract_strided_slice %75 {offsets = [0, 0], sizes = [8, 64], strides = [1, 1]} : vector<8x192xf32> to vector<8x64xf32>
    %79 = vector.extract_strided_slice %75 {offsets = [0, 64], sizes = [8, 64], strides = [1, 1]} : vector<8x192xf32> to vector<8x64xf32>
    %80 = vector.extract_strided_slice %75 {offsets = [0, 128], sizes = [8, 64], strides = [1, 1]} : vector<8x192xf32> to vector<8x64xf32>
    %81 = arith.mulf %79, %58 : vector<8x64xf32>
    %82 = arith.mulf %78, %77 : vector<8x64xf32>
    %83 = arith.addf %81, %82 : vector<8x64xf32>
    %84 = math.tanh %83 : vector<8x64xf32>
    %85 = arith.mulf %80, %84 : vector<8x64xf32>
    %86 = arith.index_cast %64 : i32 to index
    %c0_28 = arith.constant 0 : index
    %87 = vector.load %arg23[%86, %c0_28] : memref<64x64xf32, #tpu.memory_space<vmem>>, vector<8x64xf32>
    tpu.vector_store %arg23[%86, %c0_28], %85 {strides = array<i32>} : memref<64x64xf32, #tpu.memory_space<vmem>>, vector<8x64xf32>,
    %c3_i32 = arith.constant 3 : i32
    %c8_i32_29 = arith.constant 8 : i32
    %88 = arith.muli %c3_i32, %c8_i32_29 : i32
    %89 = tpu.assume_multiple %88, 8 : i32
    %90 = arith.index_cast %89 : i32 to index
    %c0_30 = arith.constant 0 : index
    %91 = vector.load %arg22[%90, %c0_30] : memref<64x256xf32, #tpu.memory_space<vmem>>, vector<8x256xf32>
    %92 = arith.truncf %85 : vector<8x64xf32> to vector<8x64xbf16>
    %cst_31 = arith.constant dense<0.000000e+00> : vector<8x256xf32>
    %93 = tpu.matmul %92, %10, %cst_31 {dimension_numbers = #tpu.dot_dimension_numbers<[1], [0], [0], [1], [0, 0, 1, 1], [], []>} : vector<8x64xbf16>, vector<64x256xbf16>, vector<8x256xf32> -> vector<8x256xf32>
    %94 = arith.addf %91, %93 : vector<8x256xf32>
    %95 = vector.extract_strided_slice %94 {offsets = [0, 0], sizes = [8, 192], strides = [1, 1]} : vector<8x256xf32> to vector<8x192xf32>
    %96 = arith.negf %95 : vector<8x192xf32>
    %97 = math.exp %96 : vector<8x192xf32>
    %cst_32 = arith.constant 1.000000e+00 : f32
    %98 = vector.broadcast %cst_32 : f32 to vector<8x192xf32>
    %99 = arith.addf %98, %97 : vector<8x192xf32>
    %100 = arith.divf %98, %99 : vector<8x192xf32>
    %101 = vector.extract_strided_slice %94 {offsets = [0, 192], sizes = [8, 64], strides = [1, 1]} : vector<8x256xf32> to vector<8x64xf32>
    %102 = math.tanh %101 : vector<8x64xf32>
    %103 = vector.extract_strided_slice %100 {offsets = [0, 0], sizes = [8, 64], strides = [1, 1]} : vector<8x192xf32> to vector<8x64xf32>
    %104 = vector.extract_strided_slice %100 {offsets = [0, 64], sizes = [8, 64], strides = [1, 1]} : vector<8x192xf32> to vector<8x64xf32>
    %105 = vector.extract_strided_slice %100 {offsets = [0, 128], sizes = [8, 64], strides = [1, 1]} : vector<8x192xf32> to vector<8x64xf32>
    %106 = arith.mulf %104, %83 : vector<8x64xf32>
    %107 = arith.mulf %103, %102 : vector<8x64xf32>
    %108 = arith.addf %106, %107 : vector<8x64xf32>
    %109 = math.tanh %108 : vector<8x64xf32>
    %110 = arith.mulf %105, %109 : vector<8x64xf32>
    %111 = arith.index_cast %89 : i32 to index
    %c0_33 = arith.constant 0 : index
    %112 = vector.load %arg23[%111, %c0_33] : memref<64x64xf32, #tpu.memory_space<vmem>>, vector<8x64xf32>
    tpu.vector_store %arg23[%111, %c0_33], %110 {strides = array<i32>} : memref<64x64xf32, #tpu.memory_space<vmem>>, vector<8x64xf32>,
    %c4_i32 = arith.constant 4 : i32
    %c8_i32_34 = arith.constant 8 : i32
    %113 = arith.muli %c4_i32, %c8_i32_34 : i32
    %114 = tpu.assume_multiple %113, 8 : i32
    %115 = arith.index_cast %114 : i32 to index
    %c0_35 = arith.constant 0 : index
    %116 = vector.load %arg22[%115, %c0_35] : memref<64x256xf32, #tpu.memory_space<vmem>>, vector<8x256xf32>
    %117 = arith.truncf %110 : vector<8x64xf32> to vector<8x64xbf16>
    %cst_36 = arith.constant dense<0.000000e+00> : vector<8x256xf32>
    %118 = tpu.matmul %117, %10, %cst_36 {dimension_numbers = #tpu.dot_dimension_numbers<[1], [0], [0], [1], [0, 0, 1, 1], [], []>} : vector<8x64xbf16>, vector<64x256xbf16>, vector<8x256xf32> -> vector<8x256xf32>
    %119 = arith.addf %116, %118 : vector<8x256xf32>
    %120 = vector.extract_strided_slice %119 {offsets = [0, 0], sizes = [8, 192], strides = [1, 1]} : vector<8x256xf32> to vector<8x192xf32>
    %121 = arith.negf %120 : vector<8x192xf32>
    %122 = math.exp %121 : vector<8x192xf32>
    %cst_37 = arith.constant 1.000000e+00 : f32
    %123 = vector.broadcast %cst_37 : f32 to vector<8x192xf32>
    %124 = arith.addf %123, %122 : vector<8x192xf32>
    %125 = arith.divf %123, %124 : vector<8x192xf32>
    %126 = vector.extract_strided_slice %119 {offsets = [0, 192], sizes = [8, 64], strides = [1, 1]} : vector<8x256xf32> to vector<8x64xf32>
    %127 = math.tanh %126 : vector<8x64xf32>
    %128 = vector.extract_strided_slice %125 {offsets = [0, 0], sizes = [8, 64], strides = [1, 1]} : vector<8x192xf32> to vector<8x64xf32>
    %129 = vector.extract_strided_slice %125 {offsets = [0, 64], sizes = [8, 64], strides = [1, 1]} : vector<8x192xf32> to vector<8x64xf32>
    %130 = vector.extract_strided_slice %125 {offsets = [0, 128], sizes = [8, 64], strides = [1, 1]} : vector<8x192xf32> to vector<8x64xf32>
    %131 = arith.mulf %129, %108 : vector<8x64xf32>
    %132 = arith.mulf %128, %127 : vector<8x64xf32>
    %133 = arith.addf %131, %132 : vector<8x64xf32>
    %134 = math.tanh %133 : vector<8x64xf32>
    %135 = arith.mulf %130, %134 : vector<8x64xf32>
    %136 = arith.index_cast %114 : i32 to index
    %c0_38 = arith.constant 0 : index
    %137 = vector.load %arg23[%136, %c0_38] : memref<64x64xf32, #tpu.memory_space<vmem>>, vector<8x64xf32>
    tpu.vector_store %arg23[%136, %c0_38], %135 {strides = array<i32>} : memref<64x64xf32, #tpu.memory_space<vmem>>, vector<8x64xf32>,
    %c5_i32 = arith.constant 5 : i32
    %c8_i32_39 = arith.constant 8 : i32
    %138 = arith.muli %c5_i32, %c8_i32_39 : i32
    %139 = tpu.assume_multiple %138, 8 : i32
    %140 = arith.index_cast %139 : i32 to index
    %c0_40 = arith.constant 0 : index
    %141 = vector.load %arg22[%140, %c0_40] : memref<64x256xf32, #tpu.memory_space<vmem>>, vector<8x256xf32>
    %142 = arith.truncf %135 : vector<8x64xf32> to vector<8x64xbf16>
    %cst_41 = arith.constant dense<0.000000e+00> : vector<8x256xf32>
    %143 = tpu.matmul %142, %10, %cst_41 {dimension_numbers = #tpu.dot_dimension_numbers<[1], [0], [0], [1], [0, 0, 1, 1], [], []>} : vector<8x64xbf16>, vector<64x256xbf16>, vector<8x256xf32> -> vector<8x256xf32>
    %144 = arith.addf %141, %143 : vector<8x256xf32>
    %145 = vector.extract_strided_slice %144 {offsets = [0, 0], sizes = [8, 192], strides = [1, 1]} : vector<8x256xf32> to vector<8x192xf32>
    %146 = arith.negf %145 : vector<8x192xf32>
    %147 = math.exp %146 : vector<8x192xf32>
    %cst_42 = arith.constant 1.000000e+00 : f32
    %148 = vector.broadcast %cst_42 : f32 to vector<8x192xf32>
    %149 = arith.addf %148, %147 : vector<8x192xf32>
    %150 = arith.divf %148, %149 : vector<8x192xf32>
    %151 = vector.extract_strided_slice %144 {offsets = [0, 192], sizes = [8, 64], strides = [1, 1]} : vector<8x256xf32> to vector<8x64xf32>
    %152 = math.tanh %151 : vector<8x64xf32>
    %153 = vector.extract_strided_slice %150 {offsets = [0, 0], sizes = [8, 64], strides = [1, 1]} : vector<8x192xf32> to vector<8x64xf32>
    %154 = vector.extract_strided_slice %150 {offsets = [0, 64], sizes = [8, 64], strides = [1, 1]} : vector<8x192xf32> to vector<8x64xf32>
    %155 = vector.extract_strided_slice %150 {offsets = [0, 128], sizes = [8, 64], strides = [1, 1]} : vector<8x192xf32> to vector<8x64xf32>
    %156 = arith.mulf %154, %133 : vector<8x64xf32>
    %157 = arith.mulf %153, %152 : vector<8x64xf32>
    %158 = arith.addf %156, %157 : vector<8x64xf32>
    %159 = math.tanh %158 : vector<8x64xf32>
    %160 = arith.mulf %155, %159 : vector<8x64xf32>
    %161 = arith.index_cast %139 : i32 to index
    %c0_43 = arith.constant 0 : index
    %162 = vector.load %arg23[%161, %c0_43] : memref<64x64xf32, #tpu.memory_space<vmem>>, vector<8x64xf32>
    tpu.vector_store %arg23[%161, %c0_43], %160 {strides = array<i32>} : memref<64x64xf32, #tpu.memory_space<vmem>>, vector<8x64xf32>,
    %c6_i32 = arith.constant 6 : i32
    %c8_i32_44 = arith.constant 8 : i32
    %163 = arith.muli %c6_i32, %c8_i32_44 : i32
    %164 = tpu.assume_multiple %163, 8 : i32
    %165 = arith.index_cast %164 : i32 to index
    %c0_45 = arith.constant 0 : index
    %166 = vector.load %arg22[%165, %c0_45] : memref<64x256xf32, #tpu.memory_space<vmem>>, vector<8x256xf32>
    %167 = arith.truncf %160 : vector<8x64xf32> to vector<8x64xbf16>
    %cst_46 = arith.constant dense<0.000000e+00> : vector<8x256xf32>
    %168 = tpu.matmul %167, %10, %cst_46 {dimension_numbers = #tpu.dot_dimension_numbers<[1], [0], [0], [1], [0, 0, 1, 1], [], []>} : vector<8x64xbf16>, vector<64x256xbf16>, vector<8x256xf32> -> vector<8x256xf32>
    %169 = arith.addf %166, %168 : vector<8x256xf32>
    %170 = vector.extract_strided_slice %169 {offsets = [0, 0], sizes = [8, 192], strides = [1, 1]} : vector<8x256xf32> to vector<8x192xf32>
    %171 = arith.negf %170 : vector<8x192xf32>
    %172 = math.exp %171 : vector<8x192xf32>
    %cst_47 = arith.constant 1.000000e+00 : f32
    %173 = vector.broadcast %cst_47 : f32 to vector<8x192xf32>
    %174 = arith.addf %173, %172 : vector<8x192xf32>
    %175 = arith.divf %173, %174 : vector<8x192xf32>
    %176 = vector.extract_strided_slice %169 {offsets = [0, 192], sizes = [8, 64], strides = [1, 1]} : vector<8x256xf32> to vector<8x64xf32>
    %177 = math.tanh %176 : vector<8x64xf32>
    %178 = vector.extract_strided_slice %175 {offsets = [0, 0], sizes = [8, 64], strides = [1, 1]} : vector<8x192xf32> to vector<8x64xf32>
    %179 = vector.extract_strided_slice %175 {offsets = [0, 64], sizes = [8, 64], strides = [1, 1]} : vector<8x192xf32> to vector<8x64xf32>
    %180 = vector.extract_strided_slice %175 {offsets = [0, 128], sizes = [8, 64], strides = [1, 1]} : vector<8x192xf32> to vector<8x64xf32>
    %181 = arith.mulf %179, %158 : vector<8x64xf32>
    %182 = arith.mulf %178, %177 : vector<8x64xf32>
    %183 = arith.addf %181, %182 : vector<8x64xf32>
    %184 = math.tanh %183 : vector<8x64xf32>
    %185 = arith.mulf %180, %184 : vector<8x64xf32>
    %186 = arith.index_cast %164 : i32 to index
    %c0_48 = arith.constant 0 : index
    %187 = vector.load %arg23[%186, %c0_48] : memref<64x64xf32, #tpu.memory_space<vmem>>, vector<8x64xf32>
    tpu.vector_store %arg23[%186, %c0_48], %185 {strides = array<i32>} : memref<64x64xf32, #tpu.memory_space<vmem>>, vector<8x64xf32>,
    %c7_i32 = arith.constant 7 : i32
    %c8_i32_49 = arith.constant 8 : i32
    %188 = arith.muli %c7_i32, %c8_i32_49 : i32
    %189 = tpu.assume_multiple %188, 8 : i32
    %190 = arith.index_cast %189 : i32 to index
    %c0_50 = arith.constant 0 : index
    %191 = vector.load %arg22[%190, %c0_50] : memref<64x256xf32, #tpu.memory_space<vmem>>, vector<8x256xf32>
    %192 = arith.truncf %185 : vector<8x64xf32> to vector<8x64xbf16>
    %cst_51 = arith.constant dense<0.000000e+00> : vector<8x256xf32>
    %193 = tpu.matmul %192, %10, %cst_51 {dimension_numbers = #tpu.dot_dimension_numbers<[1], [0], [0], [1], [0, 0, 1, 1], [], []>} : vector<8x64xbf16>, vector<64x256xbf16>, vector<8x256xf32> -> vector<8x256xf32>
    %194 = arith.addf %191, %193 : vector<8x256xf32>
    %195 = vector.extract_strided_slice %194 {offsets = [0, 0], sizes = [8, 192], strides = [1, 1]} : vector<8x256xf32> to vector<8x192xf32>
    %196 = arith.negf %195 : vector<8x192xf32>
    %197 = math.exp %196 : vector<8x192xf32>
    %cst_52 = arith.constant 1.000000e+00 : f32
    %198 = vector.broadcast %cst_52 : f32 to vector<8x192xf32>
    %199 = arith.addf %198, %197 : vector<8x192xf32>
    %200 = arith.divf %198, %199 : vector<8x192xf32>
    %201 = vector.extract_strided_slice %194 {offsets = [0, 192], sizes = [8, 64], strides = [1, 1]} : vector<8x256xf32> to vector<8x64xf32>
    %202 = math.tanh %201 : vector<8x64xf32>
    %203 = vector.extract_strided_slice %200 {offsets = [0, 0], sizes = [8, 64], strides = [1, 1]} : vector<8x192xf32> to vector<8x64xf32>
    %204 = vector.extract_strided_slice %200 {offsets = [0, 64], sizes = [8, 64], strides = [1, 1]} : vector<8x192xf32> to vector<8x64xf32>
    %205 = vector.extract_strided_slice %200 {offsets = [0, 128], sizes = [8, 64], strides = [1, 1]} : vector<8x192xf32> to vector<8x64xf32>
    %206 = arith.mulf %204, %183 : vector<8x64xf32>
    %207 = arith.mulf %203, %202 : vector<8x64xf32>
    %208 = arith.addf %206, %207 : vector<8x64xf32>
    %209 = math.tanh %208 : vector<8x64xf32>
    %210 = arith.mulf %205, %209 : vector<8x64xf32>
    %211 = arith.index_cast %189 : i32 to index
    %c0_53 = arith.constant 0 : index
    %212 = vector.load %arg23[%211, %c0_53] : memref<64x64xf32, #tpu.memory_space<vmem>>, vector<8x64xf32>
    tpu.vector_store %arg23[%211, %c0_53], %210 {strides = array<i32>} : memref<64x64xf32, #tpu.memory_space<vmem>>, vector<8x64xf32>,
    %c8_i32_54 = arith.constant 8 : i32
    %c0_55 = arith.constant 0 : index
    %c0_56 = arith.constant 0 : index
    %213 = vector.load %arg18[%c0_55, %c0_56] : memref<8x64xf32, #tpu.memory_space<vmem>>, vector<8x64xf32>
    tpu.vector_store %arg18[%c0_55, %c0_56], %210 {strides = array<i32>} : memref<8x64xf32, #tpu.memory_space<vmem>>, vector<8x64xf32>,
    %c0_57 = arith.constant 0 : index
    %c0_58 = arith.constant 0 : index
    %214 = vector.load %arg19[%c0_57, %c0_58] : memref<8x64xf32, #tpu.memory_space<vmem>>, vector<8x64xf32>
    tpu.vector_store %arg19[%c0_57, %c0_58], %208 {strides = array<i32>} : memref<8x64xf32, #tpu.memory_space<vmem>>, vector<8x64xf32>,
    %c0_59 = arith.constant 0 : index
    %c0_60 = arith.constant 0 : index
    %215 = vector.load %arg23[%c0_59, %c0_60] : memref<64x64xf32, #tpu.memory_space<vmem>>, vector<64x64xf32>
    %216 = arith.truncf %215 : vector<64x64xf32> to vector<64x64xbf16>
    %c0_61 = arith.constant 0 : index
    %c0_62 = arith.constant 0 : index
    %217 = vector.load %arg6[%c0_61, %c0_62] : memref<64x256xbf16, #tpu.memory_space<vmem>>, vector<64x256xbf16>
    %cst_63 = arith.constant dense<0.000000e+00> : vector<64x256xf32>
    %218 = tpu.matmul %216, %217, %cst_63 {dimension_numbers = #tpu.dot_dimension_numbers<[1], [0], [0], [1], [0, 0, 1, 1], [], []>} : vector<64x64xbf16>, vector<64x256xbf16>, vector<64x256xf32> -> vector<64x256xf32>
    %c0_64 = arith.constant 0 : index
    %c0_65 = arith.constant 0 : index
    %219 = vector.load %arg8[%c0_64, %c0_65] : memref<1x256xf32, #tpu.memory_space<vmem>>, vector<1x256xf32>
    %220 = vector.broadcast %219 : vector<1x256xf32> to vector<64x256xf32>
    %221 = arith.addf %218, %220 : vector<64x256xf32>
    %c0_66 = arith.constant 0 : index
    %c0_67 = arith.constant 0 : index
    %222 = vector.load %arg22[%c0_66, %c0_67] : memref<64x256xf32, #tpu.memory_space<vmem>>, vector<64x256xf32>
    tpu.vector_store %arg22[%c0_66, %c0_67], %221 {strides = array<i32>} : memref<64x256xf32, #tpu.memory_space<vmem>>, vector<64x256xf32>,
    %c0_68 = arith.constant 0 : index
    %c0_69 = arith.constant 0 : index
    %223 = vector.load %arg7[%c0_68, %c0_69] : memref<64x256xbf16, #tpu.memory_space<vmem>>, vector<64x256xbf16>
    %c0_70 = arith.constant 0 : index
    %c0_71 = arith.constant 0 : index
    %224 = vector.load %arg20[%c0_70, %c0_71] : memref<8x64xf32, #tpu.memory_space<vmem>>, vector<8x64xf32>
    %c0_72 = arith.constant 0 : index
    %c0_73 = arith.constant 0 : index
    %225 = vector.load %arg21[%c0_72, %c0_73] : memref<8x64xf32, #tpu.memory_space<vmem>>, vector<8x64xf32>
    %c0_i32_74 = arith.constant 0 : i32
    %c8_i32_75 = arith.constant 8 : i32
    %226 = arith.muli %c0_i32_74, %c8_i32_75 : i32
    %227 = tpu.assume_multiple %226, 8 : i32
    %228 = arith.index_cast %227 : i32 to index
    %c0_76 = arith.constant 0 : index
    %229 = vector.load %arg22[%228, %c0_76] : memref<64x256xf32, #tpu.memory_space<vmem>>, vector<8x256xf32>
    %230 = arith.truncf %224 : vector<8x64xf32> to vector<8x64xbf16>
    %cst_77 = arith.constant dense<0.000000e+00> : vector<8x256xf32>
    %231 = tpu.matmul %230, %223, %cst_77 {dimension_numbers = #tpu.dot_dimension_numbers<[1], [0], [0], [1], [0, 0, 1, 1], [], []>} : vector<8x64xbf16>, vector<64x256xbf16>, vector<8x256xf32> -> vector<8x256xf32>
    %232 = arith.addf %229, %231 : vector<8x256xf32>
    %233 = vector.extract_strided_slice %232 {offsets = [0, 0], sizes = [8, 192], strides = [1, 1]} : vector<8x256xf32> to vector<8x192xf32>
    %234 = arith.negf %233 : vector<8x192xf32>
    %235 = math.exp %234 : vector<8x192xf32>
    %cst_78 = arith.constant 1.000000e+00 : f32
    %236 = vector.broadcast %cst_78 : f32 to vector<8x192xf32>
    %237 = arith.addf %236, %235 : vector<8x192xf32>
    %238 = arith.divf %236, %237 : vector<8x192xf32>
    %239 = vector.extract_strided_slice %232 {offsets = [0, 192], sizes = [8, 64], strides = [1, 1]} : vector<8x256xf32> to vector<8x64xf32>
    %240 = math.tanh %239 : vector<8x64xf32>
    %241 = vector.extract_strided_slice %238 {offsets = [0, 0], sizes = [8, 64], strides = [1, 1]} : vector<8x192xf32> to vector<8x64xf32>
    %242 = vector.extract_strided_slice %238 {offsets = [0, 64], sizes = [8, 64], strides = [1, 1]} : vector<8x192xf32> to vector<8x64xf32>
    %243 = vector.extract_strided_slice %238 {offsets = [0, 128], sizes = [8, 64], strides = [1, 1]} : vector<8x192xf32> to vector<8x64xf32>
    %244 = arith.mulf %242, %225 : vector<8x64xf32>
    %245 = arith.mulf %241, %240 : vector<8x64xf32>
    %246 = arith.addf %244, %245 : vector<8x64xf32>
    %247 = math.tanh %246 : vector<8x64xf32>
    %248 = arith.mulf %243, %247 : vector<8x64xf32>
    %249 = arith.index_cast %227 : i32 to index
    %c0_79 = arith.constant 0 : index
    %250 = vector.load %arg23[%249, %c0_79] : memref<64x64xf32, #tpu.memory_space<vmem>>, vector<8x64xf32>
    tpu.vector_store %arg23[%249, %c0_79], %248 {strides = array<i32>} : memref<64x64xf32, #tpu.memory_space<vmem>>, vector<8x64xf32>,
    %c1_i32_80 = arith.constant 1 : i32
    %c8_i32_81 = arith.constant 8 : i32
    %251 = arith.muli %c1_i32_80, %c8_i32_81 : i32
    %252 = tpu.assume_multiple %251, 8 : i32
    %253 = arith.index_cast %252 : i32 to index
    %c0_82 = arith.constant 0 : index
    %254 = vector.load %arg22[%253, %c0_82] : memref<64x256xf32, #tpu.memory_space<vmem>>, vector<8x256xf32>
    %255 = arith.truncf %248 : vector<8x64xf32> to vector<8x64xbf16>
    %cst_83 = arith.constant dense<0.000000e+00> : vector<8x256xf32>
    %256 = tpu.matmul %255, %223, %cst_83 {dimension_numbers = #tpu.dot_dimension_numbers<[1], [0], [0], [1], [0, 0, 1, 1], [], []>} : vector<8x64xbf16>, vector<64x256xbf16>, vector<8x256xf32> -> vector<8x256xf32>
    %257 = arith.addf %254, %256 : vector<8x256xf32>
    %258 = vector.extract_strided_slice %257 {offsets = [0, 0], sizes = [8, 192], strides = [1, 1]} : vector<8x256xf32> to vector<8x192xf32>
    %259 = arith.negf %258 : vector<8x192xf32>
    %260 = math.exp %259 : vector<8x192xf32>
    %cst_84 = arith.constant 1.000000e+00 : f32
    %261 = vector.broadcast %cst_84 : f32 to vector<8x192xf32>
    %262 = arith.addf %261, %260 : vector<8x192xf32>
    %263 = arith.divf %261, %262 : vector<8x192xf32>
    %264 = vector.extract_strided_slice %257 {offsets = [0, 192], sizes = [8, 64], strides = [1, 1]} : vector<8x256xf32> to vector<8x64xf32>
    %265 = math.tanh %264 : vector<8x64xf32>
    %266 = vector.extract_strided_slice %263 {offsets = [0, 0], sizes = [8, 64], strides = [1, 1]} : vector<8x192xf32> to vector<8x64xf32>
    %267 = vector.extract_strided_slice %263 {offsets = [0, 64], sizes = [8, 64], strides = [1, 1]} : vector<8x192xf32> to vector<8x64xf32>
    %268 = vector.extract_strided_slice %263 {offsets = [0, 128], sizes = [8, 64], strides = [1, 1]} : vector<8x192xf32> to vector<8x64xf32>
    %269 = arith.mulf %267, %246 : vector<8x64xf32>
    %270 = arith.mulf %266, %265 : vector<8x64xf32>
    %271 = arith.addf %269, %270 : vector<8x64xf32>
    %272 = math.tanh %271 : vector<8x64xf32>
    %273 = arith.mulf %268, %272 : vector<8x64xf32>
    %274 = arith.index_cast %252 : i32 to index
    %c0_85 = arith.constant 0 : index
    %275 = vector.load %arg23[%274, %c0_85] : memref<64x64xf32, #tpu.memory_space<vmem>>, vector<8x64xf32>
    tpu.vector_store %arg23[%274, %c0_85], %273 {strides = array<i32>} : memref<64x64xf32, #tpu.memory_space<vmem>>, vector<8x64xf32>,
    %c2_i32_86 = arith.constant 2 : i32
    %c8_i32_87 = arith.constant 8 : i32
    %276 = arith.muli %c2_i32_86, %c8_i32_87 : i32
    %277 = tpu.assume_multiple %276, 8 : i32
    %278 = arith.index_cast %277 : i32 to index
    %c0_88 = arith.constant 0 : index
    %279 = vector.load %arg22[%278, %c0_88] : memref<64x256xf32, #tpu.memory_space<vmem>>, vector<8x256xf32>
    %280 = arith.truncf %273 : vector<8x64xf32> to vector<8x64xbf16>
    %cst_89 = arith.constant dense<0.000000e+00> : vector<8x256xf32>
    %281 = tpu.matmul %280, %223, %cst_89 {dimension_numbers = #tpu.dot_dimension_numbers<[1], [0], [0], [1], [0, 0, 1, 1], [], []>} : vector<8x64xbf16>, vector<64x256xbf16>, vector<8x256xf32> -> vector<8x256xf32>
    %282 = arith.addf %279, %281 : vector<8x256xf32>
    %283 = vector.extract_strided_slice %282 {offsets = [0, 0], sizes = [8, 192], strides = [1, 1]} : vector<8x256xf32> to vector<8x192xf32>
    %284 = arith.negf %283 : vector<8x192xf32>
    %285 = math.exp %284 : vector<8x192xf32>
    %cst_90 = arith.constant 1.000000e+00 : f32
    %286 = vector.broadcast %cst_90 : f32 to vector<8x192xf32>
    %287 = arith.addf %286, %285 : vector<8x192xf32>
    %288 = arith.divf %286, %287 : vector<8x192xf32>
    %289 = vector.extract_strided_slice %282 {offsets = [0, 192], sizes = [8, 64], strides = [1, 1]} : vector<8x256xf32> to vector<8x64xf32>
    %290 = math.tanh %289 : vector<8x64xf32>
    %291 = vector.extract_strided_slice %288 {offsets = [0, 0], sizes = [8, 64], strides = [1, 1]} : vector<8x192xf32> to vector<8x64xf32>
    %292 = vector.extract_strided_slice %288 {offsets = [0, 64], sizes = [8, 64], strides = [1, 1]} : vector<8x192xf32> to vector<8x64xf32>
    %293 = vector.extract_strided_slice %288 {offsets = [0, 128], sizes = [8, 64], strides = [1, 1]} : vector<8x192xf32> to vector<8x64xf32>
    %294 = arith.mulf %292, %271 : vector<8x64xf32>
    %295 = arith.mulf %291, %290 : vector<8x64xf32>
    %296 = arith.addf %294, %295 : vector<8x64xf32>
    %297 = math.tanh %296 : vector<8x64xf32>
    %298 = arith.mulf %293, %297 : vector<8x64xf32>
    %299 = arith.index_cast %277 : i32 to index
    %c0_91 = arith.constant 0 : index
    %300 = vector.load %arg23[%299, %c0_91] : memref<64x64xf32, #tpu.memory_space<vmem>>, vector<8x64xf32>
    tpu.vector_store %arg23[%299, %c0_91], %298 {strides = array<i32>} : memref<64x64xf32, #tpu.memory_space<vmem>>, vector<8x64xf32>,
    %c3_i32_92 = arith.constant 3 : i32
    %c8_i32_93 = arith.constant 8 : i32
    %301 = arith.muli %c3_i32_92, %c8_i32_93 : i32
    %302 = tpu.assume_multiple %301, 8 : i32
    %303 = arith.index_cast %302 : i32 to index
    %c0_94 = arith.constant 0 : index
    %304 = vector.load %arg22[%303, %c0_94] : memref<64x256xf32, #tpu.memory_space<vmem>>, vector<8x256xf32>
    %305 = arith.truncf %298 : vector<8x64xf32> to vector<8x64xbf16>
    %cst_95 = arith.constant dense<0.000000e+00> : vector<8x256xf32>
    %306 = tpu.matmul %305, %223, %cst_95 {dimension_numbers = #tpu.dot_dimension_numbers<[1], [0], [0], [1], [0, 0, 1, 1], [], []>} : vector<8x64xbf16>, vector<64x256xbf16>, vector<8x256xf32> -> vector<8x256xf32>
    %307 = arith.addf %304, %306 : vector<8x256xf32>
    %308 = vector.extract_strided_slice %307 {offsets = [0, 0], sizes = [8, 192], strides = [1, 1]} : vector<8x256xf32> to vector<8x192xf32>
    %309 = arith.negf %308 : vector<8x192xf32>
    %310 = math.exp %309 : vector<8x192xf32>
    %cst_96 = arith.constant 1.000000e+00 : f32
    %311 = vector.broadcast %cst_96 : f32 to vector<8x192xf32>
    %312 = arith.addf %311, %310 : vector<8x192xf32>
    %313 = arith.divf %311, %312 : vector<8x192xf32>
    %314 = vector.extract_strided_slice %307 {offsets = [0, 192], sizes = [8, 64], strides = [1, 1]} : vector<8x256xf32> to vector<8x64xf32>
    %315 = math.tanh %314 : vector<8x64xf32>
    %316 = vector.extract_strided_slice %313 {offsets = [0, 0], sizes = [8, 64], strides = [1, 1]} : vector<8x192xf32> to vector<8x64xf32>
    %317 = vector.extract_strided_slice %313 {offsets = [0, 64], sizes = [8, 64], strides = [1, 1]} : vector<8x192xf32> to vector<8x64xf32>
    %318 = vector.extract_strided_slice %313 {offsets = [0, 128], sizes = [8, 64], strides = [1, 1]} : vector<8x192xf32> to vector<8x64xf32>
    %319 = arith.mulf %317, %296 : vector<8x64xf32>
    %320 = arith.mulf %316, %315 : vector<8x64xf32>
    %321 = arith.addf %319, %320 : vector<8x64xf32>
    %322 = math.tanh %321 : vector<8x64xf32>
    %323 = arith.mulf %318, %322 : vector<8x64xf32>
    %324 = arith.index_cast %302 : i32 to index
    %c0_97 = arith.constant 0 : index
    %325 = vector.load %arg23[%324, %c0_97] : memref<64x64xf32, #tpu.memory_space<vmem>>, vector<8x64xf32>
    tpu.vector_store %arg23[%324, %c0_97], %323 {strides = array<i32>} : memref<64x64xf32, #tpu.memory_space<vmem>>, vector<8x64xf32>,
    %c4_i32_98 = arith.constant 4 : i32
    %c8_i32_99 = arith.constant 8 : i32
    %326 = arith.muli %c4_i32_98, %c8_i32_99 : i32
    %327 = tpu.assume_multiple %326, 8 : i32
    %328 = arith.index_cast %327 : i32 to index
    %c0_100 = arith.constant 0 : index
    %329 = vector.load %arg22[%328, %c0_100] : memref<64x256xf32, #tpu.memory_space<vmem>>, vector<8x256xf32>
    %330 = arith.truncf %323 : vector<8x64xf32> to vector<8x64xbf16>
    %cst_101 = arith.constant dense<0.000000e+00> : vector<8x256xf32>
    %331 = tpu.matmul %330, %223, %cst_101 {dimension_numbers = #tpu.dot_dimension_numbers<[1], [0], [0], [1], [0, 0, 1, 1], [], []>} : vector<8x64xbf16>, vector<64x256xbf16>, vector<8x256xf32> -> vector<8x256xf32>
    %332 = arith.addf %329, %331 : vector<8x256xf32>
    %333 = vector.extract_strided_slice %332 {offsets = [0, 0], sizes = [8, 192], strides = [1, 1]} : vector<8x256xf32> to vector<8x192xf32>
    %334 = arith.negf %333 : vector<8x192xf32>
    %335 = math.exp %334 : vector<8x192xf32>
    %cst_102 = arith.constant 1.000000e+00 : f32
    %336 = vector.broadcast %cst_102 : f32 to vector<8x192xf32>
    %337 = arith.addf %336, %335 : vector<8x192xf32>
    %338 = arith.divf %336, %337 : vector<8x192xf32>
    %339 = vector.extract_strided_slice %332 {offsets = [0, 192], sizes = [8, 64], strides = [1, 1]} : vector<8x256xf32> to vector<8x64xf32>
    %340 = math.tanh %339 : vector<8x64xf32>
    %341 = vector.extract_strided_slice %338 {offsets = [0, 0], sizes = [8, 64], strides = [1, 1]} : vector<8x192xf32> to vector<8x64xf32>
    %342 = vector.extract_strided_slice %338 {offsets = [0, 64], sizes = [8, 64], strides = [1, 1]} : vector<8x192xf32> to vector<8x64xf32>
    %343 = vector.extract_strided_slice %338 {offsets = [0, 128], sizes = [8, 64], strides = [1, 1]} : vector<8x192xf32> to vector<8x64xf32>
    %344 = arith.mulf %342, %321 : vector<8x64xf32>
    %345 = arith.mulf %341, %340 : vector<8x64xf32>
    %346 = arith.addf %344, %345 : vector<8x64xf32>
    %347 = math.tanh %346 : vector<8x64xf32>
    %348 = arith.mulf %343, %347 : vector<8x64xf32>
    %349 = arith.index_cast %327 : i32 to index
    %c0_103 = arith.constant 0 : index
    %350 = vector.load %arg23[%349, %c0_103] : memref<64x64xf32, #tpu.memory_space<vmem>>, vector<8x64xf32>
    tpu.vector_store %arg23[%349, %c0_103], %348 {strides = array<i32>} : memref<64x64xf32, #tpu.memory_space<vmem>>, vector<8x64xf32>,
    %c5_i32_104 = arith.constant 5 : i32
    %c8_i32_105 = arith.constant 8 : i32
    %351 = arith.muli %c5_i32_104, %c8_i32_105 : i32
    %352 = tpu.assume_multiple %351, 8 : i32
    %353 = arith.index_cast %352 : i32 to index
    %c0_106 = arith.constant 0 : index
    %354 = vector.load %arg22[%353, %c0_106] : memref<64x256xf32, #tpu.memory_space<vmem>>, vector<8x256xf32>
    %355 = arith.truncf %348 : vector<8x64xf32> to vector<8x64xbf16>
    %cst_107 = arith.constant dense<0.000000e+00> : vector<8x256xf32>
    %356 = tpu.matmul %355, %223, %cst_107 {dimension_numbers = #tpu.dot_dimension_numbers<[1], [0], [0], [1], [0, 0, 1, 1], [], []>} : vector<8x64xbf16>, vector<64x256xbf16>, vector<8x256xf32> -> vector<8x256xf32>
    %357 = arith.addf %354, %356 : vector<8x256xf32>
    %358 = vector.extract_strided_slice %357 {offsets = [0, 0], sizes = [8, 192], strides = [1, 1]} : vector<8x256xf32> to vector<8x192xf32>
    %359 = arith.negf %358 : vector<8x192xf32>
    %360 = math.exp %359 : vector<8x192xf32>
    %cst_108 = arith.constant 1.000000e+00 : f32
    %361 = vector.broadcast %cst_108 : f32 to vector<8x192xf32>
    %362 = arith.addf %361, %360 : vector<8x192xf32>
    %363 = arith.divf %361, %362 : vector<8x192xf32>
    %364 = vector.extract_strided_slice %357 {offsets = [0, 192], sizes = [8, 64], strides = [1, 1]} : vector<8x256xf32> to vector<8x64xf32>
    %365 = math.tanh %364 : vector<8x64xf32>
    %366 = vector.extract_strided_slice %363 {offsets = [0, 0], sizes = [8, 64], strides = [1, 1]} : vector<8x192xf32> to vector<8x64xf32>
    %367 = vector.extract_strided_slice %363 {offsets = [0, 64], sizes = [8, 64], strides = [1, 1]} : vector<8x192xf32> to vector<8x64xf32>
    %368 = vector.extract_strided_slice %363 {offsets = [0, 128], sizes = [8, 64], strides = [1, 1]} : vector<8x192xf32> to vector<8x64xf32>
    %369 = arith.mulf %367, %346 : vector<8x64xf32>
    %370 = arith.mulf %366, %365 : vector<8x64xf32>
    %371 = arith.addf %369, %370 : vector<8x64xf32>
    %372 = math.tanh %371 : vector<8x64xf32>
    %373 = arith.mulf %368, %372 : vector<8x64xf32>
    %374 = arith.index_cast %352 : i32 to index
    %c0_109 = arith.constant 0 : index
    %375 = vector.load %arg23[%374, %c0_109] : memref<64x64xf32, #tpu.memory_space<vmem>>, vector<8x64xf32>
    tpu.vector_store %arg23[%374, %c0_109], %373 {strides = array<i32>} : memref<64x64xf32, #tpu.memory_space<vmem>>, vector<8x64xf32>,
    %c6_i32_110 = arith.constant 6 : i32
    %c8_i32_111 = arith.constant 8 : i32
    %376 = arith.muli %c6_i32_110, %c8_i32_111 : i32
    %377 = tpu.assume_multiple %376, 8 : i32
    %378 = arith.index_cast %377 : i32 to index
    %c0_112 = arith.constant 0 : index
    %379 = vector.load %arg22[%378, %c0_112] : memref<64x256xf32, #tpu.memory_space<vmem>>, vector<8x256xf32>
    %380 = arith.truncf %373 : vector<8x64xf32> to vector<8x64xbf16>
    %cst_113 = arith.constant dense<0.000000e+00> : vector<8x256xf32>
    %381 = tpu.matmul %380, %223, %cst_113 {dimension_numbers = #tpu.dot_dimension_numbers<[1], [0], [0], [1], [0, 0, 1, 1], [], []>} : vector<8x64xbf16>, vector<64x256xbf16>, vector<8x256xf32> -> vector<8x256xf32>
    %382 = arith.addf %379, %381 : vector<8x256xf32>
    %383 = vector.extract_strided_slice %382 {offsets = [0, 0], sizes = [8, 192], strides = [1, 1]} : vector<8x256xf32> to vector<8x192xf32>
    %384 = arith.negf %383 : vector<8x192xf32>
    %385 = math.exp %384 : vector<8x192xf32>
    %cst_114 = arith.constant 1.000000e+00 : f32
    %386 = vector.broadcast %cst_114 : f32 to vector<8x192xf32>
    %387 = arith.addf %386, %385 : vector<8x192xf32>
    %388 = arith.divf %386, %387 : vector<8x192xf32>
    %389 = vector.extract_strided_slice %382 {offsets = [0, 192], sizes = [8, 64], strides = [1, 1]} : vector<8x256xf32> to vector<8x64xf32>
    %390 = math.tanh %389 : vector<8x64xf32>
    %391 = vector.extract_strided_slice %388 {offsets = [0, 0], sizes = [8, 64], strides = [1, 1]} : vector<8x192xf32> to vector<8x64xf32>
    %392 = vector.extract_strided_slice %388 {offsets = [0, 64], sizes = [8, 64], strides = [1, 1]} : vector<8x192xf32> to vector<8x64xf32>
    %393 = vector.extract_strided_slice %388 {offsets = [0, 128], sizes = [8, 64], strides = [1, 1]} : vector<8x192xf32> to vector<8x64xf32>
    %394 = arith.mulf %392, %371 : vector<8x64xf32>
    %395 = arith.mulf %391, %390 : vector<8x64xf32>
    %396 = arith.addf %394, %395 : vector<8x64xf32>
    %397 = math.tanh %396 : vector<8x64xf32>
    %398 = arith.mulf %393, %397 : vector<8x64xf32>
    %399 = arith.index_cast %377 : i32 to index
    %c0_115 = arith.constant 0 : index
    %400 = vector.load %arg23[%399, %c0_115] : memref<64x64xf32, #tpu.memory_space<vmem>>, vector<8x64xf32>
    tpu.vector_store %arg23[%399, %c0_115], %398 {strides = array<i32>} : memref<64x64xf32, #tpu.memory_space<vmem>>, vector<8x64xf32>,
    %c7_i32_116 = arith.constant 7 : i32
    %c8_i32_117 = arith.constant 8 : i32
    %401 = arith.muli %c7_i32_116, %c8_i32_117 : i32
    %402 = tpu.assume_multiple %401, 8 : i32
    %403 = arith.index_cast %402 : i32 to index
    %c0_118 = arith.constant 0 : index
    %404 = vector.load %arg22[%403, %c0_118] : memref<64x256xf32, #tpu.memory_space<vmem>>, vector<8x256xf32>
    %405 = arith.truncf %398 : vector<8x64xf32> to vector<8x64xbf16>
    %cst_119 = arith.constant dense<0.000000e+00> : vector<8x256xf32>
    %406 = tpu.matmul %405, %223, %cst_119 {dimension_numbers = #tpu.dot_dimension_numbers<[1], [0], [0], [1], [0, 0, 1, 1], [], []>} : vector<8x64xbf16>, vector<64x256xbf16>, vector<8x256xf32> -> vector<8x256xf32>
    %407 = arith.addf %404, %406 : vector<8x256xf32>
    %408 = vector.extract_strided_slice %407 {offsets = [0, 0], sizes = [8, 192], strides = [1, 1]} : vector<8x256xf32> to vector<8x192xf32>
    %409 = arith.negf %408 : vector<8x192xf32>
    %410 = math.exp %409 : vector<8x192xf32>
    %cst_120 = arith.constant 1.000000e+00 : f32
    %411 = vector.broadcast %cst_120 : f32 to vector<8x192xf32>
    %412 = arith.addf %411, %410 : vector<8x192xf32>
    %413 = arith.divf %411, %412 : vector<8x192xf32>
    %414 = vector.extract_strided_slice %407 {offsets = [0, 192], sizes = [8, 64], strides = [1, 1]} : vector<8x256xf32> to vector<8x64xf32>
    %415 = math.tanh %414 : vector<8x64xf32>
    %416 = vector.extract_strided_slice %413 {offsets = [0, 0], sizes = [8, 64], strides = [1, 1]} : vector<8x192xf32> to vector<8x64xf32>
    %417 = vector.extract_strided_slice %413 {offsets = [0, 64], sizes = [8, 64], strides = [1, 1]} : vector<8x192xf32> to vector<8x64xf32>
    %418 = vector.extract_strided_slice %413 {offsets = [0, 128], sizes = [8, 64], strides = [1, 1]} : vector<8x192xf32> to vector<8x64xf32>
    %419 = arith.mulf %417, %396 : vector<8x64xf32>
    %420 = arith.mulf %416, %415 : vector<8x64xf32>
    %421 = arith.addf %419, %420 : vector<8x64xf32>
    %422 = math.tanh %421 : vector<8x64xf32>
    %423 = arith.mulf %418, %422 : vector<8x64xf32>
    %424 = arith.index_cast %402 : i32 to index
    %c0_121 = arith.constant 0 : index
    %425 = vector.load %arg23[%424, %c0_121] : memref<64x64xf32, #tpu.memory_space<vmem>>, vector<8x64xf32>
    tpu.vector_store %arg23[%424, %c0_121], %423 {strides = array<i32>} : memref<64x64xf32, #tpu.memory_space<vmem>>, vector<8x64xf32>,
    %c8_i32_122 = arith.constant 8 : i32
    %c0_123 = arith.constant 0 : index
    %c0_124 = arith.constant 0 : index
    %426 = vector.load %arg20[%c0_123, %c0_124] : memref<8x64xf32, #tpu.memory_space<vmem>>, vector<8x64xf32>
    tpu.vector_store %arg20[%c0_123, %c0_124], %423 {strides = array<i32>} : memref<8x64xf32, #tpu.memory_space<vmem>>, vector<8x64xf32>,
    %c0_125 = arith.constant 0 : index
    %c0_126 = arith.constant 0 : index
    %427 = vector.load %arg21[%c0_125, %c0_126] : memref<8x64xf32, #tpu.memory_space<vmem>>, vector<8x64xf32>
    tpu.vector_store %arg21[%c0_125, %c0_126], %421 {strides = array<i32>} : memref<8x64xf32, #tpu.memory_space<vmem>>, vector<8x64xf32>,
    %c0_127 = arith.constant 0 : index
    %c0_128 = arith.constant 0 : index
    %428 = vector.load %arg23[%c0_127, %c0_128] : memref<64x64xf32, #tpu.memory_space<vmem>>, vector<64x64xf32>
    %429 = arith.truncf %428 : vector<64x64xf32> to vector<64x64xbf16>
    %c0_129 = arith.constant 0 : index
    %c0_130 = arith.constant 0 : index
    %430 = vector.load %arg9[%c0_129, %c0_130] : memref<64x4xf32, #tpu.memory_space<vmem>>, vector<64x4xf32>
    %cst_131 = arith.constant dense<0.000000e+00> : vector<64x4xf32>
    %431 = tpu.matmul %428, %430, %cst_131 {dimension_numbers = #tpu.dot_dimension_numbers<[1], [0], [0], [1], [0, 0, 1, 1], [], []>} : vector<64x64xf32>, vector<64x4xf32>, vector<64x4xf32> -> vector<64x4xf32>
    %c0_132 = arith.constant 0 : index
    %c0_133 = arith.constant 0 : index
    %432 = vector.load %arg10[%c0_132, %c0_133] : memref<1x4xf32, #tpu.memory_space<vmem>>, vector<1x4xf32>
    %433 = vector.broadcast %432 : vector<1x4xf32> to vector<64x4xf32>
    %434 = arith.addf %431, %433 : vector<64x4xf32>
    %c0_134 = arith.constant 0 : index
    %c0_135 = arith.constant 0 : index
    %435 = vector.load %arg11[%c0_134, %c0_135] : memref<64x256xbf16, #tpu.memory_space<vmem>>, vector<64x256xbf16>
    %cst_136 = arith.constant dense<0.000000e+00> : vector<64x256xf32>
    %436 = tpu.matmul %429, %435, %cst_136 {dimension_numbers = #tpu.dot_dimension_numbers<[1], [0], [0], [1], [0, 0, 1, 1], [], []>} : vector<64x64xbf16>, vector<64x256xbf16>, vector<64x256xf32> -> vector<64x256xf32>
    %c0_137 = arith.constant 0 : index
    %c0_138 = arith.constant 0 : index
    %437 = vector.load %arg12[%c0_137, %c0_138] : memref<1x256xf32, #tpu.memory_space<vmem>>, vector<1x256xf32>
    %438 = vector.broadcast %437 : vector<1x256xf32> to vector<64x256xf32>
    %439 = arith.addf %436, %438 : vector<64x256xf32>
    %cst_139 = arith.constant 0.000000e+00 : f32
    %440 = vector.broadcast %cst_139 : f32 to vector<64x256xf32>
    %441 = arith.maximumf %439, %440 : vector<64x256xf32>
    %442 = arith.truncf %441 : vector<64x256xf32> to vector<64x256xbf16>
    %c0_140 = arith.constant 0 : index
    %c0_141 = arith.constant 0 : index
    %443 = vector.load %arg13[%c0_140, %c0_141] : memref<256x128xbf16, #tpu.memory_space<vmem>>, vector<256x128xbf16>
    %cst_142 = arith.constant dense<0.000000e+00> : vector<64x128xf32>
    %444 = tpu.matmul %442, %443, %cst_142 {dimension_numbers = #tpu.dot_dimension_numbers<[1], [0], [0], [1], [0, 0, 1, 1], [], []>} : vector<64x256xbf16>, vector<256x128xbf16>, vector<64x128xf32> -> vector<64x128xf32>
    %c0_143 = arith.constant 0 : index
    %c0_144 = arith.constant 0 : index
    %445 = vector.load %arg14[%c0_143, %c0_144] : memref<1x128xf32, #tpu.memory_space<vmem>>, vector<1x128xf32>
    %446 = vector.broadcast %445 : vector<1x128xf32> to vector<64x128xf32>
    %447 = arith.addf %444, %446 : vector<64x128xf32>
    %cst_145 = arith.constant 0.000000e+00 : f32
    %448 = vector.broadcast %cst_145 : f32 to vector<64x128xf32>
    %449 = arith.maximumf %447, %448 : vector<64x128xf32>
    %c0_146 = arith.constant 0 : index
    %c0_147 = arith.constant 0 : index
    %450 = vector.load %arg15[%c0_146, %c0_147] : memref<128x4xf32, #tpu.memory_space<vmem>>, vector<128x4xf32>
    %cst_148 = arith.constant dense<0.000000e+00> : vector<64x4xf32>
    %451 = tpu.matmul %449, %450, %cst_148 {dimension_numbers = #tpu.dot_dimension_numbers<[1], [0], [0], [1], [0, 0, 1, 1], [], []>} : vector<64x128xf32>, vector<128x4xf32>, vector<64x4xf32> -> vector<64x4xf32>
    %452 = arith.addf %434, %451 : vector<64x4xf32>
    %c0_149 = arith.constant 0 : index
    %c0_150 = arith.constant 0 : index
    %453 = vector.load %arg16[%c0_149, %c0_150] : memref<1x4xf32, #tpu.memory_space<vmem>>, vector<1x4xf32>
    %454 = vector.broadcast %453 : vector<1x4xf32> to vector<64x4xf32>
    %455 = arith.addf %452, %454 : vector<64x4xf32>
    %c0_151 = arith.constant 0 : index
    %c0_152 = arith.constant 0 : index
    %456 = vector.load %arg17[%c0_151, %c0_152] : memref<64x4xf32, #tpu.memory_space<vmem>>, vector<64x4xf32>
    tpu.vector_store %arg17[%c0_151, %c0_152], %455 {strides = array<i32>} : memref<64x4xf32, #tpu.memory_space<vmem>>, vector<64x4xf32>,
    return
  }
  func.func @transform_0(%arg0: i32, %arg1: i32) -> (i32, i32) {
    %c1_i32 = arith.constant 1 : i32
    %0 = arith.muli %arg0, %c1_i32 : i32
    %1 = arith.addi %0, %arg1 : i32
    %c0_i32 = arith.constant 0 : i32
    %c0_i32_0 = arith.constant 0 : i32
    return %1, %c0_i32 : i32, i32
  }
  func.func @transform_1(%arg0: i32, %arg1: i32) -> (i32, i32) {
    %c0_i32 = arith.constant 0 : i32
    %c0_i32_0 = arith.constant 0 : i32
    %c0_i32_1 = arith.constant 0 : i32
    return %c0_i32, %c0_i32_0 : i32, i32
  }
  func.func @transform_2(%arg0: i32, %arg1: i32) -> (i32, i32) {
    %c0_i32 = arith.constant 0 : i32
    %c0_i32_0 = arith.constant 0 : i32
    %c0_i32_1 = arith.constant 0 : i32
    return %c0_i32, %c0_i32_0 : i32, i32
  }
  func.func @transform_3(%arg0: i32, %arg1: i32) -> (i32, i32) {
    %c0_i32 = arith.constant 0 : i32
    %c0_i32_0 = arith.constant 0 : i32
    %c0_i32_1 = arith.constant 0 : i32
    return %c0_i32, %c0_i32_0 : i32, i32
  }
  func.func @transform_4(%arg0: i32, %arg1: i32) -> (i32, i32) {
    %c0_i32 = arith.constant 0 : i32
    %c0_i32_0 = arith.constant 0 : i32
    %c0_i32_1 = arith.constant 0 : i32
    return %c0_i32, %c0_i32_0 : i32, i32
  }
  func.func @transform_5(%arg0: i32, %arg1: i32) -> (i32, i32) {
    %c0_i32 = arith.constant 0 : i32
    %c0_i32_0 = arith.constant 0 : i32
    %c0_i32_1 = arith.constant 0 : i32
    return %c0_i32, %c0_i32_0 : i32, i32
  }
  func.func @transform_6(%arg0: i32, %arg1: i32) -> (i32, i32) {
    %c0_i32 = arith.constant 0 : i32
    %c0_i32_0 = arith.constant 0 : i32
    %c0_i32_1 = arith.constant 0 : i32
    return %c0_i32, %c0_i32_0 : i32, i32
  }
  func.func @transform_7(%arg0: i32, %arg1: i32) -> (i32, i32) {
    %c0_i32 = arith.constant 0 : i32
    %c0_i32_0 = arith.constant 0 : i32
    %c0_i32_1 = arith.constant 0 : i32
    return %c0_i32, %c0_i32_0 : i32, i32
  }
  func.func @transform_8(%arg0: i32, %arg1: i32) -> (i32, i32) {
    %c0_i32 = arith.constant 0 : i32
    %c0_i32_0 = arith.constant 0 : i32
    %c0_i32_1 = arith.constant 0 : i32
    return %c0_i32, %c0_i32_0 : i32, i32
  }
  func.func @transform_9(%arg0: i32, %arg1: i32) -> (i32, i32) {
    %c0_i32 = arith.constant 0 : i32
    %c0_i32_0 = arith.constant 0 : i32
    %c0_i32_1 = arith.constant 0 : i32
    return %c0_i32, %c0_i32_0 : i32, i32
  }
  func.func @transform_10(%arg0: i32, %arg1: i32) -> (i32, i32) {
    %c0_i32 = arith.constant 0 : i32
    %c0_i32_0 = arith.constant 0 : i32
    %c0_i32_1 = arith.constant 0 : i32
    return %c0_i32, %c0_i32_0 : i32, i32
  }
  func.func @transform_11(%arg0: i32, %arg1: i32) -> (i32, i32) {
    %c0_i32 = arith.constant 0 : i32
    %c0_i32_0 = arith.constant 0 : i32
    %c0_i32_1 = arith.constant 0 : i32
    return %c0_i32, %c0_i32_0 : i32, i32
  }
  func.func @transform_12(%arg0: i32, %arg1: i32) -> (i32, i32) {
    %c0_i32 = arith.constant 0 : i32
    %c0_i32_0 = arith.constant 0 : i32
    %c0_i32_1 = arith.constant 0 : i32
    return %c0_i32, %c0_i32_0 : i32, i32
  }
  func.func @transform_13(%arg0: i32, %arg1: i32) -> (i32, i32) {
    %c0_i32 = arith.constant 0 : i32
    %c0_i32_0 = arith.constant 0 : i32
    %c0_i32_1 = arith.constant 0 : i32
    return %c0_i32, %c0_i32_0 : i32, i32
  }
  func.func @transform_14(%arg0: i32, %arg1: i32) -> (i32, i32) {
    %c0_i32 = arith.constant 0 : i32
    %c0_i32_0 = arith.constant 0 : i32
    %c0_i32_1 = arith.constant 0 : i32
    return %c0_i32, %c0_i32_0 : i32, i32
  }
  func.func @transform_15(%arg0: i32, %arg1: i32) -> (i32, i32) {
    %c1_i32 = arith.constant 1 : i32
    %0 = arith.muli %arg0, %c1_i32 : i32
    %1 = arith.addi %0, %arg1 : i32
    %c0_i32 = arith.constant 0 : i32
    %c0_i32_0 = arith.constant 0 : i32
    return %1, %c0_i32 : i32, i32
  }
}

</mosaic_0001>

<bundles_post_ra>
// kernel: tpu_custom_call.1
= control target key start
LH: loop header
LB: loop body
LE: loop exit
PB: predicated region body
PF: predicated region fallthrough
CT: control target
= control target key end

     0   :  { %20 = vsyncpa [#allocation9], 0  ;;  %s4118_s0 = inlined_call_operand.vmem [shape: f32[64,3], index: 0, kind: input, shape index: {}]   ;;  %s4119_s1 = inlined_call_operand.vmem [shape: f32[3,256], index: 1, kind: input, shape index: {}]   ;;  %s4120_s2 = inlined_call_operand.vmem [shape: bf16[64,256], index: 2, kind: input, shape index: {}]   ;;  %s4121_s3 = inlined_call_operand.hbm [shape: f32[1,256], index: 3, kind: input, shape index: {}]   ;;  %s4122_s4 = inlined_call_operand.vmem [shape: bf16[64,256], index: 4, kind: input, shape index: {}]   ;;  %s4123_s5 = inlined_call_operand.hbm [shape: bf16[64,256], index: 5, kind: input, shape index: {}]   ;;  %s4124_s6 = inlined_call_operand.vmem [shape: f32[1,256], index: 6, kind: input, shape index: {}]   ;;  %s4125_s7 = inlined_call_operand.vmem [shape: f32[64,4], index: 7, kind: input, shape index: {}]   ;;  %s4126_s8 = inlined_call_operand.vmem [shape: f32[1,4], index: 8, kind: input, shape index: {}]   ;;  %s4127_s9 = inlined_call_operand.hbm [shape: bf16[64,256], index: 9, kind: input, shape index: {}]   ;;  %s4128_s10 = inlined_call_operand.vmem [shape: f32[1,256], index: 10, kind: input, shape index: {}]   ;;  %s4129_s11 = inlined_call_operand.vmem [shape: bf16[256,128], index: 11, kind: input, shape index: {}]   ;;  %s4130_s12 = inlined_call_operand.vmem [shape: f32[1,128], index: 12, kind: input, shape index: {}]   ;;  %s4131_s13 = inlined_call_operand.vmem [shape: f32[128,4], index: 13, kind: input, shape index: {}]   ;;  %s4132_s14 = inlined_call_operand.vmem [shape: f32[1,4], index: 14, kind: input, shape index: {}]   ;;  %s4133_s15 = inlined_call_operand.vmem [shape: f32[64,4], index: 15, kind: output, shape index: {}]  }
   0x1   :  { %21 = vsyncpa [#allocation11], 0  ;;  %s3255_s18 = smov [#allocation10]  }
   0x2   :  { %s53_s19 = sshll.u32 %s3255_s18, 4  ;;  %s54_s19 = int_to_ptr.vmem [resolvable:$true] %s53_s19 }
   0x3   :  { %s3199_s20 = scalar_lea.vmem %s54_s19, 1024  ;;  %p3204_p1 = scmp.lt.s32.totalorder %s54_s19, %s54_s19 }
   0x4   :  { %p3200_p0 = scmp.ne.s32.totalorder %s54_s19, %s3199_s20  ;;  %p3205_p2 = scmp.lt.s32.totalorder %s3199_s20, %s3199_s20 }
   0x6   :  { %p3206_p3 = por %p3205_p2, %p3204_p1 }
   0x8   :  { %p3207_p4 = pnand %p3206_p3, %p3200_p0 }
   0xa   :  { %3210 = shalt.err (!%p3207_p4)
}
   0xb   :  { %s3256_s21 = smov 128   ;;  %s3257_s22 = smov 8  }
   0xc   :  { %59 = dma.hbm_to_vmem [thread:$0]  %s4123_s5, 1024, %s54_s19, [#allocation11], %s3256_s21, %s3256_s21, %s3257_s22  }
   0xd   :  { %s3258_s25 = smov [#allocation8]   ;;  %s3259_s27 = smov [#allocation12]  }
   0xe   :  { %s42_s26 = sshll.u32 %s3258_s25, 4  ;;  %s71_s28 = sshll.u32 %s3259_s27, 4  ;;  %s43_s26 = int_to_ptr.vmem [resolvable:$true] %s42_s26  ;;  %s72_s28 = int_to_ptr.vmem [resolvable:$true] %s71_s28 }
   0xf   :  { %s3219_s29 = scalar_lea.vmem %s43_s26, 32  ;;  %p3224_p6 = scmp.lt.s32.totalorder %s43_s26, %s43_s26 }
  0x10   :  { %p3220_p5 = scmp.ne.s32.totalorder %s43_s26, %s3219_s29  ;;  %p3225_p7 = scmp.lt.s32.totalorder %s3219_s29, %s3219_s29 }
  0x12   :  { %p3226_p8 = por %p3225_p7, %p3224_p6 }
  0x14   :  { %p3227_p9 = pnand %p3226_p8, %p3220_p5 }
  0x16   :  { %3230 = shalt.err (!%p3227_p9)
}
  0x17   :  { %45 = dma.hbm_to_vmem [thread:$0]  %s4121_s3, 32, %s43_s26, [#allocation9]  }
  0x18   :  { %s3239_s17 = scalar_lea.vmem %s72_s28, 1024  ;;  %p3244_p11 = scmp.lt.s32.totalorder %s72_s28, %s72_s28 }
  0x19   :  { %p3240_p10 = scmp.ne.s32.totalorder %s72_s28, %s3239_s17  ;;  %p3245_p12 = scmp.lt.s32.totalorder %s3239_s17, %s3239_s17 }
  0x1b   :  { %p3246_p13 = por %p3245_p12, %p3244_p11 }
  0x1d   :  { %p3247_p0 = pnand %p3246_p13, %p3240_p10 }
  0x1f   :  { %3250 = shalt.err (!%p3247_p0)
}
  0x20   :  { %77 = dma.hbm_to_vmem [thread:$0]  %s4127_s9, 1024, %s72_s28, [#allocation11], %s3256_s21, %s3256_s21, %s3257_s22  }
  0x21   :  { %3251 = dma.done.wait [#allocation9], 32  }
  0x22   :  { %3252 = vsyncadd [#allocation9], 4294967264 }
  0x23   :  { %3253 = dma.done.wait [#allocation11], 2048  }
  0x24   :  { %3254 = vsyncadd [#allocation11], 4294965248  ;;  %v3260_v0 = vmov 0.0   ;;  %v3261_v1 = vmov 0   ;;  %vm130_vm0 = vcmask 523264   ;;  %vm183_vm1 = vcmask 1042432  }
  0x25   :  { %252 = vmatprep.mubr.f32.mxu0 %v3260_v0  ;;  %409 = vmatprep.mubr.bf16.mxu1 %v3261_v1  ;;  %131 = vst.msk [vmem:[#allocation2] sm:$0xff] %vm130_vm0, %v3260_v0  ;;  %132 = vst.msk [vmem:[#allocation3] sm:$0xff] %vm130_vm0, %v3260_v0  ;;  %v3365_v2 = vld [vmem:[%s4120_s2 + $0x34] ss:$8 sps:$4 sm:$0xff]   ;;  %v3370_v3 = vld [vmem:[%s4120_s2 + $0x30] ss:$8 sps:$4 sm:$0xff]   ;;  %v146_v15 = vlaneseq }
  0x26   :  { %133 = vst.msk [vmem:[#allocation4] sm:$0xff] %vm130_vm0, %v3260_v0  ;;  %134 = vst.msk [vmem:[#allocation5] sm:$0xff] %vm130_vm0, %v3260_v0  ;;  %385 = vmatprep.subr.bf16.mxu1 %v3365_v2  ;;  %v3376_v4 = vld [vmem:[%s4120_s2 + $0x24] ss:$8 sps:$4 sm:$0xff]   ;;  %v3382_v5 = vld [vmem:[%s4120_s2 + $0x20] ss:$8 sps:$4 sm:$0xff]  }
  0x27   :  { %386 = vmatpush1.bf16.msra.mxu1 %v3370_v3  ;;  %v3388_v6 = vld [vmem:[%s4120_s2 + $0x14] ss:$8 sps:$4 sm:$0xff]   ;;  %v143_v7 = vld [vmem:[%s4119_s1] sm:$0x77]  ;;  %v3396_v8 = vld [vmem:[%s4120_s2 + $0x10] ss:$8 sps:$4 sm:$0xff]  }
  0x28   :  { %387 = vmatprep.subr.bf16.mxu1 %v3376_v4  ;;  %v157_v9 = vcombine.high %v143_v7, %v143_v7  ;;  %v135_v10 = vld [vmem:[%s4118_s0] sm:$0xff]  ;;  %vm158_vm2 = vcmask 23552   ;;  %v147_v16 = vshrl.u32 %v146_v15, 7  ;;  %v136_v44 = vld [vmem:[%s4118_s0 + $0x8] sm:$0xff]  ;;  %vm2599_vm3 = vcmask 31744  }
  0x29   :  { %v3404_v11 = vld [vmem:[%s4120_s2 + $0x4] ss:$8 sps:$4 sm:$0xff]   ;;  %v3412_v12 = vld [vmem:[%s4120_s2] ss:$8 sps:$4 sm:$0xff]   ;;  %s3262_s2 = smov 64  }
  0x2a   :  { %2649 = vmatprep.subr.msk.mxu0 %vm183_vm1, %v157_v9  ;;  %v3438_v17 = vsub.s32 0, %v147_v16  ;;  %v144_v18 = vld [vmem:[#allocation8] sm:$0x3]  ;;  %v3443_v20 = vsub.s32 1, %v147_v16  ;;  %v137_v16 = vld [vmem:[%s4118_s0 + $0x10] sm:$0xff] }
  0x2b   :  { %388 = vmatpush1.bf16.msra.mxu1 %v3382_v5  ;;  %2650 = vmatpush1.msk.msra.mxu0 %vm183_vm1, %v143_v7 }
  0x2c   :  { %389 = vmatprep.subr.bf16.mxu1 %v3388_v6  ;;  %2651 = vmatmul.mubr.msk.f32.vlgmr.msra.gmra.mxu0 %vm158_vm2, %v135_v10  ;;  %v325_v13 = vld [vmem:[#allocation2] sm:$0xff]  ;;  %v3441_v19 = vrot.slane %v144_v18, %v3438_v17  ;;  %v3447_v23 = vrot.slane %v144_v18, %v3443_v20  ;;  %v326_v33 = vld [vmem:[#allocation3] sm:$0xff]  ;;  %v138_v18 = vld [vmem:[%s4118_s0 + $0x18] sm:$0xff] }
  0x2d   :  { %556 = vmatprep.subr.bf16.mxu0 %v3365_v2  ;;  %258 = vmatprep.mubr.f32.mxu0 %v3260_v0  ;;  %v332_v14 = vpack.c.bf16 %v325_v13, %v325_v13 }
  0x2e   :  { %557 = vmatpush1.bf16.msra.mxu0 %v3370_v3 }
  0x2f   :  { %390 = vmatpush1.bf16.msra.mxu1 %v3396_v8  ;;  %558 = vmatprep.subr.bf16.mxu0 %v3376_v4 }
  0x30   :  { %391 = vmatprep.subr.bf16.mxu1 %v3404_v11  ;;  %2652 = vmatmul.mubr.msk.f32.gmra.mxu0 %vm158_vm2, %v136_v44 }
  0x31   :  { %264 = vmatprep.mubr.f32.mxu0 %v3260_v0 }
  0x32   :  { %559 = vmatpush1.bf16.msra.mxu0 %v3382_v5 }
  0x33   :  { %392 = vmatpush1.bf16.msra.mxu1 %v3412_v12  ;;  %560 = vmatprep.subr.bf16.mxu0 %v3388_v6 }
  0x34   :  { %472 = vmatprep.subr.bf16.mxu1 %v3365_v2  ;;  %2653 = vmatmul.mubr.msk.f32.gmra.mxu0 %vm158_vm2, %v137_v16 }
  0x35   :  { %270 = vmatprep.mubr.f32.mxu0 %v3260_v0 }
  0x36   :  { %2667 = vmatmul.mubr.msk.bf16.vlgmr.msra.gmra.mxu1 %vm130_vm0, %v332_v14  ;;  %561 = vmatpush1.bf16.msra.mxu0 %v3396_v8 }
  0x37   :  { %473 = vmatpush1.bf16.msra.mxu1 %v3370_v3  ;;  %496 = vmatprep.mubr.bf16.mxu1 %v3261_v1 }
  0x38   :  { %474 = vmatprep.subr.bf16.mxu1 %v3376_v4  ;;  %562 = vmatprep.subr.bf16.mxu0 %v3404_v11 }
  0x39   :  { %2654 = vmatmul.mubr.msk.f32.gmra.mxu0 %vm158_vm2, %v138_v18 }
  0x3a   :  { %563 = vmatpush1.bf16.msra.mxu0 %v3412_v12  ;;  %276 = vmatprep.mubr.f32.mxu0 %v3260_v0 }
  0x3b   :  { %475 = vmatpush1.bf16.msra.mxu1 %v3382_v5  ;;  %724 = vmatprep.subr.bf16.mxu0 %v3365_v2 }
  0x3c   :  { %476 = vmatprep.subr.bf16.mxu1 %v3388_v6 }
  0x3f   :  { %477 = vmatpush1.bf16.msra.mxu1 %v3396_v8 }
  0x40   :  { %478 = vmatprep.subr.bf16.mxu1 %v3404_v11 }
  0x43   :  { %479 = vmatpush1.bf16.msra.mxu1 %v3412_v12 }
  0x44   :  { %640 = vmatprep.subr.bf16.mxu1 %v3365_v2 }
  0xec   :  { %v254_v21 = vpop.f32.mrf.mxu0 }
  0xed   :  { %v255_v22 = vadd.f32 %v254_v21, %v3441_v19  ;;  %v139_v21 = vld [vmem:[%s4118_s0 + $0x20] sm:$0xff] }
  0xee   :  { %v256_v24 = vpop.f32.mrf.mxu0  ;;  %2655 = vmatmul.mubr.msk.f32.gmra.mxu0 %vm158_vm2, %v139_v21 }
  0xef   :  { %v257_v26 = vadd.f32 %v256_v24, %v3447_v23  ;;  %282 = vmatprep.mubr.f32.mxu0 %v3260_v0  ;;  %v141_v24 = vld [vmem:[%s4118_s0 + $0x30] sm:$0xff] }
  0xf0   :  { %v260_v53 = vpop.f32.mrf.mxu0 }
  0xf1   :  { %v261_v54 = vadd.f32 %v260_v53, %v3441_v19 }
  0xf2   :  { %v262_v55 = vpop.f32.mrf.mxu0 }
  0xf3   :  { %v263_v57 = vadd.f32 %v262_v55, %v3447_v23 }
  0xf6   :  { %v411_v25 = vpop.f32.mrf.mxu1 }
  0xf7   :  { %v418_v27 = vadd.f32 %v411_v25, %v255_v22  ;;  %v140_v22 = vld [vmem:[%s4118_s0 + $0x28] sm:$0xff]  ;;  %v142_v25 = vld [vmem:[%s4118_s0 + $0x38] sm:$0xff] }
  0xf8   :  { %v413_v28 = vpop.f32.mrf.mxu1  ;;  %2656 = vmatmul.mubr.msk.f32.gmra.mxu0 %vm158_vm2, %v140_v22 }
  0xf9   :  { %v419_v29 = vadd.f32 %v413_v28, %v257_v26  ;;  %v2668_v34 = vmul.f32 -1.442695, %v418_v27  ;;  %288 = vmatprep.mubr.f32.mxu0 %v3260_v0 }
  0xfa   :  { %v415_v30 = vpop.f32.mrf.mxu1 }
  0xfb   :  { %2999 = vtanh.f32 %v419_v29  ;;  %v2669_v46 = vmul.f32 -1.442695, %v419_v29 }
  0xfc   :  { %v416_v31 = vpop.f32.mrf.mxu1  ;;  %3001 = vpow2.f32 %v2668_v34  ;;  %2657 = vmatmul.mubr.msk.f32.gmra.mxu0 %vm158_vm2, %v141_v24 }
  0xfd   :  { %294 = vmatprep.mubr.f32.mxu0 %v3260_v0 }
 0x100   :  { %2658 = vmatmul.mubr.msk.f32.gmra.mxu0 %vm158_vm2, %v142_v25 }
 0x101   :  { %580 = vmatprep.mubr.bf16.mxu0 %v3261_v1 }
 0x108   :  { %v3000_v32 = vpop.eup %2999 }
 0x109   :  { %439 = vrot.lane.b32.xlu0 %v3000_v32, %s3262_s2  ;;  %v3002_v35 = vpop.eup %3001 }
 0x10a   :  { %v426_v36 = vadd.f32 1.0, %v3002_v35 }
 0x10c   :  { %3003 = vrcp.f32 %v426_v36  ;;  %v266_v36 = vpop.f32.mrf.mxu0 }
 0x10d   :  { %434 = vrot.lane.b32.xlu0 %v326_v33, %s3262_s2 }
 0x119   :  { %v3004_v37 = vpop.eup %3003 }
 0x17b   :  { %v440_v38 = vpop.permute.xlu0 %439 }
 0x17c   :  { %v442_v39 = vmul.f32 %v3004_v37, %v440_v38 }
 0x17e   :  { %444 = vrot.lane.b32.xlu1 %v442_v39, %s3262_s2 }
 0x17f   :  { %v435_v40 = vpop.permute.xlu0 %434 }
 0x180   :  { %v437_v41 = vmul.f32 %v3004_v37, %v435_v40  ;;  %v268_v37 = vpop.f32.mrf.mxu0 }
 0x182   :  { %v272_v38 = vpop.f32.mrf.mxu0 }
 0x183   :  { %v273_v24 = vadd.f32 %v272_v38, %v3441_v19 }
 0x184   :  { %v274_v39 = vpop.f32.mrf.mxu0 }
 0x1ae   :  { %v3520_v40 = vpop.f32.mrf.mxu0 }
 0x1f0   :  { %v445_v42 = vpop.permute.xlu1 %444 }
 0x1f1   :  { %v3453_v43 = vadd.f32 %v445_v42, %v437_v41  ;;  %v3522_v41 = vpop.f32.mrf.mxu0 }
 0x1f3   :  { %3005 = vtanh.f32 %v3453_v43  ;;  %v3524_v42 = vpop.f32.mrf.mxu0 }
 0x1f4   :  { %3007 = vpow2.f32 %v2669_v46 }
 0x200   :  { %v3006_v45 = vpop.eup %3005 }
 0x201   :  { %450 = vrot.lane.b32.xlu1 %v3006_v45, %s3262_s2  ;;  %v3008_v47 = vpop.eup %3007 }
 0x202   :  { %v427_v48 = vadd.f32 1.0, %v3008_v47 }
 0x204   :  { %3009 = vrcp.f32 %v427_v48  ;;  %v267_v48 = vadd.f32 %v266_v36, %v3441_v19 }
 0x211   :  { %v3010_v49 = vpop.eup %3009 }
 0x273   :  { %v451_v50 = vpop.permute.xlu1 %450 }
 0x274   :  { %v453_v51 = vmul.f32 %v3010_v49, %v451_v50  ;;  %v269_v50 = vadd.f32 %v268_v37, %v3447_v23 }
 0x276   :  { %454 = vst.msk [vmem:[#allocation7] sm:$0xff] %vm130_vm0, %v453_v51  ;;  %v460_v52 = vpack.c.bf16 %v453_v51, %v453_v51 }
 0x278   :  { %2670 = vmatmul.mubr.msk.bf16.vlgmr.msra.gmra.mxu1 %vm130_vm0, %v460_v52 }
 0x279   :  { %641 = vmatpush1.bf16.msra.mxu1 %v3370_v3  ;;  %664 = vmatprep.mubr.bf16.mxu1 %v3261_v1 }
 0x27a   :  { %642 = vmatprep.subr.bf16.mxu1 %v3376_v4 }
 0x27d   :  { %643 = vmatpush1.bf16.msra.mxu1 %v3382_v5 }
 0x27e   :  { %644 = vmatprep.subr.bf16.mxu1 %v3388_v6 }
 0x281   :  { %645 = vmatpush1.bf16.msra.mxu1 %v3396_v8 }
 0x282   :  { %646 = vmatprep.subr.bf16.mxu1 %v3404_v11 }
 0x285   :  { %647 = vmatpush1.bf16.msra.mxu1 %v3412_v12 }
 0x286   :  { %808 = vmatprep.subr.bf16.mxu1 %v3365_v2 }
 0x338   :  { %v498_v56 = vpop.f32.mrf.mxu1 }
 0x339   :  { %v505_v58 = vadd.f32 %v498_v56, %v261_v54 }
 0x33a   :  { %v500_v59 = vpop.f32.mrf.mxu1 }
 0x33b   :  { %v506_v60 = vadd.f32 %v500_v59, %v263_v57  ;;  %v2671_v7 = vmul.f32 -1.442695, %v505_v58 }
 0x33c   :  { %v502_v61 = vpop.f32.mrf.mxu1 }
 0x33d   :  { %3011 = vtanh.f32 %v506_v60  ;;  %v2672_v30 = vmul.f32 -1.442695, %v506_v60 }
 0x33e   :  { %v503_v62 = vpop.f32.mrf.mxu1  ;;  %3013 = vpow2.f32 %v2671_v7 }
 0x34a   :  { %v3012_v63 = vpop.eup %3011 }
 0x34b   :  { %522 = vrot.lane.b32.xlu0 %v3012_v63, %s3262_s2  ;;  %v3014_v9 = vpop.eup %3013 }
 0x34c   :  { %v513_v10 = vadd.f32 1.0, %v3014_v9 }
 0x34e   :  { %3015 = vrcp.f32 %v513_v10 }
 0x35b   :  { %v3016_v13 = vpop.eup %3015 }
 0x35c   :  { %v520_v26 = vmul.f32 %v3016_v13, %v3453_v43  ;;  %v3526_v43 = vpop.f32.mrf.mxu0 }
 0x35e   :  { %v3528_v44 = vpop.f32.mrf.mxu0 }
 0x360   :  { %v3530_v45 = vpop.f32.mrf.mxu0 }
 0x362   :  { %v3532_v46 = vpop.f32.mrf.mxu0 }
 0x364   :  { %v3534_v47 = vpop.f32.mrf.mxu0 }
 0x3bd   :  { %v523_v14 = vpop.permute.xlu0 %522 }
 0x3be   :  { %v525_v15 = vmul.f32 %v3016_v13, %v523_v14 }
 0x3c0   :  { %527 = vrot.lane.b32.xlu1 %v525_v15, %s3262_s2 }
 0x432   :  { %v528_v27 = vpop.permute.xlu1 %527 }
 0x433   :  { %v530_v28 = vadd.f32 %v528_v27, %v520_v26  ;;  %v275_v26 = vadd.f32 %v274_v39, %v3447_v23 }
 0x435   :  { %3017 = vtanh.f32 %v530_v28 }
 0x436   :  { %3019 = vpow2.f32 %v2672_v30 }
 0x442   :  { %v3018_v29 = vpop.eup %3017 }
 0x443   :  { %533 = vrot.lane.b32.xlu0 %v3018_v29, %s3262_s2  ;;  %v3020_v31 = vpop.eup %3019 }
 0x444   :  { %v514_v0 = vadd.f32 1.0, %v3020_v31 }
 0x446   :  { %3021 = vrcp.f32 %v514_v0 }
 0x453   :  { %v3022_v32 = vpop.eup %3021 }
 0x4b5   :  { %v534_v33 = vpop.permute.xlu0 %533 }
 0x4b6   :  { %v536_v34 = vmul.f32 %v3022_v32, %v534_v33 }
 0x4b8   :  { %538 = vst.msk [vmem:[#allocation7 + $0x8] sm:$0xff] %vm130_vm0, %v536_v34  ;;  %v544_v35 = vpack.c.bf16 %v536_v34, %v536_v34 }
 0x4ba   :  { %2673 = vmatmul.mubr.msk.bf16.vlgmr.msra.gmra.mxu0 %vm130_vm0, %v544_v35 }
 0x4bb   :  { %725 = vmatpush1.bf16.msra.mxu0 %v3370_v3  ;;  %748 = vmatprep.mubr.bf16.mxu0 %v3261_v1 }
 0x4bc   :  { %726 = vmatprep.subr.bf16.mxu0 %v3376_v4 }
 0x4bf   :  { %727 = vmatpush1.bf16.msra.mxu0 %v3382_v5 }
 0x4c0   :  { %728 = vmatprep.subr.bf16.mxu0 %v3388_v6 }
 0x4c3   :  { %729 = vmatpush1.bf16.msra.mxu0 %v3396_v8 }
 0x4c4   :  { %730 = vmatprep.subr.bf16.mxu0 %v3404_v11 }
 0x4c7   :  { %731 = vmatpush1.bf16.msra.mxu0 %v3412_v12 }
 0x4c8   :  { %892 = vmatprep.subr.bf16.mxu0 %v3365_v2 }
 0x57a   :  { %v582_v49 = vpop.f32.mrf.mxu0 }
 0x57b   :  { %v589_v51 = vadd.f32 %v582_v49, %v267_v48 }
 0x57c   :  { %v584_v52 = vpop.f32.mrf.mxu0 }
 0x57d   :  { %v590_v53 = vadd.f32 %v584_v52, %v269_v50  ;;  %v2674_v57 = vmul.f32 -1.442695, %v589_v51 }
 0x57e   :  { %v586_v54 = vpop.f32.mrf.mxu0 }
 0x57f   :  { %3023 = vtanh.f32 %v590_v53  ;;  %v2675_v13 = vmul.f32 -1.442695, %v590_v53 }
 0x580   :  { %v587_v55 = vpop.f32.mrf.mxu0  ;;  %3025 = vpow2.f32 %v2674_v57 }
 0x58c   :  { %v3024_v56 = vpop.eup %3023 }
 0x58d   :  { %606 = vrot.lane.b32.xlu1 %v3024_v56, %s3262_s2  ;;  %v3026_v58 = vpop.eup %3025  ;;  %v279_v56 = vadd.f32 %v3520_v40, %v3441_v19 }
 0x58e   :  { %v597_v59 = vadd.f32 1.0, %v3026_v58  ;;  %v281_v58 = vadd.f32 %v3522_v41, %v3447_v23 }
 0x590   :  { %3027 = vrcp.f32 %v597_v59 }
 0x59d   :  { %v3028_v60 = vpop.eup %3027 }
 0x59e   :  { %v604_v63 = vmul.f32 %v3028_v60, %v530_v28 }
 0x5ff   :  { %v607_v61 = vpop.permute.xlu1 %606 }
 0x600   :  { %v609_v62 = vmul.f32 %v3028_v60, %v607_v61 }
 0x602   :  { %611 = vrot.lane.b32.xlu0 %v609_v62, %s3262_s2 }
 0x674   :  { %v612_v7 = vpop.permute.xlu0 %611 }
 0x675   :  { %v614_v9 = vadd.f32 %v612_v7, %v604_v63 }
 0x677   :  { %3029 = vtanh.f32 %v614_v9 }
 0x678   :  { %3031 = vpow2.f32 %v2675_v13 }
 0x684   :  { %v3030_v10 = vpop.eup %3029 }
 0x685   :  { %617 = vrot.lane.b32.xlu1 %v3030_v10, %s3262_s2  ;;  %v3032_v14 = vpop.eup %3031 }
 0x686   :  { %v598_v15 = vadd.f32 1.0, %v3032_v14 }
 0x688   :  { %3033 = vrcp.f32 %v598_v15 }
 0x695   :  { %v3034_v16 = vpop.eup %3033 }
 0x6f7   :  { %v618_v18 = vpop.permute.xlu1 %617 }
 0x6f8   :  { %v620_v21 = vmul.f32 %v3034_v16, %v618_v18 }
 0x6fa   :  { %622 = vst.msk [vmem:[#allocation7 + $0x10] sm:$0xff] %vm130_vm0, %v620_v21  ;;  %v628_v22 = vpack.c.bf16 %v620_v21, %v620_v21 }
 0x6fc   :  { %2676 = vmatmul.mubr.msk.bf16.vlgmr.msra.gmra.mxu1 %vm130_vm0, %v628_v22 }
 0x6fd   :  { %809 = vmatpush1.bf16.msra.mxu1 %v3370_v3  ;;  %832 = vmatprep.mubr.bf16.mxu1 %v3261_v1 }
 0x6fe   :  { %810 = vmatprep.subr.bf16.mxu1 %v3376_v4 }
 0x701   :  { %811 = vmatpush1.bf16.msra.mxu1 %v3382_v5 }
 0x702   :  { %812 = vmatprep.subr.bf16.mxu1 %v3388_v6 }
 0x705   :  { %813 = vmatpush1.bf16.msra.mxu1 %v3396_v8 }
 0x706   :  { %814 = vmatprep.subr.bf16.mxu1 %v3404_v11 }
 0x709   :  { %815 = vmatpush1.bf16.msra.mxu1 %v3412_v12 }
 0x70a   :  { %976 = vmatprep.subr.bf16.mxu1 %v3365_v2 }
 0x7bc   :  { %v666_v25 = vpop.f32.mrf.mxu1 }
 0x7bd   :  { %v673_v27 = vadd.f32 %v666_v25, %v273_v24 }
 0x7be   :  { %v668_v28 = vpop.f32.mrf.mxu1 }
 0x7bf   :  { %v674_v29 = vadd.f32 %v668_v28, %v275_v26  ;;  %v2677_v32 = vmul.f32 -1.442695, %v673_v27 }
 0x7c0   :  { %v670_v30 = vpop.f32.mrf.mxu1 }
 0x7c1   :  { %3035 = vtanh.f32 %v674_v29  ;;  %v2678_v49 = vmul.f32 -1.442695, %v674_v29  ;;  %v285_v30 = vadd.f32 %v3524_v42, %v3441_v19 }
 0x7c2   :  { %v671_v31 = vpop.f32.mrf.mxu1  ;;  %3037 = vpow2.f32 %v2677_v32 }
 0x7ce   :  { %v3036_v0 = vpop.eup %3035 }
 0x7cf   :  { %690 = vrot.lane.b32.xlu0 %v3036_v0, %s3262_s2  ;;  %v3038_v33 = vpop.eup %3037 }
 0x7d0   :  { %v681_v34 = vadd.f32 1.0, %v3038_v33 }
 0x7d2   :  { %3039 = vrcp.f32 %v681_v34 }
 0x7df   :  { %v3040_v2 = vpop.eup %3039 }
 0x7e0   :  { %v688_v37 = vmul.f32 %v3040_v2, %v614_v9 }
 0x841   :  { %v691_v35 = vpop.permute.xlu0 %690 }
 0x842   :  { %v693_v36 = vmul.f32 %v3040_v2, %v691_v35 }
 0x844   :  { %695 = vrot.lane.b32.xlu1 %v693_v36, %s3262_s2 }
 0x8b6   :  { %v696_v38 = vpop.permute.xlu1 %695 }
 0x8b7   :  { %v698_v39 = vadd.f32 %v696_v38, %v688_v37  ;;  %v2949_v37 = vld [vmem:[%s4122_s4 + $0x34] ss:$8 sps:$4 sm:$0xff]  }
 0x8b9   :  { %3041 = vtanh.f32 %v698_v39 }
 0x8ba   :  { %3043 = vpow2.f32 %v2678_v49 }
 0x8c6   :  { %v3042_v48 = vpop.eup %3041 }
 0x8c7   :  { %701 = vrot.lane.b32.xlu0 %v3042_v48, %s3262_s2  ;;  %v3044_v50 = vpop.eup %3043 }
 0x8c8   :  { %v682_v51 = vadd.f32 1.0, %v3044_v50 }
 0x8ca   :  { %3045 = vrcp.f32 %v682_v51 }
 0x8d7   :  { %v3046_v52 = vpop.eup %3045 }
 0x939   :  { %v702_v53 = vpop.permute.xlu0 %701 }
 0x93a   :  { %v704_v54 = vmul.f32 %v3046_v52, %v702_v53  ;;  %v2947_v53 = vld [vmem:[%s4122_s4 + $0x30] ss:$8 sps:$4 sm:$0xff]  }
 0x93c   :  { %706 = vst.msk [vmem:[#allocation7 + $0x18] sm:$0xff] %vm130_vm0, %v704_v54  ;;  %v712_v55 = vpack.c.bf16 %v704_v54, %v704_v54 }
 0x93e   :  { %2679 = vmatmul.mubr.msk.bf16.vlgmr.msra.gmra.mxu0 %vm130_vm0, %v712_v55  ;;  %v2952_v55 = vld [vmem:[%s4122_s4 + $0x24] ss:$8 sps:$4 sm:$0xff]  }
 0x93f   :  { %893 = vmatpush1.bf16.msra.mxu0 %v3370_v3  ;;  %916 = vmatprep.mubr.bf16.mxu0 %v3261_v1 }
 0x940   :  { %894 = vmatprep.subr.bf16.mxu0 %v3376_v4 }
 0x943   :  { %895 = vmatpush1.bf16.msra.mxu0 %v3382_v5 }
 0x944   :  { %896 = vmatprep.subr.bf16.mxu0 %v3388_v6 }
 0x947   :  { %897 = vmatpush1.bf16.msra.mxu0 %v3396_v8 }
 0x948   :  { %898 = vmatprep.subr.bf16.mxu0 %v3404_v11 }
 0x94b   :  { %899 = vmatpush1.bf16.msra.mxu0 %v3412_v12 }
 0x94c   :  { %1141 = vmatprep.subr.bf16.mxu0 %v2949_v37 }
 0x9fe   :  { %v750_v57 = vpop.f32.mrf.mxu0 }
 0x9ff   :  { %v757_v59 = vadd.f32 %v750_v57, %v279_v56  ;;  %v2950_v56 = vld [vmem:[%s4122_s4 + $0x20] ss:$8 sps:$4 sm:$0xff]   ;;  %v2955_v57 = vld [vmem:[%s4122_s4 + $0x14] ss:$8 sps:$4 sm:$0xff]  }
 0xa00   :  { %v752_v60 = vpop.f32.mrf.mxu0 }
 0xa01   :  { %v758_v61 = vadd.f32 %v752_v60, %v281_v58  ;;  %v2680_v9 = vmul.f32 -1.442695, %v757_v59  ;;  %v2953_v58 = vld [vmem:[%s4122_s4 + $0x10] ss:$8 sps:$4 sm:$0xff]   ;;  %v2958_v59 = vld [vmem:[%s4122_s4 + $0x4] ss:$8 sps:$4 sm:$0xff]  }
 0xa02   :  { %v754_v62 = vpop.f32.mrf.mxu0  ;;  %v2956_v60 = vld [vmem:[%s4122_s4] ss:$8 sps:$4 sm:$0xff]  }
 0xa03   :  { %3047 = vtanh.f32 %v758_v61  ;;  %v2681_v22 = vmul.f32 -1.442695, %v758_v61  ;;  %v1050_v61 = vld [vmem:[#allocation7 + $0x8] sm:$0xff]  ;;  %v1049_v62 = vld [vmem:[#allocation7] sm:$0xff] }
 0xa04   :  { %v755_v63 = vpop.f32.mrf.mxu0  ;;  %3049 = vpow2.f32 %v2680_v9  ;;  %v1051_v9 = vld [vmem:[#allocation7 + $0x10] sm:$0xff] }
 0xa05   :  { %v1057_v63 = vpack.c.bf16 %v1050_v61, %v1049_v62 }
 0xa10   :  { %v3048_v7 = vpop.eup %3047 }
 0xa11   :  { %774 = vrot.lane.b32.xlu1 %v3048_v7, %s3262_s2  ;;  %v3050_v10 = vpop.eup %3049  ;;  %v1052_v7 = vld [vmem:[#allocation7 + $0x18] sm:$0xff] }
 0xa12   :  { %v765_v13 = vadd.f32 1.0, %v3050_v10  ;;  %v1058_v10 = vpack.c.bf16 %v1052_v7, %v1051_v9 }
 0xa14   :  { %3051 = vrcp.f32 %v765_v13 }
 0xa21   :  { %v3052_v14 = vpop.eup %3051 }
 0xa22   :  { %v772_v41 = vmul.f32 %v3052_v14, %v698_v39 }
 0xa83   :  { %v775_v40 = vpop.permute.xlu1 %774 }
 0xa84   :  { %v777_v15 = vmul.f32 %v3052_v14, %v775_v40 }
 0xa86   :  { %779 = vrot.lane.b32.xlu0 %v777_v15, %s3262_s2  ;;  %v291_v15 = vadd.f32 %v3528_v44, %v3441_v19 }
 0xaf8   :  { %v780_v16 = vpop.permute.xlu0 %779 }
 0xaf9   :  { %v782_v18 = vadd.f32 %v780_v16, %v772_v41  ;;  %v293_v16 = vadd.f32 %v3530_v45, %v3447_v23 }
 0xafb   :  { %3053 = vtanh.f32 %v782_v18 }
 0xafc   :  { %3055 = vpow2.f32 %v2681_v22 }
 0xb08   :  { %v3054_v21 = vpop.eup %3053 }
 0xb09   :  { %785 = vrot.lane.b32.xlu1 %v3054_v21, %s3262_s2  ;;  %v3056_v24 = vpop.eup %3055 }
 0xb0a   :  { %v766_v25 = vadd.f32 1.0, %v3056_v24 }
 0xb0c   :  { %3057 = vrcp.f32 %v766_v25 }
 0xb19   :  { %v3058_v26 = vpop.eup %3057 }
 0xb7b   :  { %v786_v27 = vpop.permute.xlu1 %785 }
 0xb7c   :  { %v788_v28 = vmul.f32 %v3058_v26, %v786_v27 }
 0xb7e   :  { %790 = vst.msk [vmem:[#allocation7 + $0x20] sm:$0xff] %vm130_vm0, %v788_v28  ;;  %v796_v29 = vpack.c.bf16 %v788_v28, %v788_v28 }
 0xb80   :  { %2682 = vmatmul.mubr.msk.bf16.vlgmr.msra.gmra.mxu1 %vm130_vm0, %v796_v29 }
 0xb81   :  { %977 = vmatpush1.bf16.msra.mxu1 %v3370_v3  ;;  %1000 = vmatprep.mubr.bf16.mxu1 %v3261_v1  ;;  %v287_v3 = vadd.f32 %v3526_v43, %v3447_v23 }
 0xb82   :  { %978 = vmatprep.subr.bf16.mxu1 %v3376_v4 }
 0xb85   :  { %979 = vmatpush1.bf16.msra.mxu1 %v3382_v5  ;;  %v1053_v14 = vld [vmem:[#allocation7 + $0x20] sm:$0xff] }
 0xb86   :  { %980 = vmatprep.subr.bf16.mxu1 %v3388_v6 }
 0xb89   :  { %981 = vmatpush1.bf16.msra.mxu1 %v3396_v8 }
 0xb8a   :  { %982 = vmatprep.subr.bf16.mxu1 %v3404_v11 }
 0xb8d   :  { %983 = vmatpush1.bf16.msra.mxu1 %v3412_v12 }
 0xc40   :  { %v834_v31 = vpop.f32.mrf.mxu1 }
 0xc41   :  { %v841_v0 = vadd.f32 %v834_v31, %v285_v30 }
 0xc42   :  { %v836_v32 = vpop.f32.mrf.mxu1 }
 0xc43   :  { %v842_v4 = vadd.f32 %v836_v32, %v287_v3  ;;  %v2683_v8 = vmul.f32 -1.442695, %v841_v0  ;;  %v3637_v32 = vld [vmem:[#allocation10 + $0x34] ss:$8 sps:$4 sm:$0xff]  }
 0xc44   :  { %v838_v33 = vpop.f32.mrf.mxu1  ;;  %1286 = vmatprep.subr.bf16.mxu1 %v3637_v32 }
 0xc45   :  { %3059 = vtanh.f32 %v842_v4  ;;  %v2684_v39 = vmul.f32 -1.442695, %v842_v4  ;;  %v3639_v4 = vld [vmem:[#allocation10 + $0x30] ss:$8 sps:$4 sm:$0xff]   ;;  %v3644_v33 = vld [vmem:[#allocation10 + $0x24] ss:$8 sps:$4 sm:$0xff]  }
 0xc46   :  { %v839_v5 = vpop.f32.mrf.mxu1  ;;  %3061 = vpow2.f32 %v2683_v8  ;;  %v3652_v8 = vld [vmem:[#allocation10 + $0x10] ss:$8 sps:$4 sm:$0xff]  }
 0xc47   :  { %v3646_v5 = vld [vmem:[#allocation10 + $0x20] ss:$8 sps:$4 sm:$0xff]  }
 0xc52   :  { %v3060_v6 = vpop.eup %3059 }
 0xc53   :  { %858 = vrot.lane.b32.xlu0 %v3060_v6, %s3262_s2  ;;  %v3062_v11 = vpop.eup %3061  ;;  %v3650_v6 = vld [vmem:[#allocation10 + $0x14] ss:$8 sps:$4 sm:$0xff]  }
 0xc54   :  { %v849_v12 = vadd.f32 1.0, %v3062_v11 }
 0xc56   :  { %3063 = vrcp.f32 %v849_v12  ;;  %v3657_v12 = vld [vmem:[#allocation10 + $0x4] ss:$8 sps:$4 sm:$0xff]  }
 0xc63   :  { %v3064_v34 = vpop.eup %3063 }
 0xc64   :  { %v856_v43 = vmul.f32 %v3064_v34, %v782_v18 }
 0xcc5   :  { %v859_v42 = vpop.permute.xlu0 %858 }
 0xcc6   :  { %v861_v2 = vmul.f32 %v3064_v34, %v859_v42  ;;  %v3659_v34 = vld [vmem:[#allocation10] ss:$8 sps:$4 sm:$0xff]   ;;  %v1231_v42 = vld [vmem:[#allocation5] sm:$0xff] }
 0xcc8   :  { %863 = vrot.lane.b32.xlu1 %v861_v2, %s3262_s2 }
 0xd3a   :  { %v864_v35 = vpop.permute.xlu1 %863 }
 0xd3b   :  { %v3590_v36 = vadd.f32 %v864_v35, %v856_v43 }
 0xd3d   :  { %3065 = vtanh.f32 %v3590_v36 }
 0xd3e   :  { %3067 = vpow2.f32 %v2684_v39 }
 0xd4a   :  { %v3066_v38 = vpop.eup %3065 }
 0xd4b   :  { %869 = vrot.lane.b32.xlu0 %v3066_v38, %s3262_s2  ;;  %v3068_v48 = vpop.eup %3067 }
 0xd4c   :  { %v850_v49 = vadd.f32 1.0, %v3068_v48  ;;  %v1230_v48 = vld [vmem:[#allocation4] sm:$0xff] }
 0xd4e   :  { %3069 = vrcp.f32 %v850_v49  ;;  %v1234_v49 = vpack.c.bf16 %v1230_v48, %v1230_v48 }
 0xd5b   :  { %v3070_v50 = vpop.eup %3069 }
 0xdbd   :  { %v870_v51 = vpop.permute.xlu0 %869 }
 0xdbe   :  { %v872_v52 = vmul.f32 %v3070_v50, %v870_v51  ;;  %v297_v50 = vadd.f32 %v3532_v46, %v3441_v19 }
 0xdc0   :  { %874 = vst.msk [vmem:[#allocation7 + $0x28] sm:$0xff] %vm130_vm0, %v872_v52  ;;  %v880_v54 = vpack.c.bf16 %v872_v52, %v872_v52 }
 0xdc2   :  { %2685 = vmatmul.mubr.msk.bf16.vlgmr.msra.gmra.mxu0 %vm130_vm0, %v880_v54 }
 0xdc3   :  { %1142 = vmatpush1.bf16.msra.mxu0 %v2947_v53  ;;  %1165 = vmatprep.mubr.bf16.mxu0 %v3261_v1 }
 0xdc4   :  { %1143 = vmatprep.subr.bf16.mxu0 %v2952_v55 }
 0xdc7   :  { %1144 = vmatpush1.bf16.msra.mxu0 %v2950_v56  ;;  %v1054_v13 = vld [vmem:[#allocation7 + $0x28] sm:$0xff]  ;;  %v1069_v56 = vld [vmem:[%s4124_s6] sm:$0x3] }
 0xdc8   :  { %1145 = vmatprep.subr.bf16.mxu0 %v2955_v57  ;;  %v1059_v40 = vpack.c.bf16 %v1054_v13, %v1053_v14  ;;  %v3692_v57 = vrot.slane %v1069_v56, %v3438_v17 }
 0xdcb   :  { %1146 = vmatpush1.bf16.msra.mxu0 %v2953_v58 }
 0xdcc   :  { %1147 = vmatprep.subr.bf16.mxu0 %v2958_v59 }
 0xdcf   :  { %1148 = vmatpush1.bf16.msra.mxu0 %v2956_v60  ;;  %v3696_v60 = vrot.slane %v1069_v56, %v3443_v20 }
 0xdd0   :  { %1450 = vmatprep.subr.bf16.mxu0 %v3637_v32 }
 0xdd2   :  { %2699 = vmatmul.mubr.msk.bf16.vlgmr.msra.gmra.mxu0 %vm130_vm0, %v1057_v63 }
 0xdd3   :  { %1175 = vmatprep.mubr.bf16.mxu0 %v3261_v1  ;;  %1451 = vmatpush1.bf16.msra.mxu0 %v3639_v4 }
 0xdd4   :  { %1452 = vmatprep.subr.bf16.mxu0 %v3644_v33 }
 0xdd7   :  { %1453 = vmatpush1.bf16.msra.mxu0 %v3646_v5 }
 0xdd8   :  { %1454 = vmatprep.subr.bf16.mxu0 %v3650_v6 }
 0xdda   :  { %2700 = vmatmul.mubr.msk.bf16.gmra.mxu0 %vm130_vm0, %v1058_v10 }
 0xddb   :  { %1185 = vmatprep.mubr.bf16.mxu0 %v3261_v1  ;;  %1455 = vmatpush1.bf16.msra.mxu0 %v3652_v8 }
 0xddc   :  { %1456 = vmatprep.subr.bf16.mxu0 %v3657_v12 }
 0xddf   :  { %1457 = vmatpush1.bf16.msra.mxu0 %v3659_v34 }
 0xde0   :  { %1610 = vmatprep.subr.bf16.mxu0 %v3637_v32 }
 0xde2   :  { %2701 = vmatmul.mubr.msk.bf16.gmra.mxu0 %vm130_vm0, %v1059_v40 }
 0xde3   :  { %1195 = vmatprep.mubr.bf16.mxu0 %v3261_v1 }
 0xe82   :  { %v918_v41 = vpop.f32.mrf.mxu0 }
 0xe83   :  { %v925_v18 = vadd.f32 %v918_v41, %v291_v15  ;;  %v299_v41 = vadd.f32 %v3534_v47, %v3447_v23 }
 0xe84   :  { %v920_v21 = vpop.f32.mrf.mxu0 }
 0xe85   :  { %v926_v22 = vadd.f32 %v920_v21, %v293_v16  ;;  %v2686_v27 = vmul.f32 -1.442695, %v925_v18 }
 0xe86   :  { %v922_v24 = vpop.f32.mrf.mxu0 }
 0xe87   :  { %3071 = vtanh.f32 %v926_v22  ;;  %v2687_v2 = vmul.f32 -1.442695, %v926_v22 }
 0xe88   :  { %v923_v25 = vpop.f32.mrf.mxu0  ;;  %3073 = vpow2.f32 %v2686_v27 }
 0xe92   :  { %v1167_v58 = vpop.f32.mrf.mxu0 }
 0xe93   :  { %v1168_v59 = vadd.f32 %v1167_v58, %v3692_v57 }
 0xe94   :  { %v3072_v26 = vpop.eup %3071  ;;  %v1169_v61 = vpop.f32.mrf.mxu0 }
 0xe95   :  { %942 = vrot.lane.b32.xlu1 %v3072_v26, %s3262_s2  ;;  %v3074_v28 = vpop.eup %3073  ;;  %v1170_v63 = vadd.f32 %v1169_v61, %v3696_v60 }
 0xe96   :  { %v933_v29 = vadd.f32 1.0, %v3074_v28  ;;  %v1171_v58 = vpop.f32.mrf.mxu0 }
 0xe97   :  { %v1172_v61 = vadd.f32 %v1171_v58, %v3692_v57 }
 0xe98   :  { %3075 = vrcp.f32 %v933_v29 }
 0xea5   :  { %v3076_v30 = vpop.eup %3075 }
 0xea6   :  { %v940_v45 = vmul.f32 %v3076_v30, %v3590_v36 }
 0xf07   :  { %v943_v44 = vpop.permute.xlu1 %942 }
 0xf08   :  { %v945_v31 = vmul.f32 %v3076_v30, %v943_v44 }
 0xf0a   :  { %947 = vrot.lane.b32.xlu0 %v945_v31, %s3262_s2 }
 0xf7c   :  { %v948_v3 = vpop.permute.xlu0 %947 }
 0xf7d   :  { %v3634_v0 = vadd.f32 %v948_v3, %v940_v45 }
 0xf7f   :  { %3077 = vtanh.f32 %v3634_v0 }
 0xf80   :  { %3079 = vpow2.f32 %v2687_v2 }
 0xf8c   :  { %v3078_v11 = vpop.eup %3077 }
 0xf8d   :  { %953 = vrot.lane.b32.xlu1 %v3078_v11, %s3262_s2  ;;  %v3080_v43 = vpop.eup %3079 }
 0xf8e   :  { %v934_v35 = vadd.f32 1.0, %v3080_v43 }
 0xf90   :  { %3081 = vrcp.f32 %v934_v35 }
 0xf91   :  { %1335 = vrot.lane.b32.xlu1 %v1231_v42, %s3262_s2 }
 0xf9d   :  { %v3082_v36 = vpop.eup %3081 }
 0xfff   :  { %v954_v37 = vpop.permute.xlu1 %953 }
0x1000   :  { %v956_v38 = vmul.f32 %v3082_v36, %v954_v37 }
0x1002   :  { %958 = vst.msk [vmem:[#allocation7 + $0x30] sm:$0xff] %vm130_vm0, %v956_v38  ;;  %v964_v39 = vpack.c.bf16 %v956_v38, %v956_v38 }
0x1003   :  { %v1336_v28 = vpop.permute.xlu1 %1335 }
0x1004   :  { %2688 = vmatmul.mubr.msk.bf16.vlgmr.msra.gmra.mxu1 %vm130_vm0, %v964_v39 }
0x1005   :  { %1287 = vmatpush1.bf16.msra.mxu1 %v3639_v4  ;;  %1310 = vmatprep.mubr.bf16.mxu1 %v3261_v1 }
0x1006   :  { %1288 = vmatprep.subr.bf16.mxu1 %v3644_v33 }
0x1009   :  { %1289 = vmatpush1.bf16.msra.mxu1 %v3646_v5 }
0x100a   :  { %1290 = vmatprep.subr.bf16.mxu1 %v3650_v6 }
0x100d   :  { %1291 = vmatpush1.bf16.msra.mxu1 %v3652_v8 }
0x100e   :  { %1292 = vmatprep.subr.bf16.mxu1 %v3657_v12 }
0x1011   :  { %1293 = vmatpush1.bf16.msra.mxu1 %v3659_v34 }
0x1012   :  { %1370 = vmatprep.subr.bf16.mxu1 %v3637_v32 }
0x1014   :  { %2711 = vmatmul.mubr.msk.bf16.vlgmr.msra.gmra.mxu1 %vm130_vm0, %v1234_v49 }
0x1015   :  { %1371 = vmatpush1.bf16.msra.mxu1 %v3639_v4  ;;  %1394 = vmatprep.mubr.bf16.mxu1 %v3261_v1 }
0x1016   :  { %1372 = vmatprep.subr.bf16.mxu1 %v3644_v33 }
0x1019   :  { %1373 = vmatpush1.bf16.msra.mxu1 %v3646_v5 }
0x101a   :  { %1374 = vmatprep.subr.bf16.mxu1 %v3650_v6 }
0x101d   :  { %1375 = vmatpush1.bf16.msra.mxu1 %v3652_v8 }
0x101e   :  { %1376 = vmatprep.subr.bf16.mxu1 %v3657_v12 }
0x1021   :  { %1377 = vmatpush1.bf16.msra.mxu1 %v3659_v34 }
0x1022   :  { %1530 = vmatprep.subr.bf16.mxu1 %v3637_v32 }
0x10c4   :  { %v1002_v51 = vpop.f32.mrf.mxu1 }
0x10c5   :  { %v1009_v52 = vadd.f32 %v1002_v51, %v297_v50 }
0x10c6   :  { %v1004_v53 = vpop.f32.mrf.mxu1 }
0x10c7   :  { %v1010_v16 = vadd.f32 %v1004_v53, %v299_v41  ;;  %v2689_v25 = vmul.f32 -1.442695, %v1009_v52 }
0x10c8   :  { %v1006_v54 = vpop.f32.mrf.mxu1 }
0x10c9   :  { %v1055_v54 = vld [vmem:[#allocation7 + $0x30] sm:$0xff] }
0x10ca   :  { %v1007_v55 = vpop.f32.mrf.mxu1 }
0x10d4   :  { %v1312_v19 = vpop.f32.mrf.mxu1 }
0x10d5   :  { %v1319_v46 = vadd.f32 %v1312_v19, %v1168_v59  ;;  %v1173_v59 = vpop.f32.mrf.mxu0 }
0x10d6   :  { %v1314_v62 = vpop.f32.mrf.mxu1 }
0x10d7   :  { %v1320_v9 = vadd.f32 %v1314_v62, %v1170_v63  ;;  %v2712_v14 = vmul.f32 -1.442695, %v1319_v46  ;;  %v1174_v46 = vadd.f32 %v1173_v59, %v3696_v60 }
0x10d8   :  { %v1316_v7 = vpop.f32.mrf.mxu1 }
0x10d9   :  { %3083 = vtanh.f32 %v1320_v9  ;;  %v2713_v3 = vmul.f32 -1.442695, %v1320_v9 }
0x10da   :  { %v1317_v10 = vpop.f32.mrf.mxu1  ;;  %3085 = vpow2.f32 %v2712_v14 }
0x10e6   :  { %v3084_v13 = vpop.eup %3083 }
0x10e7   :  { %1340 = vrot.lane.b32.xlu0 %v3084_v13, %s3262_s2  ;;  %v3086_v40 = vpop.eup %3085 }
0x10e8   :  { %v1327_v15 = vadd.f32 1.0, %v3086_v40 }
0x10ea   :  { %3087 = vrcp.f32 %v1327_v15 }
0x10eb   :  { %3089 = vtanh.f32 %v1010_v16 }
0x10ec   :  { %3091 = vpow2.f32 %v2689_v25 }
0x10f7   :  { %v3088_v18 = vpop.eup %3087 }
0x10f8   :  { %v3090_v24 = vpop.eup %3089  ;;  %v1338_v29 = vmul.f32 %v3088_v18, %v1336_v28 }
0x10f9   :  { %v3092_v26 = vpop.eup %3091 }
0x10fa   :  { %v1017_v27 = vadd.f32 1.0, %v3092_v26 }
0x10fc   :  { %3093 = vrcp.f32 %v1017_v27 }
0x1109   :  { %v3094_v47 = vpop.eup %3093 }
0x110a   :  { %v1024_v2 = vmul.f32 %v3094_v47, %v3634_v0  ;;  %v2690_v0 = vmul.f32 -1.442695, %v1010_v16 }
0x1159   :  { %v1341_v21 = vpop.permute.xlu0 %1340 }
0x115a   :  { %v1343_v22 = vmul.f32 %v3088_v18, %v1341_v21 }
0x115c   :  { %1345 = vrot.lane.b32.xlu0 %v1343_v22, %s3262_s2 }
0x1160   :  { %1026 = vrot.lane.b32.xlu0 %v3090_v24, %s3262_s2 }
0x11ce   :  { %v1346_v30 = vpop.permute.xlu0 %1345 }
0x11cf   :  { %v3704_v23 = vadd.f32 %v1346_v30, %v1338_v29 }
0x11d1   :  { %3095 = vtanh.f32 %v3704_v23 }
0x11d2   :  { %v1027_v44 = vpop.permute.xlu0 %1026  ;;  %3097 = vpow2.f32 %v2713_v3 }
0x11d3   :  { %v1029_v31 = vmul.f32 %v3094_v47, %v1027_v44 }
0x11d5   :  { %1031 = vrot.lane.b32.xlu0 %v1029_v31, %s3262_s2 }
0x11de   :  { %v3096_v45 = vpop.eup %3095 }
0x11df   :  { %1351 = vrot.lane.b32.xlu1 %v3096_v45, %s3262_s2  ;;  %v3098_v11 = vpop.eup %3097 }
0x11e0   :  { %v1328_v42 = vadd.f32 1.0, %v3098_v11 }
0x11e2   :  { %3099 = vrcp.f32 %v1328_v42 }
0x11ef   :  { %v3100_v36 = vpop.eup %3099 }
0x1247   :  { %v1032_v43 = vpop.permute.xlu0 %1031 }
0x1248   :  { %v3710_v35 = vadd.f32 %v1032_v43, %v1024_v2 }
0x124a   :  { %3101 = vtanh.f32 %v3710_v35 }
0x124b   :  { %3103 = vpow2.f32 %v2690_v0 }
0x1251   :  { %v1352_v37 = vpop.permute.xlu1 %1351 }
0x1252   :  { %v1354_v38 = vmul.f32 %v3100_v36, %v1352_v37 }
0x1254   :  { %1355 = vst.msk [vmem:[#allocation7] sm:$0xff] %vm130_vm0, %v1354_v38  ;;  %v1358_v39 = vpack.c.bf16 %v1354_v38, %v1354_v38 }
0x1256   :  { %2714 = vmatmul.mubr.msk.bf16.vlgmr.msra.gmra.mxu1 %vm130_vm0, %v1358_v39 }
0x1257   :  { %v3102_v48 = vpop.eup %3101  ;;  %1531 = vmatpush1.bf16.msra.mxu1 %v3639_v4  ;;  %1554 = vmatprep.mubr.bf16.mxu1 %v3261_v1 }
0x1258   :  { %1037 = vrot.lane.b32.xlu0 %v3102_v48, %s3262_s2  ;;  %1532 = vmatprep.subr.bf16.mxu1 %v3644_v33  ;;  %v3104_v49 = vpop.eup %3103 }
0x1259   :  { %v1018_v50 = vadd.f32 1.0, %v3104_v49 }
0x125b   :  { %1533 = vmatpush1.bf16.msra.mxu1 %v3646_v5  ;;  %3105 = vrcp.f32 %v1018_v50 }
0x125c   :  { %1534 = vmatprep.subr.bf16.mxu1 %v3650_v6 }
0x125f   :  { %1535 = vmatpush1.bf16.msra.mxu1 %v3652_v8 }
0x1260   :  { %1536 = vmatprep.subr.bf16.mxu1 %v3657_v12 }
0x1263   :  { %1537 = vmatpush1.bf16.msra.mxu1 %v3659_v34 }
0x1264   :  { %1690 = vmatprep.subr.bf16.mxu1 %v3637_v32 }
0x1268   :  { %v3106_v51 = vpop.eup %3105 }
0x12ca   :  { %v1038_v52 = vpop.permute.xlu0 %1037 }
0x12cb   :  { %v1040_v53 = vmul.f32 %v3106_v51, %v1038_v52 }
0x12cd   :  { %1042 = vst.msk [vmem:[#allocation7 + $0x38] sm:$0xff] %vm130_vm0, %v1040_v53  ;;  %1043 = vst.msk [vmem:[#allocation2] sm:$0xff] %vm130_vm0, %v1040_v53 }
0x12d4   :  { %v1056_v55 = vld [vmem:[#allocation7 + $0x38] sm:$0xff] }
0x12d5   :  { %v1060_v56 = vpack.c.bf16 %v1056_v55, %v1055_v54 }
0x12d7   :  { %2702 = vmatmul.mubr.msk.bf16.gmra.mxu0 %vm130_vm0, %v1060_v56 }
0x12d8   :  { %1474 = vmatprep.mubr.bf16.mxu0 %v3261_v1 }
0x1316   :  { %v1396_v19 = vpop.f32.mrf.mxu1 }
0x1317   :  { %v1403_v62 = vadd.f32 %v1396_v19, %v1172_v61 }
0x1318   :  { %v1398_v63 = vpop.f32.mrf.mxu1 }
0x1319   :  { %v1404_v7 = vadd.f32 %v1398_v63, %v1174_v46  ;;  %v2715_v14 = vmul.f32 -1.442695, %v1403_v62 }
0x131a   :  { %v1400_v9 = vpop.f32.mrf.mxu1 }
0x131b   :  { %3107 = vtanh.f32 %v1404_v7  ;;  %v2716_v26 = vmul.f32 -1.442695, %v1404_v7 }
0x131c   :  { %v1401_v10 = vpop.f32.mrf.mxu1  ;;  %3109 = vpow2.f32 %v2715_v14 }
0x1328   :  { %v3108_v13 = vpop.eup %3107 }
0x1329   :  { %1420 = vrot.lane.b32.xlu1 %v3108_v13, %s3262_s2  ;;  %v3110_v40 = vpop.eup %3109 }
0x132a   :  { %v1411_v15 = vadd.f32 1.0, %v3110_v40 }
0x132c   :  { %3111 = vrcp.f32 %v1411_v15 }
0x1339   :  { %v3112_v41 = vpop.eup %3111 }
0x133a   :  { %v1418_v21 = vmul.f32 %v3112_v41, %v3704_v23  ;;  %v1177_v23 = vpop.f32.mrf.mxu0 }
0x133b   :  { %v1178_v48 = vadd.f32 %v1177_v23, %v3692_v57 }
0x133c   :  { %v1179_v31 = vpop.f32.mrf.mxu0 }
0x133d   :  { %v1180_v49 = vadd.f32 %v1179_v31, %v3696_v60 }
0x133e   :  { %v1181_v45 = vpop.f32.mrf.mxu0 }
0x1340   :  { %v1183_v3 = vpop.f32.mrf.mxu0 }
0x1342   :  { %v3746_v11 = vpop.f32.mrf.mxu0 }
0x1344   :  { %v3748_v42 = vpop.f32.mrf.mxu0 }
0x1346   :  { %v3750_v2 = vpop.f32.mrf.mxu0 }
0x1348   :  { %v3752_v43 = vpop.f32.mrf.mxu0 }
0x1397   :  { %v3754_v36 = vpop.f32.mrf.mxu0 }
0x1399   :  { %v3756_v37 = vpop.f32.mrf.mxu0 }
0x139b   :  { %v1421_v16 = vpop.permute.xlu1 %1420  ;;  %v3758_v38 = vpop.f32.mrf.mxu0 }
0x139c   :  { %v1423_v18 = vmul.f32 %v3112_v41, %v1421_v16 }
0x139d   :  { %v3760_v39 = vpop.f32.mrf.mxu0 }
0x139e   :  { %1425 = vrot.lane.b32.xlu1 %v1423_v18, %s3262_s2  ;;  %v1182_v18 = vadd.f32 %v1181_v45, %v3692_v57 }
0x1410   :  { %v1426_v22 = vpop.permute.xlu1 %1425 }
0x1411   :  { %v1428_v24 = vadd.f32 %v1426_v22, %v1418_v21  ;;  %v1184_v22 = vadd.f32 %v1183_v3, %v3696_v60 }
0x1413   :  { %3113 = vtanh.f32 %v1428_v24 }
0x1414   :  { %3115 = vpow2.f32 %v2716_v26 }
0x1420   :  { %v3114_v25 = vpop.eup %3113 }
0x1421   :  { %1431 = vrot.lane.b32.xlu1 %v3114_v25, %s3262_s2  ;;  %v3116_v27 = vpop.eup %3115 }
0x1422   :  { %v1412_v28 = vadd.f32 1.0, %v3116_v27 }
0x1424   :  { %3117 = vrcp.f32 %v1412_v28 }
0x1431   :  { %v3118_v29 = vpop.eup %3117 }
0x1493   :  { %v1432_v30 = vpop.permute.xlu1 %1431 }
0x1494   :  { %v1434_v47 = vmul.f32 %v3118_v29, %v1432_v30 }
0x1496   :  { %1435 = vst.msk [vmem:[#allocation7 + $0x8] sm:$0xff] %vm130_vm0, %v1434_v47  ;;  %v1438_v44 = vpack.c.bf16 %v1434_v47, %v1434_v47 }
0x1498   :  { %2717 = vmatmul.mubr.msk.bf16.vlgmr.msra.gmra.mxu0 %vm130_vm0, %v1438_v44 }
0x1499   :  { %1611 = vmatpush1.bf16.msra.mxu0 %v3639_v4  ;;  %1634 = vmatprep.mubr.bf16.mxu0 %v3261_v1 }
0x149a   :  { %1612 = vmatprep.subr.bf16.mxu0 %v3644_v33 }
0x149d   :  { %1613 = vmatpush1.bf16.msra.mxu0 %v3646_v5 }
0x149e   :  { %1614 = vmatprep.subr.bf16.mxu0 %v3650_v6 }
0x14a1   :  { %1615 = vmatpush1.bf16.msra.mxu0 %v3652_v8 }
0x14a2   :  { %1616 = vmatprep.subr.bf16.mxu0 %v3657_v12 }
0x14a5   :  { %1617 = vmatpush1.bf16.msra.mxu0 %v3659_v34 }
0x14a6   :  { %1770 = vmatprep.subr.bf16.mxu0 %v3637_v32 }
0x1558   :  { %v1476_v0 = vpop.f32.mrf.mxu0 }
0x1559   :  { %v1483_v50 = vadd.f32 %v1476_v0, %v1178_v48 }
0x155a   :  { %v1478_v51 = vpop.f32.mrf.mxu0 }
0x155b   :  { %v1484_v52 = vadd.f32 %v1478_v51, %v1180_v49  ;;  %v2718_v56 = vmul.f32 -1.442695, %v1483_v50 }
0x155c   :  { %v1480_v53 = vpop.f32.mrf.mxu0 }
0x155d   :  { %3119 = vtanh.f32 %v1484_v52  ;;  %v2719_v10 = vmul.f32 -1.442695, %v1484_v52 }
0x155e   :  { %v1481_v54 = vpop.f32.mrf.mxu0  ;;  %3121 = vpow2.f32 %v2718_v56  ;;  %v1188_v56 = vadd.f32 %v3746_v11, %v3692_v57 }
0x156a   :  { %v3120_v55 = vpop.eup %3119 }
0x156b   :  { %1500 = vrot.lane.b32.xlu0 %v3120_v55, %s3262_s2  ;;  %v3122_v58 = vpop.eup %3121 }
0x156c   :  { %v1491_v59 = vadd.f32 1.0, %v3122_v58 }
0x156e   :  { %3123 = vrcp.f32 %v1491_v59  ;;  %v1190_v59 = vadd.f32 %v3748_v42, %v3696_v60 }
0x157b   :  { %v3124_v61 = vpop.eup %3123 }
0x157c   :  { %v1498_v62 = vmul.f32 %v3124_v61, %v1428_v24 }
0x15dd   :  { %v1501_v19 = vpop.permute.xlu0 %1500 }
0x15de   :  { %v1503_v46 = vmul.f32 %v3124_v61, %v1501_v19 }
0x15e0   :  { %1505 = vrot.lane.b32.xlu1 %v1503_v46, %s3262_s2 }
0x1652   :  { %v1506_v63 = vpop.permute.xlu1 %1505 }
0x1653   :  { %v1508_v7 = vadd.f32 %v1506_v63, %v1498_v62 }
0x1655   :  { %3125 = vtanh.f32 %v1508_v7 }
0x1656   :  { %3127 = vpow2.f32 %v2719_v10 }
0x1662   :  { %v3126_v9 = vpop.eup %3125 }
0x1663   :  { %1511 = vrot.lane.b32.xlu0 %v3126_v9, %s3262_s2  ;;  %v3128_v13 = vpop.eup %3127 }
0x1664   :  { %v1492_v14 = vadd.f32 1.0, %v3128_v13 }
0x1666   :  { %3129 = vrcp.f32 %v1492_v14 }
0x1673   :  { %v3130_v40 = vpop.eup %3129 }
0x16d5   :  { %v1512_v15 = vpop.permute.xlu0 %1511 }
0x16d6   :  { %v1514_v41 = vmul.f32 %v3130_v40, %v1512_v15 }
0x16d8   :  { %1515 = vst.msk [vmem:[#allocation7 + $0x10] sm:$0xff] %vm130_vm0, %v1514_v41  ;;  %v1518_v16 = vpack.c.bf16 %v1514_v41, %v1514_v41 }
0x16da   :  { %2720 = vmatmul.mubr.msk.bf16.vlgmr.msra.gmra.mxu1 %vm130_vm0, %v1518_v16 }
0x16db   :  { %1691 = vmatpush1.bf16.msra.mxu1 %v3639_v4  ;;  %1714 = vmatprep.mubr.bf16.mxu1 %v3261_v1 }
0x16dc   :  { %1692 = vmatprep.subr.bf16.mxu1 %v3644_v33 }
0x16df   :  { %1693 = vmatpush1.bf16.msra.mxu1 %v3646_v5 }
0x16e0   :  { %1694 = vmatprep.subr.bf16.mxu1 %v3650_v6 }
0x16e3   :  { %1695 = vmatpush1.bf16.msra.mxu1 %v3652_v8 }
0x16e4   :  { %1696 = vmatprep.subr.bf16.mxu1 %v3657_v12 }
0x16e7   :  { %1697 = vmatpush1.bf16.msra.mxu1 %v3659_v34 }
0x16e8   :  { %1850 = vmatprep.subr.bf16.mxu1 %v3637_v32 }
0x179a   :  { %v1556_v21 = vpop.f32.mrf.mxu1 }
0x179b   :  { %v1563_v24 = vadd.f32 %v1556_v21, %v1182_v18 }
0x179c   :  { %v1558_v25 = vpop.f32.mrf.mxu1 }
0x179d   :  { %v1564_v26 = vadd.f32 %v1558_v25, %v1184_v22  ;;  %v2721_v30 = vmul.f32 -1.442695, %v1563_v24 }
0x179e   :  { %v1560_v27 = vpop.f32.mrf.mxu1 }
0x179f   :  { %3131 = vtanh.f32 %v1564_v26  ;;  %v2722_v49 = vmul.f32 -1.442695, %v1564_v26 }
0x17a0   :  { %v1561_v28 = vpop.f32.mrf.mxu1  ;;  %3133 = vpow2.f32 %v2721_v30 }
0x17a1   :  { %v1192_v28 = vadd.f32 %v3750_v2, %v3692_v57 }
0x17ac   :  { %v3132_v29 = vpop.eup %3131 }
0x17ad   :  { %1580 = vrot.lane.b32.xlu1 %v3132_v29, %s3262_s2  ;;  %v3134_v47 = vpop.eup %3133 }
0x17ae   :  { %v1571_v44 = vadd.f32 1.0, %v3134_v47 }
0x17b0   :  { %3135 = vrcp.f32 %v1571_v44 }
0x17bd   :  { %v3136_v32 = vpop.eup %3135 }
0x17be   :  { %v1578_v45 = vmul.f32 %v3136_v32, %v1508_v7 }
0x181f   :  { %v1581_v23 = vpop.permute.xlu1 %1580 }
0x1820   :  { %v1583_v31 = vmul.f32 %v3136_v32, %v1581_v23 }
0x1822   :  { %1585 = vrot.lane.b32.xlu0 %v1583_v31, %s3262_s2 }
0x1894   :  { %v1586_v3 = vpop.permute.xlu0 %1585 }
0x1895   :  { %v1588_v48 = vadd.f32 %v1586_v3, %v1578_v45  ;;  %v1941_v3 = vld [vmem:[%s4125_s7 + $0x38] sm:$0xff] }
0x1897   :  { %3137 = vtanh.f32 %v1588_v48 }
0x1898   :  { %3139 = vpow2.f32 %v2722_v49 }
0x18a4   :  { %v3138_v0 = vpop.eup %3137 }
0x18a5   :  { %1591 = vrot.lane.b32.xlu1 %v3138_v0, %s3262_s2  ;;  %v3140_v50 = vpop.eup %3139 }
0x18a6   :  { %v1572_v51 = vadd.f32 1.0, %v3140_v50 }
0x18a8   :  { %3141 = vrcp.f32 %v1572_v51 }
0x18b5   :  { %v3142_v52 = vpop.eup %3141 }
0x1917   :  { %v1592_v53 = vpop.permute.xlu1 %1591 }
0x1918   :  { %v1594_v54 = vmul.f32 %v3142_v52, %v1592_v53 }
0x191a   :  { %1595 = vst.msk [vmem:[#allocation7 + $0x18] sm:$0xff] %vm130_vm0, %v1594_v54  ;;  %v1598_v55 = vpack.c.bf16 %v1594_v54, %v1594_v54 }
0x191c   :  { %2723 = vmatmul.mubr.msk.bf16.vlgmr.msra.gmra.mxu0 %vm130_vm0, %v1598_v55  ;;  %v1940_v55 = vld [vmem:[%s4125_s7 + $0x30] sm:$0xff] }
0x191d   :  { %1771 = vmatpush1.bf16.msra.mxu0 %v3639_v4  ;;  %1794 = vmatprep.mubr.bf16.mxu0 %v3261_v1 }
0x191e   :  { %1772 = vmatprep.subr.bf16.mxu0 %v3644_v33 }
0x1921   :  { %1773 = vmatpush1.bf16.msra.mxu0 %v3646_v5 }
0x1922   :  { %1774 = vmatprep.subr.bf16.mxu0 %v3650_v6 }
0x1925   :  { %1775 = vmatpush1.bf16.msra.mxu0 %v3652_v8 }
0x1926   :  { %1776 = vmatprep.subr.bf16.mxu0 %v3657_v12 }
0x1929   :  { %1777 = vmatpush1.bf16.msra.mxu0 %v3659_v34 }
0x192a   :  { %2854 = vmatprep.subr.mxu0 %v1941_v3 }
0x19dc   :  { %v1636_v58 = vpop.f32.mrf.mxu0 }
0x19dd   :  { %v1643_v61 = vadd.f32 %v1636_v58, %v1188_v56  ;;  %v3828_v56 = vld [vmem:[#allocation7] sm:$0xff]  ;;  %v1939_v58 = vld [vmem:[%s4125_s7 + $0x28] sm:$0xff] }
0x19de   :  { %v1638_v19 = vpop.f32.mrf.mxu0 }
0x19df   :  { %v1644_v46 = vadd.f32 %v1638_v19, %v1190_v59  ;;  %v2724_v9 = vmul.f32 -1.442695, %v1643_v61  ;;  %v1938_v59 = vld [vmem:[%s4125_s7 + $0x20] sm:$0xff]  ;;  %v1937_v61 = vld [vmem:[%s4125_s7 + $0x18] sm:$0xff] }
0x19e0   :  { %v1640_v62 = vpop.f32.mrf.mxu0 }
0x19e1   :  { %3143 = vtanh.f32 %v1644_v46  ;;  %v2725_v18 = vmul.f32 -1.442695, %v1644_v46 }
0x19e2   :  { %v1641_v63 = vpop.f32.mrf.mxu0  ;;  %3145 = vpow2.f32 %v2724_v9  ;;  %v1934_v9 = vld [vmem:[%s4125_s7] sm:$0xff] }
0x19e3   :  { %v1936_v63 = vld [vmem:[%s4125_s7 + $0x10] sm:$0xff] }
0x19ee   :  { %v3144_v7 = vpop.eup %3143 }
0x19ef   :  { %1660 = vrot.lane.b32.xlu0 %v3144_v7, %s3262_s2  ;;  %v3146_v10 = vpop.eup %3145  ;;  %v1935_v7 = vld [vmem:[%s4125_s7 + $0x8] sm:$0xff] }
0x19f0   :  { %v1651_v13 = vadd.f32 1.0, %v3146_v10  ;;  %v3856_v10 = vld [vmem:[#allocation7 + $0x8] sm:$0xff] }
0x19f2   :  { %3147 = vrcp.f32 %v1651_v13  ;;  %v3860_v13 = vld [vmem:[#allocation7 + $0x10] sm:$0xff] }
0x19ff   :  { %v3148_v14 = vpop.eup %3147 }
0x1a00   :  { %v1658_v42 = vmul.f32 %v3148_v14, %v1588_v48 }
0x1a61   :  { %v1661_v11 = vpop.permute.xlu0 %1660 }
0x1a62   :  { %v1663_v40 = vmul.f32 %v3148_v14, %v1661_v11  ;;  %v3864_v14 = vld [vmem:[#allocation7 + $0x18] sm:$0xff]  ;;  %v1198_v11 = vadd.f32 %v3754_v36, %v3692_v57 }
0x1a64   :  { %1665 = vrot.lane.b32.xlu1 %v1663_v40, %s3262_s2 }
0x1ad6   :  { %v1666_v15 = vpop.permute.xlu1 %1665 }
0x1ad7   :  { %v1668_v41 = vadd.f32 %v1666_v15, %v1658_v42  ;;  %v1200_v42 = vadd.f32 %v3756_v37, %v3696_v60 }
0x1ad9   :  { %3149 = vtanh.f32 %v1668_v41 }
0x1ada   :  { %3151 = vpow2.f32 %v2725_v18 }
0x1ae6   :  { %v3150_v16 = vpop.eup %3149 }
0x1ae7   :  { %1671 = vrot.lane.b32.xlu0 %v3150_v16, %s3262_s2  ;;  %v3152_v21 = vpop.eup %3151 }
0x1ae8   :  { %v1652_v22 = vadd.f32 1.0, %v3152_v21 }
0x1aea   :  { %3153 = vrcp.f32 %v1652_v22 }
0x1af7   :  { %v3154_v24 = vpop.eup %3153 }
0x1b59   :  { %v1672_v25 = vpop.permute.xlu0 %1671 }
0x1b5a   :  { %v1674_v26 = vmul.f32 %v3154_v24, %v1672_v25 }
0x1b5c   :  { %1675 = vst.msk [vmem:[#allocation7 + $0x20] sm:$0xff] %vm130_vm0, %v1674_v26  ;;  %v1678_v27 = vpack.c.bf16 %v1674_v26, %v1674_v26 }
0x1b5e   :  { %2726 = vmatmul.mubr.msk.bf16.vlgmr.msra.gmra.mxu1 %vm130_vm0, %v1678_v27 }
0x1b5f   :  { %1851 = vmatpush1.bf16.msra.mxu1 %v3639_v4  ;;  %1874 = vmatprep.mubr.bf16.mxu1 %v3261_v1  ;;  %v1194_v4 = vadd.f32 %v3752_v43, %v3696_v60 }
0x1b60   :  { %1852 = vmatprep.subr.bf16.mxu1 %v3644_v33 }
0x1b63   :  { %1853 = vmatpush1.bf16.msra.mxu1 %v3646_v5  ;;  %v3841_v19 = vld [vmem:[#allocation7 + $0x20] sm:$0xff] }
0x1b64   :  { %1854 = vmatprep.subr.bf16.mxu1 %v3650_v6 }
0x1b67   :  { %1855 = vmatpush1.bf16.msra.mxu1 %v3652_v8 }
0x1b68   :  { %1856 = vmatprep.subr.bf16.mxu1 %v3657_v12 }
0x1b6b   :  { %1857 = vmatpush1.bf16.msra.mxu1 %v3659_v34 }
0x1c1e   :  { %v1716_v29 = vpop.f32.mrf.mxu1 }
0x1c1f   :  { %v1723_v30 = vadd.f32 %v1716_v29, %v1192_v28 }
0x1c20   :  { %v1718_v47 = vpop.f32.mrf.mxu1 }
0x1c21   :  { %v1724_v33 = vadd.f32 %v1718_v47, %v1194_v4  ;;  %v2727_v8 = vmul.f32 -1.442695, %v1723_v30  ;;  %v2973_v30 = vld [vmem:[#allocation12 + $0x34] ss:$8 sps:$4 sm:$0xff]  }
0x1c22   :  { %v1720_v44 = vpop.f32.mrf.mxu1  ;;  %2158 = vmatprep.subr.bf16.mxu1 %v2973_v30  ;;  %v2463_v30 = vld [vmem:[%s4131_s13 + $0x40] sm:$0xff] }
0x1c23   :  { %3155 = vtanh.f32 %v1724_v33  ;;  %v2728_v0 = vmul.f32 -1.442695, %v1724_v33 }
0x1c24   :  { %v1721_v5 = vpop.f32.mrf.mxu1  ;;  %3157 = vpow2.f32 %v2727_v8 }
0x1c30   :  { %v3156_v6 = vpop.eup %3155 }
0x1c31   :  { %1740 = vrot.lane.b32.xlu1 %v3156_v6, %s3262_s2  ;;  %v3158_v12 = vpop.eup %3157 }
0x1c32   :  { %v1731_v34 = vadd.f32 1.0, %v3158_v12 }
0x1c34   :  { %3159 = vrcp.f32 %v1731_v34  ;;  %v2971_v34 = vld [vmem:[#allocation12 + $0x30] ss:$8 sps:$4 sm:$0xff]  }
0x1c41   :  { %v3160_v32 = vpop.eup %3159 }
0x1c42   :  { %v1738_v43 = vmul.f32 %v3160_v32, %v1668_v41 }
0x1ca3   :  { %v1741_v2 = vpop.permute.xlu1 %1740 }
0x1ca4   :  { %v1743_v23 = vmul.f32 %v3160_v32, %v1741_v2  ;;  %v2976_v2 = vld [vmem:[#allocation12 + $0x24] ss:$8 sps:$4 sm:$0xff]  }
0x1ca6   :  { %1745 = vrot.lane.b32.xlu0 %v1743_v23, %s3262_s2  ;;  %v2974_v23 = vld [vmem:[#allocation12 + $0x20] ss:$8 sps:$4 sm:$0xff]  }
0x1d18   :  { %v1746_v31 = vpop.permute.xlu0 %1745 }
0x1d19   :  { %v3816_v45 = vadd.f32 %v1746_v31, %v1738_v43  ;;  %v2979_v43 = vld [vmem:[#allocation12 + $0x14] ss:$8 sps:$4 sm:$0xff]  }
0x1d1b   :  { %3161 = vtanh.f32 %v3816_v45 }
0x1d1c   :  { %3163 = vpow2.f32 %v2728_v0  ;;  %v1930_v0 = vpack.c.bf16 %v3856_v10, %v3828_v56 }
0x1d28   :  { %v3162_v48 = vpop.eup %3161 }
0x1d29   :  { %1751 = vrot.lane.b32.xlu1 %v3162_v48, %s3262_s2  ;;  %v3164_v49 = vpop.eup %3163  ;;  %v2980_v48 = vld [vmem:[#allocation12] ss:$8 sps:$4 sm:$0xff]  }
0x1d2a   :  { %v1732_v50 = vadd.f32 1.0, %v3164_v49  ;;  %v1931_v49 = vpack.c.bf16 %v3864_v14, %v3860_v13 }
0x1d2c   :  { %3165 = vrcp.f32 %v1732_v50  ;;  %v1202_v50 = vadd.f32 %v3758_v38, %v3692_v57 }
0x1d39   :  { %v3166_v51 = vpop.eup %3165 }
0x1d9b   :  { %v1752_v52 = vpop.permute.xlu1 %1751 }
0x1d9c   :  { %v1754_v53 = vmul.f32 %v3166_v51, %v1752_v52  ;;  %v1204_v52 = vadd.f32 %v3760_v39, %v3696_v60  ;;  %v2983_v60 = vld [vmem:[%s4129_s11 + $0x78] sm:$0xff]  }
0x1d9d   :  { %v2984_v39 = vld [vmem:[%s4129_s11 + $0x38] sm:$0xff]  }
0x1d9e   :  { %1755 = vst.msk [vmem:[#allocation7 + $0x28] sm:$0xff] %vm130_vm0, %v1754_v53  ;;  %v1758_v54 = vpack.c.bf16 %v1754_v53, %v1754_v53 }
0x1da0   :  { %2729 = vmatmul.mubr.msk.bf16.vlgmr.msra.gmra.mxu0 %vm130_vm0, %v1758_v54 }
0x1da1   :  { %2855 = vmatpush3.msra.mxu0 %v1941_v3  ;;  %2870 = vmatprep.mubr.msk.f32.mxu0 %vm130_vm0, %v3828_v56  ;;  %v2982_v3 = vld [vmem:[#allocation12 + $0x4] ss:$8 sps:$4 sm:$0xff]  }
0x1da2   :  { %2856 = vmatprep.subr.mxu0 %v1940_v55 }
0x1da3   :  { %2857 = vmatpush3.msra.mxu0 %v1940_v55 }
0x1da4   :  { %2858 = vmatprep.subr.mxu0 %v1939_v58 }
0x1da5   :  { %2859 = vmatpush3.msra.mxu0 %v1939_v58  ;;  %v3843_v46 = vld [vmem:[#allocation7 + $0x28] sm:$0xff] }
0x1da6   :  { %2860 = vmatprep.subr.mxu0 %v1938_v59  ;;  %v1932_v62 = vpack.c.bf16 %v3843_v46, %v3841_v19 }
0x1da7   :  { %2861 = vmatpush3.msra.mxu0 %v1938_v59 }
0x1da8   :  { %2862 = vmatprep.subr.mxu0 %v1937_v61 }
0x1da9   :  { %2863 = vmatpush3.msra.mxu0 %v1937_v61 }
0x1daa   :  { %2864 = vmatprep.subr.mxu0 %v1936_v63 }
0x1dab   :  { %2865 = vmatpush3.msra.mxu0 %v1936_v63  ;;  %v2986_v63 = vld [vmem:[%s4129_s11 + $0x30] sm:$0xff]  }
0x1dac   :  { %2866 = vmatprep.subr.mxu0 %v1935_v7 }
0x1dad   :  { %2867 = vmatpush3.msra.mxu0 %v1935_v7  ;;  %v2988_v7 = vld [vmem:[%s4129_s11 + $0x28] sm:$0xff]  }
0x1dae   :  { %2868 = vmatprep.subr.mxu0 %v1934_v9 }
0x1daf   :  { %2869 = vmatpush3.msra.mxu0 %v1934_v9  ;;  %v2989_v9 = vld [vmem:[%s4129_s11 + $0x60] sm:$0xff]  }
0x1db0   :  { %2871 = vmatmul.mubr.msk.f32.vlgmr.msra.gmra.mxu0 %vm130_vm0, %v3856_v10  ;;  %2790 = vmatprep.subr.bf16.mxu0 %v2983_v60  ;;  %v2990_v10 = vld [vmem:[%s4129_s11 + $0x20] sm:$0xff]  }
0x1db1   :  { %2873 = vmatprep.mubr.msk.f32.mxu0 %vm130_vm0, %v3860_v13  ;;  %2791 = vmatpush3.bf16.msra.mxu0 %v2984_v39  ;;  %v2991_v13 = vld [vmem:[%s4129_s11 + $0x58] sm:$0xff]  }
0x1db4   :  { %2874 = vmatmul.mubr.msk.f32.gmra.mxu0 %vm130_vm0, %v3864_v14  ;;  %v2992_v14 = vld [vmem:[%s4129_s11 + $0x18] sm:$0xff]  }
0x1db5   :  { %2876 = vmatprep.mubr.msk.f32.mxu0 %vm130_vm0, %v3841_v19 }
0x1db8   :  { %2877 = vmatmul.mubr.msk.f32.gmra.mxu0 %vm130_vm0, %v3843_v46 }
0x1e60   :  { %v1796_v40 = vpop.f32.mrf.mxu0 }
0x1e61   :  { %v1803_v15 = vadd.f32 %v1796_v40, %v1198_v11 }
0x1e62   :  { %v1798_v41 = vpop.f32.mrf.mxu0 }
0x1e63   :  { %v1804_v16 = vadd.f32 %v1798_v41, %v1200_v42  ;;  %v2730_v24 = vmul.f32 -1.442695, %v1803_v15  ;;  %v2993_v41 = vld [vmem:[%s4129_s11 + $0x50] sm:$0xff]  }
0x1e64   :  { %v1800_v18 = vpop.f32.mrf.mxu0 }
0x1e65   :  { %3167 = vtanh.f32 %v1804_v16  ;;  %v2731_v33 = vmul.f32 -1.442695, %v1804_v16  ;;  %v2994_v16 = vld [vmem:[%s4129_s11 + $0x10] sm:$0xff]   ;;  %v2995_v18 = vld [vmem:[%s4129_s11 + $0x48] sm:$0xff]  }
0x1e66   :  { %v1801_v21 = vpop.f32.mrf.mxu0  ;;  %3169 = vpow2.f32 %v2730_v24  ;;  %v2998_v24 = vld [vmem:[%s4129_s11] sm:$0xff]  }
0x1e67   :  { %v2996_v21 = vld [vmem:[%s4129_s11 + $0x8] sm:$0xff]  }
0x1e72   :  { %v3168_v22 = vpop.eup %3167 }
0x1e73   :  { %1820 = vrot.lane.b32.xlu0 %v3168_v22, %s3262_s2  ;;  %v3170_v25 = vpop.eup %3169  ;;  %v2997_v22 = vld [vmem:[%s4129_s11 + $0x40] sm:$0xff]  }
0x1e74   :  { %v1811_v26 = vadd.f32 1.0, %v3170_v25 }
0x1e76   :  { %3171 = vrcp.f32 %v1811_v26  ;;  %v2470_v26 = vld [vmem:[%s4131_s13 + $0x78] sm:$0xff] }
0x1e83   :  { %v3172_v27 = vpop.eup %3171 }
0x1e84   :  { %v1818_v37 = vmul.f32 %v3172_v27, %v3816_v45  ;;  %v2977_v45 = vld [vmem:[#allocation12 + $0x10] ss:$8 sps:$4 sm:$0xff]  }
0x1ee5   :  { %v1821_v36 = vpop.permute.xlu0 %1820 }
0x1ee6   :  { %v1823_v28 = vmul.f32 %v3172_v27, %v1821_v36  ;;  %v2469_v27 = vld [vmem:[%s4131_s13 + $0x70] sm:$0xff]  ;;  %v2468_v36 = vld [vmem:[%s4131_s13 + $0x68] sm:$0xff] }
0x1ee8   :  { %1825 = vrot.lane.b32.xlu1 %v1823_v28, %s3262_s2  ;;  %v2467_v28 = vld [vmem:[%s4131_s13 + $0x60] sm:$0xff] }
0x1f5a   :  { %v1826_v29 = vpop.permute.xlu1 %1825 }
0x1f5b   :  { %v3879_v4 = vadd.f32 %v1826_v29, %v1818_v37  ;;  %v2466_v37 = vld [vmem:[%s4131_s13 + $0x58] sm:$0xff]  ;;  %v2465_v29 = vld [vmem:[%s4131_s13 + $0x50] sm:$0xff] }
0x1f5d   :  { %3173 = vtanh.f32 %v3879_v4 }
0x1f5e   :  { %3175 = vpow2.f32 %v2731_v33 }
0x1f6a   :  { %v3174_v47 = vpop.eup %3173 }
0x1f6b   :  { %1831 = vrot.lane.b32.xlu0 %v3174_v47, %s3262_s2  ;;  %v3176_v44 = vpop.eup %3175 }
0x1f6c   :  { %v1812_v5 = vadd.f32 1.0, %v3176_v44 }
0x1f6e   :  { %3177 = vrcp.f32 %v1812_v5 }
0x1f7b   :  { %v3178_v6 = vpop.eup %3177 }
0x1fdd   :  { %v1832_v8 = vpop.permute.xlu0 %1831 }
0x1fde   :  { %v1834_v12 = vmul.f32 %v3178_v6, %v1832_v8 }
0x1fe0   :  { %1835 = vst.msk [vmem:[#allocation7 + $0x30] sm:$0xff] %vm130_vm0, %v1834_v12  ;;  %v1838_v32 = vpack.c.bf16 %v1834_v12, %v1834_v12 }
0x1fe2   :  { %2732 = vmatmul.mubr.msk.bf16.vlgmr.msra.gmra.mxu1 %vm130_vm0, %v1838_v32 }
0x1fe3   :  { %2159 = vmatpush1.bf16.msra.mxu1 %v2971_v34  ;;  %2182 = vmatprep.mubr.bf16.mxu1 %v3261_v1 }
0x1fe4   :  { %2160 = vmatprep.subr.bf16.mxu1 %v2976_v2 }
0x1fe7   :  { %2161 = vmatpush1.bf16.msra.mxu1 %v2974_v23  ;;  %v3886_v31 = vld [vmem:[#allocation7 + $0x30] sm:$0xff] }
0x1fe8   :  { %2879 = vmatprep.mubr.msk.f32.mxu0 %vm130_vm0, %v3886_v31  ;;  %2162 = vmatprep.subr.bf16.mxu1 %v2979_v43  ;;  %v2086_v43 = vld [vmem:[%s4128_s10] sm:$0x3] }
0x1feb   :  { %2163 = vmatpush1.bf16.msra.mxu1 %v2977_v45 }
0x1fec   :  { %2164 = vmatprep.subr.bf16.mxu1 %v2982_v3 }
0x1fef   :  { %2165 = vmatpush1.bf16.msra.mxu1 %v2980_v48  ;;  %v3995_v48 = vrot.slane %v2086_v43, %v3443_v20 }
0x1ff0   :  { %2882 = vmatprep.subr.mxu1 %v2470_v26 }
0x1ff2   :  { %2752 = vmatmul.mubr.msk.bf16.vlgmr.msra.gmra.mxu1 %vm130_vm0, %v1930_v0 }
0x1ff3   :  { %2192 = vmatprep.mubr.bf16.mxu1 %v3261_v1  ;;  %2883 = vmatpush3.msra.mxu1 %v2470_v26  ;;  %v2460_v26 = vld [vmem:[%s4131_s13 + $0x28] sm:$0xff] }
0x1ff4   :  { %2884 = vmatprep.subr.mxu1 %v2469_v27 }
0x1ff5   :  { %2885 = vmatpush3.msra.mxu1 %v2469_v27  ;;  %v2459_v27 = vld [vmem:[%s4131_s13 + $0x20] sm:$0xff] }
0x1ff6   :  { %2886 = vmatprep.subr.mxu1 %v2468_v36 }
0x1ff7   :  { %2887 = vmatpush3.msra.mxu1 %v2468_v36  ;;  %v2458_v36 = vld [vmem:[%s4131_s13 + $0x18] sm:$0xff] }
0x1ff8   :  { %2888 = vmatprep.subr.mxu1 %v2467_v28 }
0x1ff9   :  { %2889 = vmatpush3.msra.mxu1 %v2467_v28  ;;  %v2457_v28 = vld [vmem:[%s4131_s13 + $0x10] sm:$0xff] }
0x1ffa   :  { %2753 = vmatmul.mubr.msk.bf16.gmra.mxu1 %vm130_vm0, %v1931_v49  ;;  %2890 = vmatprep.subr.mxu1 %v2466_v37 }
0x1ffb   :  { %2202 = vmatprep.mubr.bf16.mxu1 %v3261_v1  ;;  %2891 = vmatpush3.msra.mxu1 %v2466_v37  ;;  %v2456_v37 = vld [vmem:[%s4131_s13 + $0x8] sm:$0xff] }
0x1ffc   :  { %2892 = vmatprep.subr.mxu1 %v2465_v29 }
0x1ffd   :  { %2893 = vmatpush3.msra.mxu1 %v2465_v29  ;;  %v2455_v29 = vld [vmem:[%s4131_s13] sm:$0xff] }
0x2002   :  { %2754 = vmatmul.mubr.msk.bf16.gmra.mxu1 %vm130_vm0, %v1932_v62  ;;  %v2985_v62 = vld [vmem:[%s4129_s11 + $0x70] sm:$0xff]  }
0x2003   :  { %2212 = vmatprep.mubr.bf16.mxu1 %v3261_v1  ;;  %2792 = vmatprep.subr.bf16.mxu0 %v2985_v62 }
0x2004   :  { %2793 = vmatpush3.bf16.msra.mxu0 %v2986_v63 }
0x20a2   :  { %v1876_v51 = vpop.f32.mrf.mxu1 }
0x20a3   :  { %v1883_v53 = vadd.f32 %v1876_v51, %v1202_v50  ;;  %v3999_v51 = vrot.slane %v2086_v43, %v3438_v17 }
0x20a4   :  { %v1878_v54 = vpop.f32.mrf.mxu1 }
0x20a5   :  { %v3907_v55 = vadd.f32 %v1878_v54, %v1204_v52  ;;  %v2733_v61 = vmul.f32 -1.442695, %v1883_v53 }
0x20a6   :  { %v1880_v56 = vpop.f32.mrf.mxu1 }
0x20a7   :  { %3179 = vtanh.f32 %v3907_v55  ;;  %v2734_v47 = vmul.f32 -1.442695, %v3907_v55 }
0x20a8   :  { %v1881_v58 = vpop.f32.mrf.mxu1  ;;  %3181 = vpow2.f32 %v2733_v61 }
0x20b2   :  { %v2184_v33 = vpop.f32.mrf.mxu1 }
0x20b3   :  { %v2185_v58 = vadd.f32 %v2184_v33, %v3999_v51 }
0x20b4   :  { %v3180_v59 = vpop.eup %3179  ;;  %v2186_v44 = vpop.f32.mrf.mxu1 }
0x20b5   :  { %1900 = vrot.lane.b32.xlu1 %v3180_v59, %s3262_s2  ;;  %v3182_v1 = vpop.eup %3181  ;;  %v2187_v53 = vadd.f32 %v2186_v44, %v3995_v48 }
0x20b6   :  { %v1891_v19 = vadd.f32 1.0, %v3182_v1  ;;  %v2188_v5 = vpop.f32.mrf.mxu1 }
0x20b7   :  { %v2189_v55 = vadd.f32 %v2188_v5, %v3999_v51  ;;  %v2224_v17 = vmax.f32 %v2187_v53, 0.0 }
0x20b8   :  { %3183 = vrcp.f32 %v1891_v19  ;;  %v2190_v6 = vpop.f32.mrf.mxu1 }
0x20b9   :  { %v2191_v50 = vadd.f32 %v2190_v6, %v3995_v48  ;;  %v2225_v1 = vmax.f32 %v2189_v55, 0.0 }
0x20ba   :  { %v2194_v34 = vpop.f32.mrf.mxu1 }
0x20bb   :  { %v2226_v20 = vmax.f32 %v2191_v50, 0.0 }
0x20bc   :  { %v2196_v32 = vpop.f32.mrf.mxu1 }
0x20bd   :  { %v2197_v61 = vadd.f32 %v2196_v32, %v3995_v48  ;;  %v2240_v19 = vpack.c.bf16 %v2226_v20, %v2224_v17 }
0x20be   :  { %v2198_v2 = vpop.f32.mrf.mxu1 }
0x20bf   :  { %v2228_v62 = vmax.f32 %v2197_v61, 0.0 }
0x20c0   :  { %v2200_v23 = vpop.f32.mrf.mxu1 }
0x20c1   :  { %v2201_v56 = vadd.f32 %v2200_v23, %v3995_v48  ;;  %v4059_v23 = vld [vmem:[%s4130_s12] ss:$0 sm:$0xff] }
0x20c2   :  { %v2204_v45 = vpop.f32.mrf.mxu1 }
0x20c4   :  { %v2206_v52 = vpop.f32.mrf.mxu1 }
0x20c5   :  { %v3184_v57 = vpop.eup %3183 }
0x20c6   :  { %v1898_v11 = vmul.f32 %v3184_v57, %v3879_v4  ;;  %v2464_v4 = vld [vmem:[%s4131_s13 + $0x48] sm:$0xff]  ;;  %v2208_v59 = vpop.f32.mrf.mxu1 }
0x20c7   :  { %2894 = vmatprep.subr.mxu1 %v2464_v4 }
0x20c8   :  { %2895 = vmatpush3.msra.mxu1 %v2464_v4  ;;  %v2210_v60 = vpop.f32.mrf.mxu1  ;;  %v2872_v4 = vpop.f32.mrf.mxu0 }
0x20c9   :  { %2896 = vmatprep.subr.mxu1 %v2463_v30 }
0x20ca   :  { %2897 = vmatpush3.msra.mxu1 %v2463_v30  ;;  %v4042_v30 = vpop.f32.mrf.mxu0 }
0x2127   :  { %v1901_v38 = vpop.permute.xlu1 %1900 }
0x2128   :  { %v1903_v46 = vmul.f32 %v3184_v57, %v1901_v38  ;;  %v2230_v57 = vmax.f32 %v2201_v56, 0.0 }
0x212a   :  { %1905 = vrot.lane.b32.xlu0 %v1903_v46, %s3262_s2  ;;  %v2223_v46 = vmax.f32 %v2185_v58, 0.0 }
0x212c   :  { %v2239_v63 = vpack.c.bf16 %v2225_v1, %v2223_v46 }
0x212e   :  { %1045 = vrot.lane.b32.xlu0 %v3710_v35, %s3262_s2  ;;  %v2987_v35 = vld [vmem:[%s4129_s11 + $0x68] sm:$0xff]  }
0x212f   :  { %2794 = vmatprep.subr.bf16.mxu0 %v2987_v35  ;;  %v2199_v35 = vadd.f32 %v2198_v2, %v3999_v51 }
0x2130   :  { %2795 = vmatpush3.bf16.msra.mxu0 %v2988_v7  ;;  %v2242_v7 = vpack.c.bf16 %v2230_v57, %v2228_v62 }
0x2131   :  { %2796 = vmatprep.subr.bf16.mxu0 %v2989_v9  ;;  %v2211_v9 = vadd.f32 %v2210_v60, %v3995_v48 }
0x2134   :  { %2797 = vmatpush3.bf16.msra.mxu0 %v2990_v10  ;;  %v2195_v10 = vadd.f32 %v2194_v34, %v3999_v51 }
0x2135   :  { %2798 = vmatprep.subr.bf16.mxu0 %v2991_v13  ;;  %v2207_v13 = vadd.f32 %v2206_v52, %v3995_v48 }
0x2138   :  { %2799 = vmatpush3.bf16.msra.mxu0 %v2992_v14  ;;  %v2229_v14 = vmax.f32 %v2199_v35, 0.0 }
0x2139   :  { %2800 = vmatprep.subr.bf16.mxu0 %v2993_v41 }
0x213c   :  { %2801 = vmatpush3.bf16.msra.mxu0 %v2994_v16  ;;  %v2205_v16 = vadd.f32 %v2204_v45, %v3999_v51 }
0x213d   :  { %2802 = vmatprep.subr.bf16.mxu0 %v2995_v18 }
0x2140   :  { %2803 = vmatpush3.bf16.msra.mxu0 %v2996_v21  ;;  %v2231_v21 = vmax.f32 %v2205_v16, 0.0 }
0x2141   :  { %2804 = vmatprep.subr.bf16.mxu0 %v2997_v22 }
0x2144   :  { %2805 = vmatpush3.bf16.msra.mxu0 %v2998_v24  ;;  %v2462_v24 = vld [vmem:[%s4131_s13 + $0x38] sm:$0xff] }
0x2145   :  { %2898 = vmatprep.subr.mxu1 %v2462_v24 }
0x2146   :  { %2899 = vmatpush3.msra.mxu1 %v2462_v24 }
0x219c   :  { %v1906_v40 = vpop.permute.xlu0 %1905 }
0x219d   :  { %v1908_v42 = vadd.f32 %v1906_v40, %v1898_v11  ;;  %v2227_v11 = vmax.f32 %v2195_v10, 0.0  ;;  %v2232_v40 = vmax.f32 %v2207_v13, 0.0 }
0x219f   :  { %3185 = vtanh.f32 %v1908_v42 }
0x21a0   :  { %v1046_v15 = vpop.permute.xlu0 %1045  ;;  %3187 = vpow2.f32 %v2734_v47  ;;  %v4044_v47 = vpop.f32.mrf.mxu0 }
0x21a1   :  { %1048 = vst.msk [vmem:[#allocation3] sm:$0xff] %vm130_vm0, %v1046_v15  ;;  %v2209_v15 = vadd.f32 %v2208_v59, %v3999_v51 }
0x21a2   :  { %v4046_v33 = vpop.f32.mrf.mxu0 }
0x21a3   :  { %v2233_v18 = vmax.f32 %v2209_v15, 0.0 }
0x21a4   :  { %v4048_v44 = vpop.f32.mrf.mxu0 }
0x21a5   :  { %v2243_v22 = vpack.c.bf16 %v2233_v18, %v2231_v21  ;;  %v2735_v18 = vld [vmem:[%s4126_s8] ss:$0 sm:$0xff] }
0x21a6   :  { %v4050_v5 = vpop.f32.mrf.mxu0  ;;  %v2045_v21 = vadd.f32 %v2872_v4, %v2735_v18 }
0x21ac   :  { %v3186_v25 = vpop.eup %3185 }
0x21ad   :  { %1911 = vrot.lane.b32.xlu1 %v3186_v25, %s3262_s2  ;;  %v3188_v8 = vpop.eup %3187  ;;  %v2461_v25 = vld [vmem:[%s4131_s13 + $0x30] sm:$0xff] }
0x21ae   :  { %v1892_v12 = vadd.f32 1.0, %v3188_v8  ;;  %2900 = vmatprep.subr.mxu1 %v2461_v25 }
0x21af   :  { %2901 = vmatpush3.msra.mxu1 %v2461_v25  ;;  %v2773_v25 = vld [vmem:[%s4132_s14] ss:$0 sm:$0xff] }
0x21b0   :  { %3189 = vrcp.f32 %v1892_v12  ;;  %2902 = vmatprep.subr.mxu1 %v2460_v26 }
0x21b1   :  { %1918 = vrot.lane.b32.xlu1 %v1908_v42, %s3262_s2  ;;  %v2241_v42 = vpack.c.bf16 %v2229_v14, %v2227_v11  ;;  %2903 = vmatpush3.msra.mxu1 %v2460_v26  ;;  %v2040_v26 = vadd.f32 %v2735_v18, %v4042_v30  ;;  %v2055_v30 = vadd.f32 %v4044_v47, %v2735_v18 }
0x21b2   :  { %2904 = vmatprep.subr.mxu1 %v2459_v27 }
0x21b3   :  { %2905 = vmatpush3.msra.mxu1 %v2459_v27 }
0x21b4   :  { %2906 = vmatprep.subr.mxu1 %v2458_v36 }
0x21b5   :  { %2907 = vmatpush3.msra.mxu1 %v2458_v36 }
0x21b6   :  { %2908 = vmatprep.subr.mxu1 %v2457_v28 }
0x21b7   :  { %2909 = vmatpush3.msra.mxu1 %v2457_v28 }
0x21b8   :  { %2910 = vmatprep.subr.mxu1 %v2456_v37 }
0x21b9   :  { %2911 = vmatpush3.msra.mxu1 %v2456_v37 }
0x21ba   :  { %2912 = vmatprep.subr.mxu1 %v2455_v29 }
0x21bb   :  { %2913 = vmatpush3.msra.mxu1 %v2455_v29 }
0x21bd   :  { %v3190_v3 = vpop.eup %3189 }
0x221f   :  { %v1912_v0 = vpop.permute.xlu1 %1911 }
0x2220   :  { %v1914_v49 = vmul.f32 %v3190_v3, %v1912_v0 }
0x2222   :  { %1915 = vst.msk [vmem:[#allocation7 + $0x38] sm:$0xff] %vm130_vm0, %v1914_v49  ;;  %1916 = vst.msk [vmem:[#allocation4] sm:$0xff] %vm130_vm0, %v1914_v49 }
0x2223   :  { %v1919_v54 = vpop.permute.xlu1 %1918 }
0x2224   :  { %1921 = vst.msk [vmem:[#allocation5] sm:$0xff] %vm130_vm0, %v1919_v54 }
0x2229   :  { %v1929_v38 = vld [vmem:[#allocation7 + $0x38] sm:$0xff] }
0x222a   :  { %v1933_v39 = vpack.c.bf16 %v1929_v38, %v3886_v31  ;;  %2880 = vmatmul.mubr.msk.f32.gmra.mxu0 %vm130_vm0, %v1929_v38  ;;  %v2234_v31 = vmax.f32 %v2211_v9, 0.0 }
0x222b   :  { %2414 = vmatprep.mubr.bf16.mxu0 %v2240_v19 }
0x222c   :  { %2755 = vmatmul.mubr.msk.bf16.gmra.mxu1 %vm130_vm0, %v1933_v39  ;;  %v2244_v41 = vpack.c.bf16 %v2234_v31, %v2232_v40 }
0x222e   :  { %2415 = vmatmul.mubr.bf16.vlgmr.msra.gmra.mxu0 %v2239_v63 }
0x222f   :  { %2422 = vmatprep.mubr.bf16.mxu0 %v2242_v7 }
0x2236   :  { %2423 = vmatmul.mubr.bf16.gmra.mxu0 %v2241_v42 }
0x2237   :  { %2430 = vmatprep.mubr.bf16.mxu0 %v2244_v41 }
0x223e   :  { %2431 = vmatmul.mubr.bf16.gmra.mxu0 %v2243_v22 }
0x22ea   :  { %v4052_v6 = vpop.f32.mrf.mxu0 }
0x22ec   :  { %v4054_v8 = vpop.f32.mrf.mxu0  ;;  %v2214_v12 = vpop.f32.mrf.mxu1 }
0x22ed   :  { %v2215_v49 = vadd.f32 %v2214_v12, %v3999_v51 }
0x22ee   :  { %v2216_v34 = vpop.f32.mrf.mxu1  ;;  %v2806_v32 = vpop.f32.mrf.mxu0 }
0x22ef   :  { %v2217_v45 = vadd.f32 %v2216_v34, %v3995_v48  ;;  %v2235_v61 = vmax.f32 %v2215_v49, 0.0  ;;  %v2050_v49 = vadd.f32 %v2735_v18, %v4046_v33 }
0x22f0   :  { %v2218_v2 = vpop.f32.mrf.mxu1  ;;  %v2807_v43 = vpop.f32.mrf.mxu0 }
0x22f1   :  { %v2219_v3 = vadd.f32 %v2218_v2, %v3999_v51  ;;  %v2808_v0 = vadd.f32 %v2807_v43, %v2806_v32  ;;  %v2236_v56 = vmax.f32 %v2217_v45, 0.0 }
0x22f2   :  { %v2220_v50 = vpop.f32.mrf.mxu1  ;;  %v2809_v52 = vpop.f32.mrf.mxu0 }
0x22f3   :  { %v2417_v53 = vadd.f32 %v2808_v0, %v4059_v23  ;;  %v2221_v54 = vadd.f32 %v2220_v50, %v3995_v48  ;;  %v2237_v55 = vmax.f32 %v2219_v3, 0.0 }
0x22f4   :  { %v2810_v20 = vpop.f32.mrf.mxu0 }
0x22f5   :  { %v2447_v58 = vmax.f32 %v2417_v53, 0.0  ;;  %v2238_v59 = vmax.f32 %v2221_v54, 0.0  ;;  %v2811_v17 = vadd.f32 %v2810_v20, %v2809_v52  ;;  %v2245_v38 = vpack.c.bf16 %v2237_v55, %v2235_v61 }
0x22f6   :  { %v2812_v1 = vpop.f32.mrf.mxu0  ;;  %v2065_v20 = vadd.f32 %v4048_v44, %v2735_v18  ;;  %v2075_v44 = vadd.f32 %v4052_v6, %v2735_v18 }
0x22f7   :  { %v2246_v19 = vpack.c.bf16 %v2238_v59, %v2236_v56  ;;  %v2420_v57 = vadd.f32 %v2811_v17, %v4059_v23  ;;  %2914 = vmatprep.mubr.f32.mxu1 %v2447_v58 }
0x22f8   :  { %v2813_v51 = vpop.f32.mrf.mxu0 }
0x22f9   :  { %v2448_v46 = vmax.f32 %v2420_v57, 0.0  ;;  %v2814_v60 = vadd.f32 %v2813_v51, %v2812_v1  ;;  %2438 = vmatprep.mubr.bf16.mxu0 %v2246_v19 }
0x22fa   :  { %v2815_v39 = vpop.f32.mrf.mxu0  ;;  %2439 = vmatmul.mubr.bf16.gmra.mxu0 %v2245_v38 }
0x22fb   :  { %v2425_v48 = vadd.f32 %v2814_v60, %v4059_v23  ;;  %2915 = vmatmul.mubr.f32.vlgmr.msra.gmra.mxu1 %v2448_v46 }
0x22fc   :  { %v2816_v62 = vpop.f32.mrf.mxu0 }
0x22fd   :  { %v2449_v63 = vmax.f32 %v2425_v48, 0.0  ;;  %v2817_v35 = vadd.f32 %v2816_v62, %v2815_v39 }
0x22fe   :  { %v2818_v7 = vpop.f32.mrf.mxu0 }
0x22ff   :  { %v2428_v9 = vadd.f32 %v2817_v35, %v4059_v23  ;;  %2917 = vmatprep.mubr.f32.mxu1 %v2449_v63 }
0x2300   :  { %v2819_v10 = vpop.f32.mrf.mxu0 }
0x2301   :  { %v2450_v13 = vmax.f32 %v2428_v9, 0.0  ;;  %v2820_v14 = vadd.f32 %v2819_v10, %v2818_v7 }
0x2302   :  { %v2821_v31 = vpop.f32.mrf.mxu0 }
0x2303   :  { %v2433_v11 = vadd.f32 %v2820_v14, %v4059_v23  ;;  %2918 = vmatmul.mubr.f32.gmra.mxu1 %v2450_v13 }
0x2304   :  { %v2822_v40 = vpop.f32.mrf.mxu0 }
0x2305   :  { %v2451_v42 = vmax.f32 %v2433_v11, 0.0  ;;  %v2823_v15 = vadd.f32 %v2822_v40, %v2821_v31 }
0x2307   :  { %v2436_v41 = vadd.f32 %v2823_v15, %v4059_v23  ;;  %2920 = vmatprep.mubr.f32.mxu1 %v2451_v42 }
0x2309   :  { %v2452_v16 = vmax.f32 %v2436_v41, 0.0 }
0x230b   :  { %2921 = vmatmul.mubr.f32.gmra.mxu1 %v2452_v16 }
0x23ba   :  { %v2824_v22 = vpop.f32.mrf.mxu0 }
0x23bb   :  { %v2916_v24 = vpop.f32.mrf.mxu1 }
0x23bc   :  { %v2577_v27 = vadd.f32 %v2916_v24, %v2045_v21  ;;  %v2825_v36 = vpop.f32.mrf.mxu0 }
0x23bd   :  { %v2826_v28 = vadd.f32 %v2825_v36, %v2824_v22  ;;  %v2537_v37 = vpop.f32.mrf.mxu1 }
0x23be   :  { %v2592_v29 = vadd.f32 %v2773_v25, %v2577_v27  ;;  %v2576_v12 = vadd.f32 %v2537_v37, %v2040_v26  ;;  %v2827_v34 = vpop.f32.mrf.mxu0 }
0x23bf   :  { %v2441_v32 = vadd.f32 %v2826_v28, %v4059_v23 }
0x23c0   :  { %2601 = vst.msk [vmem:[%s4133_s15 + $0x8] sm:$0xff] %vm2599_vm3, %v2592_v29  ;;  %v2591_v4 = vadd.f32 %v2773_v25, %v2576_v12  ;;  %v2828_v2 = vpop.f32.mrf.mxu0 }
0x23c1   :  { %v2453_v43 = vmax.f32 %v2441_v32, 0.0  ;;  %v2829_v45 = vadd.f32 %v2828_v2, %v2827_v34 }
0x23c2   :  { %2600 = vst.msk [vmem:[%s4133_s15] sm:$0xff] %vm2599_vm3, %v2591_v4 }
0x23c3   :  { %v2444_v3 = vadd.f32 %v2829_v45, %v4059_v23  ;;  %v2919_v0 = vpop.f32.mrf.mxu1  ;;  %2923 = vmatprep.mubr.f32.mxu1 %v2453_v43  ;;  %v2060_v23 = vadd.f32 %v2735_v18, %v4050_v5  ;;  %v2070_v5 = vadd.f32 %v2735_v18, %v4054_v8 }
0x23c4   :  { %v2579_v50 = vadd.f32 %v2919_v0, %v2055_v30 }
0x23c5   :  { %v2454_v52 = vmax.f32 %v2444_v3, 0.0  ;;  %v2547_v53 = vpop.f32.mrf.mxu1 }
0x23c6   :  { %v2594_v54 = vadd.f32 %v2773_v25, %v2579_v50  ;;  %v2578_v55 = vadd.f32 %v2547_v53, %v2050_v49 }
0x23c7   :  { %2924 = vmatmul.mubr.f32.gmra.mxu1 %v2454_v52 }
0x23c8   :  { %2603 = vst.msk [vmem:[%s4133_s15 + $0x18] sm:$0xff] %vm2599_vm3, %v2594_v54  ;;  %v2593_v47 = vadd.f32 %v2773_v25, %v2578_v55 }
0x23ca   :  { %2602 = vst.msk [vmem:[%s4133_s15 + $0x10] sm:$0xff] %vm2599_vm3, %v2593_v47 }
0x23cb   :  { %v2922_v33 = vpop.f32.mrf.mxu1 }
0x23cc   :  { %v2581_v56 = vadd.f32 %v2922_v33, %v2065_v20 }
0x23cd   :  { %v2557_v58 = vpop.f32.mrf.mxu1 }
0x23ce   :  { %v2596_v59 = vadd.f32 %v2773_v25, %v2581_v56  ;;  %v2580_v17 = vadd.f32 %v2557_v58, %v2060_v23 }
0x23d0   :  { %2605 = vst.msk [vmem:[%s4133_s15 + $0x28] sm:$0xff] %vm2599_vm3, %v2596_v59  ;;  %v2595_v61 = vadd.f32 %v2773_v25, %v2580_v17 }
0x23d2   :  { %2604 = vst.msk [vmem:[%s4133_s15 + $0x20] sm:$0xff] %vm2599_vm3, %v2595_v61 }
0x2487   :  { %v2925_v1 = vpop.f32.mrf.mxu1 }
0x2488   :  { %v2583_v19 = vadd.f32 %v2925_v1, %v2075_v44 }
0x2489   :  { %v2567_v57 = vpop.f32.mrf.mxu1 }
0x248a   :  { %v2598_v38 = vadd.f32 %v2773_v25, %v2583_v19  ;;  %v2582_v51 = vadd.f32 %v2567_v57, %v2070_v5 }
0x248c   :  { %2607 = vst.msk [vmem:[%s4133_s15 + $0x38] sm:$0xff] %vm2599_vm3, %v2598_v38  ;;  %v2597_v46 = vadd.f32 %v2773_v25, %v2582_v51 }
0x248e   :  { %2606 = vst.msk [vmem:[%s4133_s15 + $0x30] sm:$0xff] %vm2599_vm3, %v2597_v46 }
0x248f   :  { %2626 = vsyncpa [#allocation9], 1 }
0x2490   :  { %2627 = vsyncpa [#allocation11], 1 }

</bundles_post_ra>
